<compile_context>
chip_gen: v6e
topology: v6e:2x2x1
jax: 0.10.0
libtpu: 0.0.40
codegen_flags: <defaults>
</compile_context>

<pallas_src>
import functools

import jax
import jax.numpy as jnp
from jax.experimental import pallas as pl
from jax.experimental.pallas import tpu as pltpu


def _elu(v):
    # nn.ELU(alpha=1.0): x if x > 0 else exp(x) - 1.
    # exp is taken on the clamped-negative branch only -> no inf in dead lanes.
    return jnp.where(v > 0, v, jnp.exp(jnp.minimum(v, 0.0)) - 1.0)


def autoencoder_kernel(x_ref,
                       w1_ref, w2_ref, w3_ref, w4_ref, w5_ref, w6_ref,
                       b_ref,
                       xrec_ref, h_ref):
    def dense(a, w_ref, layer):
        out_d = w_ref.shape[-1]
        y = jnp.dot(a.astype(jnp.bfloat16), w_ref[...],
                    preferred_element_type=jnp.float32)
        return y + b_ref[layer:layer + 1, :out_d]     # (1, out_d) f32 bias row

    x = x_ref[...]                                    # (TILE_B, 784) bf16

    # ----- encoder -----
    a = _elu(dense(x, w1_ref, 0))
    a = _elu(dense(a, w2_ref, 1))
    h = dense(a, w3_ref, 2)                           # latent, f32

    # ----- decoder -----
    d = _elu(dense(h, w4_ref, 3))
    d = _elu(dense(d, w5_ref, 4))
    logits = dense(d, w6_ref, 5)
    # Exact sigmoid via a single EUP tanh on the widest elementwise layer.
    xrec = 0.5 * jnp.tanh(0.5 * logits) + 0.5

    h_ref[...] = h.astype(h_ref.dtype)
    xrec_ref[...] = xrec.astype(xrec_ref.dtype)


def _round_up(n, m):
    return ((n + m - 1) // m) * m


@functools.partial(jax.jit, static_argnames=("max_tile", "min_steps"))
def autoencoder_forward(x, params, *, max_tile=512, min_steps=2):
    """x: (batch, input_dim) f32. params: 6 (W, b) pairs, W is (in, out), b is (out,)."""
    batch, input_dim = x.shape
    in_dims = [w.shape[0] for w, _ in params]
    out_dims = [w.shape[1] for w, _ in params]
    hidden_dim = out_dims[2]
    output_dim = out_dims[5]
    bias_rows = _round_up(len(params), 8)
    bias_cols = max(out_dims)

    # --- batch tiling: >= min_steps grid steps, tile a multiple of 16 (bf16-safe
    # sublane packing), padding only to the chosen tile (not a fixed 256-multiple).
    tile_b = max(16, min(max_tile, _round_up(pl.cdiv(batch, min_steps), 16)))
    b_pad = _round_up(batch, tile_b)
    n_tiles = b_pad // tile_b

    # --- operands: no feature padding; weights and x in bf16 (MXU-native, half DMA).
    w_bf16 = [w.astype(jnp.bfloat16) for w, _ in params]
    b_tab = jnp.zeros((bias_rows, bias_cols), jnp.float32)
    for i, (_, b) in enumerate(params):
        b_tab = b_tab.at[i, : b.size].set(b.reshape(-1).astype(jnp.float32))
    x_pad = jnp.pad(x.astype(jnp.bfloat16), ((0, b_pad - batch), (0, 0)))

    def row_spec(feat):
        return pl.BlockSpec((tile_b, feat), lambda i: (i, 0))

    def const_spec(shape):
        return pl.BlockSpec(shape, lambda i: (0, 0))

    # --- advisory cost estimate and a footprint-derived VMEM limit.
    flops = 2 * b_pad * sum(i * o for i, o in zip(in_dims, out_dims))
    transcendentals = b_pad * (out_dims[0] + out_dims[1] + out_dims[3]
                               + out_dims[4] + output_dim)
    bytes_accessed = (x_pad.size * 2 + sum(w.size * 2 for w in w_bf16)
                      + b_tab.size * 4 + b_pad * (output_dim + hidden_dim) * 4)

    weight_bytes = sum(w.size * 2 for w in w_bf16) + b_tab.size * 4
    io_bytes = 2 * tile_b * (input_dim * 2 + output_dim * 4 + hidden_dim * 4)  # double-buffered
    scratch_bytes = 8 * tile_b * 1024                                          # intermediates headroom
    vmem_limit = int(min(max(2 * weight_bytes + io_bytes + scratch_bytes, 8 << 20),
                         40 << 20))                                            # v7x: 64 MiB/TC cap

    xrec_p, h_p = pl.pallas_call(
        autoencoder_kernel,
        out_shape=(
            jax.ShapeDtypeStruct((b_pad, output_dim), jnp.float32),
            jax.ShapeDtypeStruct((b_pad, hidden_dim), jnp.float32),
        ),
        grid_spec=pltpu.PrefetchScalarGridSpec(
            num_scalar_prefetch=0,
            grid=(n_tiles,),
            in_specs=[row_spec(input_dim)]
                     + [const_spec(w.shape) for w in w_bf16]
                     + [const_spec(b_tab.shape)],
            out_specs=(row_spec(output_dim), row_spec(hidden_dim)),
        ),
        compiler_params=pltpu.CompilerParams(
            dimension_semantics=("parallel",),
            vmem_limit_bytes=vmem_limit,
        ),
        cost_estimate=pl.CostEstimate(
            flops=flops,
            transcendentals=transcendentals,
            bytes_accessed=bytes_accessed,
        ),
    )(x_pad, *w_bf16, b_tab)

    # Slice away batch padding only (no feature padding was added).
    return xrec_p[:batch], h_p[:batch]


def init_linear(key, in_dim, out_dim):
    # Mirrors nn.Linear's uniform(-1/sqrt(in), 1/sqrt(in)) init.
    kw, kb = jax.random.split(key)
    bound = 1.0 / jnp.sqrt(jnp.float32(in_dim))
    w = jax.random.uniform(kw, (in_dim, out_dim), jnp.float32, -bound, bound)
    b = jax.random.uniform(kb, (out_dim,), jnp.float32, -bound, bound)
    return w, b


def make_params(key, input_dim, output_dim, hidden_dim):
    dims = [
        (input_dim, 128), (128, 64), (64, hidden_dim),    # encoder
        (hidden_dim, 64), (64, 128), (128, output_dim),   # decoder
    ]
    keys = jax.random.split(key, len(dims))
    return [init_linear(k, i, o) for k, (i, o) in zip(keys, dims)]


def reference_forward(x, params):
    # Pure-JAX reference with the same bf16-input / f32-accumulate matmul path.
    def elu(v):
        return jnp.where(v > 0, v, jnp.exp(jnp.minimum(v, 0.0)) - 1.0)

    def dense(a, w, b):
        return jnp.dot(a.astype(jnp.bfloat16), w.astype(jnp.bfloat16),
                       preferred_element_type=jnp.float32) + b

    (w1, b1), (w2, b2), (w3, b3), (w4, b4), (w5, b5), (w6, b6) = params
    a = elu(dense(x, w1, b1))
    a = elu(dense(a, w2, b2))
    h = dense(a, w3, b3)
    d = elu(dense(h, w4, b4))
    d = elu(dense(d, w5, b5))
    xrec = jax.nn.sigmoid(dense(d, w6, b6))
    return xrec, h


if __name__ == "__main__":
    batch = 300          # not a multiple of the tile -> exercises minimal batch padding
    input_dim = 784      # flattened 28x28 MNIST image
    output_dim = 784     # reconstruction
    hidden_dim = 32      # latent size

    key = jax.random.PRNGKey(0)
    k_x, k_p = jax.random.split(key)
    x = jax.random.uniform(k_x, (batch, input_dim), jnp.float32)
    params = make_params(k_p, input_dim, output_dim, hidden_dim)

    xrec, h = autoencoder_forward(x, params)
    jax.block_until_ready((xrec, h))

    xrec_ref, h_ref = reference_forward(x, params)
    assert xrec.shape == (batch, output_dim) and h.shape == (batch, hidden_dim)
    assert jnp.allclose(h, h_ref, atol=5e-3, rtol=5e-3)
    assert jnp.allclose(xrec, xrec_ref, atol=5e-3, rtol=5e-3)

    print("KERNEL_OK")
</pallas_src>

<mosaic_0001>
module attributes {stable_mosaic.version = 11 : i64} {
  func.func @autoencoder_kernel(%arg0: i32, %arg1: memref<160x784xbf16, #tpu.memory_space<vmem>>, %arg2: memref<784x128xbf16, #tpu.memory_space<vmem>>, %arg3: memref<128x64xbf16, #tpu.memory_space<vmem>>, %arg4: memref<64x32xbf16, #tpu.memory_space<vmem>>, %arg5: memref<32x64xbf16, #tpu.memory_space<vmem>>, %arg6: memref<64x128xbf16, #tpu.memory_space<vmem>>, %arg7: memref<128x784xbf16, #tpu.memory_space<vmem>>, %arg8: memref<8x784xf32, #tpu.memory_space<vmem>>, %arg9: memref<160x784xf32, #tpu.memory_space<vmem>>, %arg10: memref<160x32xf32, #tpu.memory_space<vmem>>) attributes {dimension_semantics = [#tpu.dimension_semantics<parallel>], iteration_bounds = array<i64: 2>, scalar_prefetch = 0 : i64, scratch_operands = 0 : i64, tpu.core_type = #tpu.core_type<tc>, window_params = [{transform_indices = @transform_0, window_bounds = array<i64: 160, 784>}, {pipeline_mode = #tpu.pipeline_mode<synchronous>, transform_indices = @transform_1, window_bounds = array<i64: 784, 128>}, {pipeline_mode = #tpu.pipeline_mode<synchronous>, transform_indices = @transform_2, window_bounds = array<i64: 128, 64>}, {pipeline_mode = #tpu.pipeline_mode<synchronous>, transform_indices = @transform_3, window_bounds = array<i64: 64, 32>}, {pipeline_mode = #tpu.pipeline_mode<synchronous>, transform_indices = @transform_4, window_bounds = array<i64: 32, 64>}, {pipeline_mode = #tpu.pipeline_mode<synchronous>, transform_indices = @transform_5, window_bounds = array<i64: 64, 128>}, {pipeline_mode = #tpu.pipeline_mode<synchronous>, transform_indices = @transform_6, window_bounds = array<i64: 128, 784>}, {pipeline_mode = #tpu.pipeline_mode<synchronous>, transform_indices = @transform_7, window_bounds = array<i64: 8, 784>}, {transform_indices = @transform_8, window_bounds = array<i64: 160, 784>}, {transform_indices = @transform_9, window_bounds = array<i64: 160, 32>}]} {
    %c0 = arith.constant 0 : index
    %c0_0 = arith.constant 0 : index
    %0 = vector.load %arg1[%c0, %c0_0] : memref<160x784xbf16, #tpu.memory_space<vmem>>, vector<160x784xbf16>
    %c0_1 = arith.constant 0 : index
    %c0_2 = arith.constant 0 : index
    %1 = vector.load %arg2[%c0_1, %c0_2] : memref<784x128xbf16, #tpu.memory_space<vmem>>, vector<784x128xbf16>
    %cst = arith.constant dense<0.000000e+00> : vector<160x128xf32>
    %2 = tpu.matmul %0, %1, %cst {dimension_numbers = #tpu.dot_dimension_numbers<[1], [0], [0], [1], [0, 0, 1, 1], [], []>} : vector<160x784xbf16>, vector<784x128xbf16>, vector<160x128xf32> -> vector<160x128xf32>
    %c0_3 = arith.constant 0 : index
    %c0_4 = arith.constant 0 : index
    %3 = vector.load %arg8[%c0_3, %c0_4] : memref<8x784xf32, #tpu.memory_space<vmem>>, vector<1x128xf32>
    %4 = vector.broadcast %3 : vector<1x128xf32> to vector<160x128xf32>
    %5 = arith.addf %2, %4 : vector<160x128xf32>
    %cst_5 = arith.constant 0.000000e+00 : f32
    %6 = vector.broadcast %cst_5 : f32 to vector<160x128xf32>
    %7 = arith.cmpf ogt, %5, %6 : vector<160x128xf32>
    %cst_6 = arith.constant 0.000000e+00 : f32
    %8 = vector.broadcast %cst_6 : f32 to vector<160x128xf32>
    %9 = arith.minimumf %5, %8 : vector<160x128xf32>
    %10 = math.exp %9 : vector<160x128xf32>
    %cst_7 = arith.constant 1.000000e+00 : f32
    %11 = vector.broadcast %cst_7 : f32 to vector<160x128xf32>
    %12 = arith.subf %10, %11 : vector<160x128xf32>
    %13 = arith.select %7, %5, %12 : vector<160x128xi1>, vector<160x128xf32>
    %14 = arith.truncf %13 : vector<160x128xf32> to vector<160x128xbf16>
    %c0_8 = arith.constant 0 : index
    %c0_9 = arith.constant 0 : index
    %15 = vector.load %arg3[%c0_8, %c0_9] : memref<128x64xbf16, #tpu.memory_space<vmem>>, vector<128x64xbf16>
    %cst_10 = arith.constant dense<0.000000e+00> : vector<160x64xf32>
    %16 = tpu.matmul %14, %15, %cst_10 {dimension_numbers = #tpu.dot_dimension_numbers<[1], [0], [0], [1], [0, 0, 1, 1], [], []>} : vector<160x128xbf16>, vector<128x64xbf16>, vector<160x64xf32> -> vector<160x64xf32>
    %c1 = arith.constant 1 : index
    %c0_11 = arith.constant 0 : index
    %17 = vector.load %arg8[%c1, %c0_11] : memref<8x784xf32, #tpu.memory_space<vmem>>, vector<1x64xf32>
    %18 = vector.broadcast %17 : vector<1x64xf32> to vector<160x64xf32>
    %19 = arith.addf %16, %18 : vector<160x64xf32>
    %cst_12 = arith.constant 0.000000e+00 : f32
    %20 = vector.broadcast %cst_12 : f32 to vector<160x64xf32>
    %21 = arith.cmpf ogt, %19, %20 : vector<160x64xf32>
    %cst_13 = arith.constant 0.000000e+00 : f32
    %22 = vector.broadcast %cst_13 : f32 to vector<160x64xf32>
    %23 = arith.minimumf %19, %22 : vector<160x64xf32>
    %24 = math.exp %23 : vector<160x64xf32>
    %cst_14 = arith.constant 1.000000e+00 : f32
    %25 = vector.broadcast %cst_14 : f32 to vector<160x64xf32>
    %26 = arith.subf %24, %25 : vector<160x64xf32>
    %27 = arith.select %21, %19, %26 : vector<160x64xi1>, vector<160x64xf32>
    %28 = arith.truncf %27 : vector<160x64xf32> to vector<160x64xbf16>
    %c0_15 = arith.constant 0 : index
    %c0_16 = arith.constant 0 : index
    %29 = vector.load %arg4[%c0_15, %c0_16] : memref<64x32xbf16, #tpu.memory_space<vmem>>, vector<64x32xbf16>
    %cst_17 = arith.constant dense<0.000000e+00> : vector<160x32xf32>
    %30 = tpu.matmul %28, %29, %cst_17 {dimension_numbers = #tpu.dot_dimension_numbers<[1], [0], [0], [1], [0, 0, 1, 1], [], []>} : vector<160x64xbf16>, vector<64x32xbf16>, vector<160x32xf32> -> vector<160x32xf32>
    %c2 = arith.constant 2 : index
    %c0_18 = arith.constant 0 : index
    %31 = vector.load %arg8[%c2, %c0_18] : memref<8x784xf32, #tpu.memory_space<vmem>>, vector<1x32xf32>
    %32 = vector.broadcast %31 : vector<1x32xf32> to vector<160x32xf32>
    %33 = arith.addf %30, %32 : vector<160x32xf32>
    %34 = arith.truncf %33 : vector<160x32xf32> to vector<160x32xbf16>
    %c0_19 = arith.constant 0 : index
    %c0_20 = arith.constant 0 : index
    %35 = vector.load %arg5[%c0_19, %c0_20] : memref<32x64xbf16, #tpu.memory_space<vmem>>, vector<32x64xbf16>
    %cst_21 = arith.constant dense<0.000000e+00> : vector<160x64xf32>
    %36 = tpu.matmul %34, %35, %cst_21 {dimension_numbers = #tpu.dot_dimension_numbers<[1], [0], [0], [1], [0, 0, 1, 1], [], []>} : vector<160x32xbf16>, vector<32x64xbf16>, vector<160x64xf32> -> vector<160x64xf32>
    %c3 = arith.constant 3 : index
    %c0_22 = arith.constant 0 : index
    %37 = vector.load %arg8[%c3, %c0_22] : memref<8x784xf32, #tpu.memory_space<vmem>>, vector<1x64xf32>
    %38 = vector.broadcast %37 : vector<1x64xf32> to vector<160x64xf32>
    %39 = arith.addf %36, %38 : vector<160x64xf32>
    %cst_23 = arith.constant 0.000000e+00 : f32
    %40 = vector.broadcast %cst_23 : f32 to vector<160x64xf32>
    %41 = arith.cmpf ogt, %39, %40 : vector<160x64xf32>
    %cst_24 = arith.constant 0.000000e+00 : f32
    %42 = vector.broadcast %cst_24 : f32 to vector<160x64xf32>
    %43 = arith.minimumf %39, %42 : vector<160x64xf32>
    %44 = math.exp %43 : vector<160x64xf32>
    %cst_25 = arith.constant 1.000000e+00 : f32
    %45 = vector.broadcast %cst_25 : f32 to vector<160x64xf32>
    %46 = arith.subf %44, %45 : vector<160x64xf32>
    %47 = arith.select %41, %39, %46 : vector<160x64xi1>, vector<160x64xf32>
    %48 = arith.truncf %47 : vector<160x64xf32> to vector<160x64xbf16>
    %c0_26 = arith.constant 0 : index
    %c0_27 = arith.constant 0 : index
    %49 = vector.load %arg6[%c0_26, %c0_27] : memref<64x128xbf16, #tpu.memory_space<vmem>>, vector<64x128xbf16>
    %cst_28 = arith.constant dense<0.000000e+00> : vector<160x128xf32>
    %50 = tpu.matmul %48, %49, %cst_28 {dimension_numbers = #tpu.dot_dimension_numbers<[1], [0], [0], [1], [0, 0, 1, 1], [], []>} : vector<160x64xbf16>, vector<64x128xbf16>, vector<160x128xf32> -> vector<160x128xf32>
    %c4 = arith.constant 4 : index
    %c0_29 = arith.constant 0 : index
    %51 = vector.load %arg8[%c4, %c0_29] : memref<8x784xf32, #tpu.memory_space<vmem>>, vector<1x128xf32>
    %52 = vector.broadcast %51 : vector<1x128xf32> to vector<160x128xf32>
    %53 = arith.addf %50, %52 : vector<160x128xf32>
    %cst_30 = arith.constant 0.000000e+00 : f32
    %54 = vector.broadcast %cst_30 : f32 to vector<160x128xf32>
    %55 = arith.cmpf ogt, %53, %54 : vector<160x128xf32>
    %cst_31 = arith.constant 0.000000e+00 : f32
    %56 = vector.broadcast %cst_31 : f32 to vector<160x128xf32>
    %57 = arith.minimumf %53, %56 : vector<160x128xf32>
    %58 = math.exp %57 : vector<160x128xf32>
    %cst_32 = arith.constant 1.000000e+00 : f32
    %59 = vector.broadcast %cst_32 : f32 to vector<160x128xf32>
    %60 = arith.subf %58, %59 : vector<160x128xf32>
    %61 = arith.select %55, %53, %60 : vector<160x128xi1>, vector<160x128xf32>
    %62 = arith.truncf %61 : vector<160x128xf32> to vector<160x128xbf16>
    %c0_33 = arith.constant 0 : index
    %c0_34 = arith.constant 0 : index
    %63 = vector.load %arg7[%c0_33, %c0_34] : memref<128x784xbf16, #tpu.memory_space<vmem>>, vector<128x784xbf16>
    %cst_35 = arith.constant dense<0.000000e+00> : vector<160x784xf32>
    %64 = tpu.matmul %62, %63, %cst_35 {dimension_numbers = #tpu.dot_dimension_numbers<[1], [0], [0], [1], [0, 0, 1, 1], [], []>} : vector<160x128xbf16>, vector<128x784xbf16>, vector<160x784xf32> -> vector<160x784xf32>
    %c5 = arith.constant 5 : index
    %c0_36 = arith.constant 0 : index
    %65 = vector.load %arg8[%c5, %c0_36] : memref<8x784xf32, #tpu.memory_space<vmem>>, vector<1x784xf32>
    %66 = vector.broadcast %65 : vector<1x784xf32> to vector<160x784xf32>
    %67 = arith.addf %64, %66 : vector<160x784xf32>
    %cst_37 = arith.constant 5.000000e-01 : f32
    %68 = vector.broadcast %cst_37 : f32 to vector<160x784xf32>
    %69 = arith.mulf %68, %67 : vector<160x784xf32>
    %70 = math.tanh %69 : vector<160x784xf32>
    %cst_38 = arith.constant 5.000000e-01 : f32
    %71 = vector.broadcast %cst_38 : f32 to vector<160x784xf32>
    %72 = arith.mulf %71, %70 : vector<160x784xf32>
    %cst_39 = arith.constant 5.000000e-01 : f32
    %73 = vector.broadcast %cst_39 : f32 to vector<160x784xf32>
    %74 = arith.addf %72, %73 : vector<160x784xf32>
    %c0_40 = arith.constant 0 : index
    %c0_41 = arith.constant 0 : index
    %75 = vector.load %arg10[%c0_40, %c0_41] : memref<160x32xf32, #tpu.memory_space<vmem>>, vector<160x32xf32>
    tpu.vector_store %arg10[%c0_40, %c0_41], %33 {strides = array<i32>} : memref<160x32xf32, #tpu.memory_space<vmem>>, vector<160x32xf32>,
    %c0_42 = arith.constant 0 : index
    %c0_43 = arith.constant 0 : index
    %76 = vector.load %arg9[%c0_42, %c0_43] : memref<160x784xf32, #tpu.memory_space<vmem>>, vector<160x784xf32>
    tpu.vector_store %arg9[%c0_42, %c0_43], %74 {strides = array<i32>} : memref<160x784xf32, #tpu.memory_space<vmem>>, vector<160x784xf32>,
    return
  }
  func.func @transform_0(%arg0: i32) -> (i32, i32) {
    %c0_i32 = arith.constant 0 : i32
    %c0_i32_0 = arith.constant 0 : i32
    return %arg0, %c0_i32 : i32, i32
  }
  func.func @transform_1(%arg0: i32) -> (i32, i32) {
    %c0_i32 = arith.constant 0 : i32
    %c0_i32_0 = arith.constant 0 : i32
    %c0_i32_1 = arith.constant 0 : i32
    return %c0_i32, %c0_i32_0 : i32, i32
  }
  func.func @transform_2(%arg0: i32) -> (i32, i32) {
    %c0_i32 = arith.constant 0 : i32
    %c0_i32_0 = arith.constant 0 : i32
    %c0_i32_1 = arith.constant 0 : i32
    return %c0_i32, %c0_i32_0 : i32, i32
  }
  func.func @transform_3(%arg0: i32) -> (i32, i32) {
    %c0_i32 = arith.constant 0 : i32
    %c0_i32_0 = arith.constant 0 : i32
    %c0_i32_1 = arith.constant 0 : i32
    return %c0_i32, %c0_i32_0 : i32, i32
  }
  func.func @transform_4(%arg0: i32) -> (i32, i32) {
    %c0_i32 = arith.constant 0 : i32
    %c0_i32_0 = arith.constant 0 : i32
    %c0_i32_1 = arith.constant 0 : i32
    return %c0_i32, %c0_i32_0 : i32, i32
  }
  func.func @transform_5(%arg0: i32) -> (i32, i32) {
    %c0_i32 = arith.constant 0 : i32
    %c0_i32_0 = arith.constant 0 : i32
    %c0_i32_1 = arith.constant 0 : i32
    return %c0_i32, %c0_i32_0 : i32, i32
  }
  func.func @transform_6(%arg0: i32) -> (i32, i32) {
    %c0_i32 = arith.constant 0 : i32
    %c0_i32_0 = arith.constant 0 : i32
    %c0_i32_1 = arith.constant 0 : i32
    return %c0_i32, %c0_i32_0 : i32, i32
  }
  func.func @transform_7(%arg0: i32) -> (i32, i32) {
    %c0_i32 = arith.constant 0 : i32
    %c0_i32_0 = arith.constant 0 : i32
    %c0_i32_1 = arith.constant 0 : i32
    return %c0_i32, %c0_i32_0 : i32, i32
  }
  func.func @transform_8(%arg0: i32) -> (i32, i32) {
    %c0_i32 = arith.constant 0 : i32
    %c0_i32_0 = arith.constant 0 : i32
    return %arg0, %c0_i32 : i32, i32
  }
  func.func @transform_9(%arg0: i32) -> (i32, i32) {
    %c0_i32 = arith.constant 0 : i32
    %c0_i32_0 = arith.constant 0 : i32
    return %arg0, %c0_i32 : i32, i32
  }
}

</mosaic_0001>

<bundles_post_ra>
// kernel: autoencoder_forward.1
= control target key start
LH: loop header
LB: loop body
LE: loop exit
PB: predicated region body
PF: predicated region fallthrough
CT: control target
= control target key end

     0   :  { %s6171_s30 = smov 0   ;;  %s7798_s0 = inlined_call_operand.vmem [shape: bf16[320,784], index: 0, kind: input, shape index: {}]   ;;  %s7799_s1 = inlined_call_operand.vmem [shape: bf16[784,128], index: 1, kind: input, shape index: {}]   ;;  %s7800_s2 = inlined_call_operand.vmem [shape: bf16[128,64], index: 2, kind: input, shape index: {}]   ;;  %s7801_s3 = inlined_call_operand.vmem [shape: bf16[64,32], index: 3, kind: input, shape index: {}]   ;;  %s7802_s4 = inlined_call_operand.vmem [shape: bf16[32,64], index: 4, kind: input, shape index: {}]   ;;  %s7803_s5 = inlined_call_operand.vmem [shape: bf16[64,128], index: 5, kind: input, shape index: {}]   ;;  %s7804_s6 = inlined_call_operand.vmem [shape: bf16[128,784], index: 6, kind: input, shape index: {}]   ;;  %s7805_s7 = inlined_call_operand.vmem [shape: f32[8,784], index: 7, kind: input, shape index: {}]   ;;  %s7806_s8 = inlined_call_operand.vmem [shape: f32[320,784], index: 8, kind: output, shape index: {0}]   ;;  %s7807_s9 = inlined_call_operand.vmem [shape: f32[320,32], index: 9, kind: output, shape index: {1}]  }
   0x1 LB: > { %s4600_s10 = sadd.s32 4294967295, %s6118_s30   ;;  %p4604_p0 = scmp.ge.s32.totalorder %s6118_s30, 1  ;;  %s6118_s30 = sphi %s6171_s30, %s20_s30  }
   0x2   : > { %p292_p1 = scmp.lt.s32.totalorder %s6118_s30, 3 }
   0x4   : > { %p293_p2 = pnand %p4604_p0, %p292_p1 }
   0x5   : > { %s335_s18 = smul.u32 (!%p293_p2), 20, %s4600_s10 }
   0x6   : > { %296 = sbr.rel (%p293_p2) target bundleno = 1625 (0x659), region = 52 }
   0x7   : > { %p336_p3 = scmp.lt.s32.totalorder (!%p293_p2), %s335_s18, 39 }
   0xb   : > { %v5425_v0 = vld [vmem:[%s7799_s1 + $0x78] sm:$0xff]   ;;  %v5429_v4 = vld [vmem:[%s7799_s1 + $0x70] sm:$0xff]   ;;  %v5433_v8 = vld [vmem:[%s7799_s1 + $0x68] sm:$0xff]   ;;  %s7809_s18 = smov (!%p336_p3, %s335_s18), 39  ;;  %vm1179_vm0 = vcmask 130048  }
   0xc   : > { %v5426_v1 = vld [vmem:[%s7799_s1 + $0x38] sm:$0xff]   ;;  %4925 = vmatprep.subr.bf16.mxu0 %v5425_v0  ;;  %v5430_v5 = vld [vmem:[%s7799_s1 + $0x30] sm:$0xff]   ;;  %v5434_v9 = vld [vmem:[%s7799_s1 + $0x28] sm:$0xff]   ;;  %s5414_s24 = smul.u32 28, %s7809_s18  ;;  %s4607_s16 = sshll.u32 %s7809_s18, 3 }
   0xd   : > { %v5427_v2 = vld [vmem:[%s7799_s1 + $0xf8] sm:$0xff]   ;;  %4926 = vmatpush3.bf16.msra.mxu0 %v5426_v1  ;;  %v5431_v6 = vld [vmem:[%s7799_s1 + $0xf0] sm:$0xff]   ;;  %v5435_v10 = vld [vmem:[%s7799_s1 + $0xe8] sm:$0xff]   ;;  %s6699_s22 = scalar_lea.vmem %s7807_s9, %s4607_s16  ;;  %s5415_s14 = smul.u32 56, %s7809_s18 }
   0xe   : > { %v5428_v3 = vld [vmem:[%s7799_s1 + $0xb8] sm:$0xff]   ;;  %5001 = vmatprep.subr.bf16.mxu1 %v5427_v2  ;;  %4927 = vmatprep.subr.bf16.mxu0 %v5429_v4  ;;  %v5432_v7 = vld [vmem:[%s7799_s1 + $0xb0] sm:$0xff]   ;;  %v5436_v11 = vld [vmem:[%s7799_s1 + $0xa8] sm:$0xff]   ;;  %s6272_s15 = scalar_lea.vmem %s7798_s0, %s5414_s24 }
   0xf   : > { %5002 = vmatpush3.bf16.msra.mxu1 %v5428_v3  ;;  %v5437_v12 = vld [vmem:[%s7799_s1 + $0x60] sm:$0xff]   ;;  %v5441_v16 = vld [vmem:[%s7799_s1 + $0x58] sm:$0xff]   ;;  %v5445_v20 = vld [vmem:[%s7799_s1 + $0x50] sm:$0xff]   ;;  %s7259_s17 = scalar_lea.vmem %s7806_s8, %s5415_s14 }
  0x10   : > { %5003 = vmatprep.subr.bf16.mxu1 %v5431_v6  ;;  %v5438_v13 = vld [vmem:[%s7799_s1 + $0x20] sm:$0xff]   ;;  %v5442_v17 = vld [vmem:[%s7799_s1 + $0x18] sm:$0xff]   ;;  %v5446_v21 = vld [vmem:[%s7799_s1 + $0x10] sm:$0xff]  }
  0x11   : > { %4928 = vmatpush3.bf16.msra.mxu0 %v5430_v5  ;;  %v5439_v14 = vld [vmem:[%s7799_s1 + $0xe0] sm:$0xff]   ;;  %v5443_v18 = vld [vmem:[%s7799_s1 + $0xd8] sm:$0xff]   ;;  %v5447_v22 = vld [vmem:[%s7799_s1 + $0xd0] sm:$0xff]  }
  0x12   : > { %4929 = vmatprep.subr.bf16.mxu0 %v5433_v8  ;;  %v5440_v15 = vld [vmem:[%s7799_s1 + $0xa0] sm:$0xff]   ;;  %v5444_v19 = vld [vmem:[%s7799_s1 + $0x98] sm:$0xff]   ;;  %v5448_v23 = vld [vmem:[%s7799_s1 + $0x90] sm:$0xff]  }
  0x13   : > { %5004 = vmatpush3.bf16.msra.mxu1 %v5432_v7  ;;  %v5449_v24 = vld [vmem:[%s7799_s1 + $0x48] sm:$0xff]   ;;  %v5453_v28 = vld [vmem:[%s7799_s1 + $0x40] sm:$0xff]   ;;  %v5460_v34 = vld [vmem:[%s7799_s1 + $0x178] sm:$0xff]  }
  0x14   : > { %5005 = vmatprep.subr.bf16.mxu1 %v5435_v10  ;;  %v5450_v25 = vld [vmem:[%s7799_s1 + $0x8] sm:$0xff]   ;;  %v5454_v29 = vld [vmem:[%s7799_s1] sm:$0xff]   ;;  %v5464_v37 = vld [vmem:[%s7799_s1 + $0x138] sm:$0xff]  }
  0x15   : > { %4930 = vmatpush3.bf16.msra.mxu0 %v5434_v9  ;;  %v5451_v26 = vld [vmem:[%s7799_s1 + $0xc8] sm:$0xff]   ;;  %v5455_v30 = vld [vmem:[%s7799_s1 + $0xc0] sm:$0xff]   ;;  %v5465_v38 = vld [vmem:[%s6272_s15 + $0x3c] ss:$28 sps:$4 sm:$0xff]  }
  0x16   : > { %4931 = vmatprep.subr.bf16.mxu0 %v5437_v12  ;;  %v5452_v27 = vld [vmem:[%s7799_s1 + $0x88] sm:$0xff]   ;;  %v5456_v31 = vld [vmem:[%s6272_s15] ss:$28 sps:$4 sm:$0xff]   ;;  %v5467_v40 = vld [vmem:[%s6272_s15 + $0x38] ss:$28 sps:$4 sm:$0xff]  }
  0x17   : > { %5006 = vmatpush3.bf16.msra.mxu1 %v5436_v11  ;;  %v5458_v32 = vld [vmem:[%s6272_s15 + $0x4] ss:$28 sps:$4 sm:$0xff]   ;;  %v5463_v36 = vld [vmem:[%s6272_s15 + $0xc] ss:$28 sps:$4 sm:$0xff]   ;;  %v5471_v42 = vld [vmem:[%s7799_s1 + $0x170] sm:$0xff]  }
  0x18   : > { %5007 = vmatprep.subr.bf16.mxu1 %v5439_v14  ;;  %v5459_v33 = vld [vmem:[%s7799_s1 + $0x80] sm:$0xff]   ;;  %1242 = vmatprep.mubr.bf16.mxu0 %v5458_v32  ;;  %v5472_v43 = vld [vmem:[%s7799_s1 + $0x130] sm:$0xff]   ;;  %v5477_v46 = vld [vmem:[%s6272_s15 + $0x7c] ss:$28 sps:$4 sm:$0xff]  }
  0x19   : > { %4932 = vmatpush3.bf16.msra.mxu0 %v5438_v13  ;;  %v5461_v35 = vld [vmem:[%s6272_s15 + $0x8] ss:$28 sps:$4 sm:$0xff]   ;;  %1355 = vmatprep.mubr.bf16.mxu1 %v5463_v36  ;;  %v5470_v41 = vld [vmem:[%s6272_s15 + $0x40] ss:$28 sps:$4 sm:$0xff]   ;;  %v5474_v45 = vld [vmem:[%s6272_s15 + $0x74] ss:$28 sps:$4 sm:$0xff]  }
  0x1a   : > { %4933 = vmatprep.subr.bf16.mxu0 %v5441_v16  ;;  %v5468_v39 = vld [vmem:[%s6272_s15 + $0x44] ss:$28 sps:$4 sm:$0xff]   ;;  %v5480_v47 = vld [vmem:[%s7799_s1 + $0x168] sm:$0xff]   ;;  %v5479_v51 = vld [vmem:[%s6272_s15 + $0x78] ss:$28 sps:$4 sm:$0xff]  }
  0x1b   : > { %5008 = vmatpush3.bf16.msra.mxu1 %v5440_v15  ;;  %v5473_v44 = vld [vmem:[%s7799_s1 + $0x180] sm:$0xff]   ;;  %v5481_v48 = vld [vmem:[%s7799_s1 + $0x128] sm:$0xff]   ;;  %v5485_v53 = vld [vmem:[%s6272_s15 + $0xb4] ss:$28 sps:$4 sm:$0xff]  }
  0x1c   : > { %5009 = vmatprep.subr.bf16.mxu1 %v5443_v18  ;;  %v5476_v49 = vld [vmem:[%s6272_s15 + $0x70] ss:$28 sps:$4 sm:$0xff]   ;;  %v5488_v52 = vld [vmem:[%s7799_s1 + $0x160] sm:$0xff]   ;;  %v5499_v57 = vld [vmem:[%s7799_s1 + $0x158] sm:$0xff]  }
  0x1d   : > { %4934 = vmatpush3.bf16.msra.mxu0 %v5442_v17  ;;  %v5482_v50 = vld [vmem:[%s6272_s15 + $0xac] ss:$28 sps:$4 sm:$0xff]   ;;  %v5491_v54 = vld [vmem:[%s7799_s1 + $0x120] sm:$0xff]   ;;  %v5502_v59 = vld [vmem:[%s7799_s1 + $0x118] sm:$0xff]  }
  0x1e   : > { %4935 = vmatprep.subr.bf16.mxu0 %v5445_v20  ;;  %v5484_v55 = vld [vmem:[%s6272_s15 + $0xa8] ss:$28 sps:$4 sm:$0xff]   ;;  %v5487_v58 = vld [vmem:[%s6272_s15 + $0xb0] ss:$28 sps:$4 sm:$0xff]   ;;  %v5492_v61 = vld [vmem:[%s6272_s15 + $0xe0] ss:$28 sps:$4 sm:$0xff]  }
  0x1f   : > { %5010 = vmatpush3.bf16.msra.mxu1 %v5444_v19  ;;  %v5489_v56 = vld [vmem:[%s6272_s15 + $0xe4] ss:$28 sps:$4 sm:$0xff]   ;;  %v5493_v60 = vld [vmem:[%s6272_s15 + $0xec] ss:$28 sps:$4 sm:$0xff]   ;;  %v5510_v62 = vld [vmem:[%s7799_s1 + $0x150] sm:$0xff]  }
  0x20   : > { %5011 = vmatprep.subr.bf16.mxu1 %v5447_v22  ;;  %v5511_v63 = vld [vmem:[%s7799_s1 + $0x110] sm:$0xff]   ;;  %v5496_v0 = vld [vmem:[%s6272_s15 + $0x11c] ss:$28 sps:$4 sm:$0xff]   ;;  %v5495_v1 = vld [vmem:[%s6272_s15 + $0xe8] ss:$28 sps:$4 sm:$0xff]  }
  0x21   : > { %4936 = vmatpush3.bf16.msra.mxu0 %v5446_v21  ;;  %v5500_v2 = vld [vmem:[%s6272_s15 + $0x124] ss:$28 sps:$4 sm:$0xff]   ;;  %v5518_v3 = vld [vmem:[%s7799_s1 + $0x148] sm:$0xff]   ;;  %v5498_v5 = vld [vmem:[%s6272_s15 + $0x118] ss:$28 sps:$4 sm:$0xff]  }
  0x22   : > { %4937 = vmatprep.subr.bf16.mxu0 %v5449_v24  ;;  %v5519_v4 = vld [vmem:[%s7799_s1 + $0x108] sm:$0xff]   ;;  %v5526_v6 = vld [vmem:[%s7799_s1 + $0x140] sm:$0xff]   ;;  %v5504_v7 = vld [vmem:[%s6272_s15 + $0x154] ss:$28 sps:$4 sm:$0xff]  }
  0x23   : > { %5012 = vmatpush3.bf16.msra.mxu1 %v5448_v23  ;;  %v5529_v8 = vld [vmem:[%s7799_s1 + $0x100] sm:$0xff]   ;;  %v5507_v10 = vld [vmem:[%s6272_s15 + $0x15c] ss:$28 sps:$4 sm:$0xff]   ;;  %v5506_v11 = vld [vmem:[%s6272_s15 + $0x150] ss:$28 sps:$4 sm:$0xff]  }
  0x24   : > { %5013 = vmatprep.subr.bf16.mxu1 %v5451_v26  ;;  %v5503_v9 = vld [vmem:[%s6272_s15 + $0x120] ss:$28 sps:$4 sm:$0xff]   ;;  %v5512_v12 = vld [vmem:[%s6272_s15 + $0x18c] ss:$28 sps:$4 sm:$0xff]   ;;  %v5509_v13 = vld [vmem:[%s6272_s15 + $0x158] ss:$28 sps:$4 sm:$0xff]  }
  0x25   : > { %4938 = vmatpush3.bf16.msra.mxu0 %v5450_v25  ;;  %v5515_v14 = vld [vmem:[%s6272_s15 + $0x194] ss:$28 sps:$4 sm:$0xff]   ;;  %v5514_v15 = vld [vmem:[%s6272_s15 + $0x188] ss:$28 sps:$4 sm:$0xff]   ;;  %v5522_v19 = vld [vmem:[%s6272_s15 + $0x1c0] ss:$28 sps:$4 sm:$0xff]  }
  0x26   : > { %4939 = vmatprep.subr.bf16.mxu0 %v5453_v28  ;;  %v5520_v16 = vld [vmem:[%s6272_s15 + $0x1c4] ss:$28 sps:$4 sm:$0xff]   ;;  %v5517_v17 = vld [vmem:[%s6272_s15 + $0x190] ss:$28 sps:$4 sm:$0xff]   ;;  %v5527_v20 = vld [vmem:[%s6272_s15 + $0x1fc] ss:$28 sps:$4 sm:$0xff]  }
  0x27   : > { %5014 = vmatpush3.bf16.msra.mxu1 %v5452_v27  ;;  %v5523_v18 = vld [vmem:[%s6272_s15 + $0x1cc] ss:$28 sps:$4 sm:$0xff]   ;;  %v5531_v22 = vld [vmem:[%s6272_s15 + $0x204] ss:$28 sps:$4 sm:$0xff]   ;;  %v5530_v23 = vld [vmem:[%s6272_s15 + $0x1f8] ss:$28 sps:$4 sm:$0xff]  }
  0x28   : > { %5015 = vmatprep.subr.bf16.mxu1 %v5455_v30  ;;  %v5525_v21 = vld [vmem:[%s6272_s15 + $0x1c8] ss:$28 sps:$4 sm:$0xff]   ;;  %v5536_v24 = vld [vmem:[%s6272_s15 + $0x14] ss:$28 sps:$4 sm:$0xff]   ;;  %v5533_v25 = vld [vmem:[%s6272_s15 + $0x200] ss:$28 sps:$4 sm:$0xff]  }
  0x29   : > { %4940 = vmatpush3.bf16.msra.mxu0 %v5454_v29  ;;  %v5537_v26 = vld [vmem:[%s6272_s15 + $0x18] ss:$28 sps:$4 sm:$0xff]   ;;  %v5534_v27 = vld [vmem:[%s6272_s15 + $0x10] ss:$28 sps:$4 sm:$0xff]   ;;  %v5545_v30 = vld [vmem:[%s6272_s15 + $0x88] ss:$28 sps:$4 sm:$0xff]  }
  0x2a   : > { %5077 = vmatprep.subr.bf16.mxu0 %v5460_v34  ;;  %v5539_v28 = vld [vmem:[%s6272_s15 + $0x4c] ss:$28 sps:$4 sm:$0xff]   ;;  %v5542_v32 = vld [vmem:[%s6272_s15 + $0x84] ss:$28 sps:$4 sm:$0xff]   ;;  %v5553_v34 = vld [vmem:[%s6272_s15 + $0xf8] ss:$28 sps:$4 sm:$0xff]  }
  0x2b   : > { %5016 = vmatpush3.bf16.msra.mxu1 %v5459_v33  ;;  %v5538_v29 = vld [vmem:[%s6272_s15 + $0x50] ss:$28 sps:$4 sm:$0xff]   ;;  %v5546_v33 = vld [vmem:[%s6272_s15 + $0xc0] ss:$28 sps:$4 sm:$0xff]  }
  0x2c   : > { %1243 = vmatmul.mubr.bf16.vlgmr.msra.gmra.mxu0 %v5456_v31  ;;  %5240 = vmatprep.subr.bf16.mxu1 %v5473_v44  ;;  %v5541_v31 = vld [vmem:[%s6272_s15 + $0x48] ss:$28 sps:$4 sm:$0xff]   ;;  %v5547_v36 = vld [vmem:[%s6272_s15 + $0xbc] ss:$28 sps:$4 sm:$0xff]  }
  0x2d   : > { %5078 = vmatpush3.bf16.msra.mxu0 %v5464_v37  ;;  %1250 = vmatprep.mubr.bf16.mxu0 %v5465_v38  ;;  %v5554_v37 = vld [vmem:[%s6272_s15 + $0x130] ss:$28 sps:$4 sm:$0xff]   ;;  %v5561_v38 = vld [vmem:[%s6272_s15 + $0x168] ss:$28 sps:$4 sm:$0xff]  }
  0x2e   : > { %1356 = vmatmul.mubr.bf16.vlgmr.msra.gmra.mxu1 %v5461_v35  ;;  %5079 = vmatprep.subr.bf16.mxu0 %v5471_v42  ;;  %v5544_v35 = vld [vmem:[%s6272_s15 + $0x80] ss:$28 sps:$4 sm:$0xff]   ;;  %v5569_v42 = vld [vmem:[%s6272_s15 + $0x1d8] ss:$28 sps:$4 sm:$0xff]  }
  0x2f   : > { %1363 = vmatprep.mubr.bf16.mxu1 %v5468_v39  ;;  %5241 = vmatpush3.bf16.msra.mxu1 %v5473_v44  ;;  %v5549_v39 = vld [vmem:[%s6272_s15 + $0xb8] ss:$28 sps:$4 sm:$0xff]   ;;  %v5555_v44 = vld [vmem:[%s6272_s15 + $0x12c] ss:$28 sps:$4 sm:$0xff]  }
  0x31   : > { %5080 = vmatpush3.bf16.msra.mxu0 %v5472_v43  ;;  %v5552_v43 = vld [vmem:[%s6272_s15 + $0xf0] ss:$28 sps:$4 sm:$0xff]  }
  0x32   : > { %5081 = vmatprep.subr.bf16.mxu0 %v5480_v47  ;;  %v5558_v47 = vld [vmem:[%s6272_s15 + $0x164] ss:$28 sps:$4 sm:$0xff]  }
  0x34   : > { %1251 = vmatmul.mubr.bf16.gmra.mxu0 %v5467_v40  ;;  %v5550_v40 = vld [vmem:[%s6272_s15 + $0xf4] ss:$28 sps:$4 sm:$0xff]  }
  0x35   : > { %1258 = vmatprep.mubr.bf16.mxu0 %v5474_v45  ;;  %5082 = vmatpush3.bf16.msra.mxu0 %v5481_v48  ;;  %v5570_v45 = vld [vmem:[%s6272_s15 + $0x210] ss:$28 sps:$4 sm:$0xff]   ;;  %v5560_v48 = vld [vmem:[%s6272_s15 + $0x160] ss:$28 sps:$4 sm:$0xff]  }
  0x36   : > { %1364 = vmatmul.mubr.bf16.gmra.mxu1 %v5470_v41  ;;  %5083 = vmatprep.subr.bf16.mxu0 %v5488_v52  ;;  %v5562_v41 = vld [vmem:[%s6272_s15 + $0x1a0] ss:$28 sps:$4 sm:$0xff]   ;;  %v5568_v52 = vld [vmem:[%s6272_s15 + $0x1d0] ss:$28 sps:$4 sm:$0xff]  }
  0x37   : > { %1371 = vmatprep.mubr.bf16.mxu1 %v5477_v46  ;;  %v5557_v46 = vld [vmem:[%s6272_s15 + $0x128] ss:$28 sps:$4 sm:$0xff]  }
  0x39   : > { %5084 = vmatpush3.bf16.msra.mxu0 %v5491_v54  ;;  %v5573_v54 = vld [vmem:[%s6272_s15 + $0x208] ss:$28 sps:$4 sm:$0xff]  }
  0x3a   : > { %5085 = vmatprep.subr.bf16.mxu0 %v5499_v57  ;;  %v5576_v57 = vld [vmem:[%s7800_s2 + $0x28] sm:$0xff]  }
  0x3c   : > { %1259 = vmatmul.mubr.bf16.gmra.mxu0 %v5476_v49  ;;  %v5563_v49 = vld [vmem:[%s6272_s15 + $0x19c] ss:$28 sps:$4 sm:$0xff]  }
  0x3d   : > { %1266 = vmatprep.mubr.bf16.mxu0 %v5482_v50  ;;  %5086 = vmatpush3.bf16.msra.mxu0 %v5502_v59  ;;  %v5565_v50 = vld [vmem:[%s6272_s15 + $0x198] ss:$28 sps:$4 sm:$0xff]  }
  0x3e   : > { %1372 = vmatmul.mubr.bf16.gmra.mxu1 %v5479_v51  ;;  %5087 = vmatprep.subr.bf16.mxu0 %v5510_v62  ;;  %v5566_v51 = vld [vmem:[%s6272_s15 + $0x1d4] ss:$28 sps:$4 sm:$0xff]   ;;  %v5578_v59 = vld [vmem:[%s7800_s2 + $0x18] sm:$0xff]   ;;  %v5581_v62 = vld [vmem:[%s7800_s2] sm:$0xff]  }
  0x3f   : > { %1379 = vmatprep.mubr.bf16.mxu1 %v5485_v53  ;;  %v5571_v53 = vld [vmem:[%s6272_s15 + $0x20c] ss:$28 sps:$4 sm:$0xff]  }
  0x41   : > { %5088 = vmatpush3.bf16.msra.mxu0 %v5511_v63 }
  0x42   : > { %5089 = vmatprep.subr.bf16.mxu0 %v5518_v3 }
  0x44   : > { %1267 = vmatmul.mubr.bf16.gmra.mxu0 %v5484_v55  ;;  %v5574_v55 = vld [vmem:[%s7800_s2 + $0x38] sm:$0xff]  }
  0x45   : > { %1274 = vmatprep.mubr.bf16.mxu0 %v5489_v56  ;;  %5090 = vmatpush3.bf16.msra.mxu0 %v5519_v4  ;;  %v5575_v56 = vld [vmem:[%s7800_s2 + $0x30] sm:$0xff]  }
  0x46   : > { %1380 = vmatmul.mubr.bf16.gmra.mxu1 %v5487_v58  ;;  %5091 = vmatprep.subr.bf16.mxu0 %v5526_v6  ;;  %v5577_v58 = vld [vmem:[%s7800_s2 + $0x20] sm:$0xff]  }
  0x47   : > { %1387 = vmatprep.mubr.bf16.mxu1 %v5493_v60  ;;  %5262 = vmatprep.subr.bf16.mxu1 %v5574_v55  ;;  %v5579_v60 = vld [vmem:[%s7800_s2 + $0x10] sm:$0xff]  }
  0x49   : > { %5092 = vmatpush3.bf16.msra.mxu0 %v5529_v8 }
  0x4c   : > { %1275 = vmatmul.mubr.bf16.gmra.mxu0 %v5492_v61  ;;  %v5580_v61 = vld [vmem:[%s7800_s2 + $0x8] sm:$0xff]  }
  0x4d   : > { %1282 = vmatprep.mubr.bf16.mxu0 %v5496_v0  ;;  %v6441_v0 = vld [vmem:[%s7805_s7] ss:$0 sm:$0xff] }
  0x4e   : > { %1388 = vmatmul.mubr.bf16.gmra.mxu1 %v5495_v1 }
  0x4f   : > { %1395 = vmatprep.mubr.bf16.mxu1 %v5500_v2 }
  0x54   : > { %1283 = vmatmul.mubr.bf16.gmra.mxu0 %v5498_v5 }
  0x55   : > { %1290 = vmatprep.mubr.bf16.mxu0 %v5504_v7 }
  0x56   : > { %1396 = vmatmul.mubr.bf16.gmra.mxu1 %v5503_v9 }
  0x57   : > { %1403 = vmatprep.mubr.bf16.mxu1 %v5507_v10 }
  0x5c   : > { %1291 = vmatmul.mubr.bf16.gmra.mxu0 %v5506_v11 }
  0x5d   : > { %1298 = vmatprep.mubr.bf16.mxu0 %v5512_v12 }
  0x5e   : > { %1404 = vmatmul.mubr.bf16.gmra.mxu1 %v5509_v13 }
  0x5f   : > { %1411 = vmatprep.mubr.bf16.mxu1 %v5515_v14 }
  0x64   : > { %1299 = vmatmul.mubr.bf16.gmra.mxu0 %v5514_v15 }
  0x65   : > { %1306 = vmatprep.mubr.bf16.mxu0 %v5520_v16 }
  0x66   : > { %1412 = vmatmul.mubr.bf16.gmra.mxu1 %v5517_v17 }
  0x67   : > { %1419 = vmatprep.mubr.bf16.mxu1 %v5523_v18 }
  0x6c   : > { %1307 = vmatmul.mubr.bf16.gmra.mxu0 %v5522_v19 }
  0x6d   : > { %1314 = vmatprep.mubr.bf16.mxu0 %v5527_v20 }
  0x6e   : > { %1420 = vmatmul.mubr.bf16.gmra.mxu1 %v5525_v21 }
  0x6f   : > { %1427 = vmatprep.mubr.bf16.mxu1 %v5531_v22 }
  0x74   : > { %1315 = vmatmul.mubr.bf16.gmra.mxu0 %v5530_v23 }
  0x75   : > { %1468 = vmatprep.mubr.bf16.mxu0 %v5536_v24 }
  0x76   : > { %1428 = vmatmul.mubr.bf16.gmra.mxu1 %v5533_v25 }
  0x77   : > { %5242 = vmatprep.mubr.msk.bf16.mxu1 %vm1179_vm0, %v5537_v26 }
  0x7c   : > { %1469 = vmatmul.mubr.bf16.vlgmr.msra.gmra.mxu0 %v5534_v27 }
  0x7d   : > { %1476 = vmatprep.mubr.bf16.mxu0 %v5539_v28 }
  0x7e   : > { %5243 = vmatmul.mubr.msk.bf16.vlgmr.msra.gmra.mxu1 %vm1179_vm0, %v5538_v29 }
  0x7f   : > { %5246 = vmatprep.mubr.msk.bf16.mxu1 %vm1179_vm0, %v5545_v30  ;;  %5263 = vmatpush3.bf16.msra.mxu1 %v5574_v55 }
  0x80   : > { %5264 = vmatprep.subr.bf16.mxu1 %v5575_v56 }
  0x83   : > { %5265 = vmatpush3.bf16.msra.mxu1 %v5575_v56 }
  0x84   : > { %1477 = vmatmul.mubr.bf16.gmra.mxu0 %v5541_v31  ;;  %5266 = vmatprep.subr.bf16.mxu1 %v5576_v57 }
  0x85   : > { %1484 = vmatprep.mubr.bf16.mxu0 %v5542_v32 }
  0x86   : > { %5247 = vmatmul.mubr.msk.bf16.gmra.mxu1 %vm1179_vm0, %v5546_v33 }
  0x87   : > { %5250 = vmatprep.mubr.msk.bf16.mxu1 %vm1179_vm0, %v5553_v34  ;;  %5267 = vmatpush3.bf16.msra.mxu1 %v5576_v57 }
  0x88   : > { %5268 = vmatprep.subr.bf16.mxu1 %v5577_v58 }
  0x8b   : > { %5269 = vmatpush3.bf16.msra.mxu1 %v5577_v58 }
  0x8c   : > { %1485 = vmatmul.mubr.bf16.gmra.mxu0 %v5544_v35  ;;  %5270 = vmatprep.subr.bf16.mxu1 %v5578_v59 }
  0x8d   : > { %1492 = vmatprep.mubr.bf16.mxu0 %v5547_v36 }
  0x8e   : > { %5251 = vmatmul.mubr.msk.bf16.gmra.mxu1 %vm1179_vm0, %v5554_v37 }
  0x8f   : > { %5254 = vmatprep.mubr.msk.bf16.mxu1 %vm1179_vm0, %v5561_v38  ;;  %5271 = vmatpush3.bf16.msra.mxu1 %v5578_v59 }
  0x90   : > { %5272 = vmatprep.subr.bf16.mxu1 %v5579_v60 }
  0x93   : > { %5273 = vmatpush3.bf16.msra.mxu1 %v5579_v60 }
  0x94   : > { %1493 = vmatmul.mubr.bf16.gmra.mxu0 %v5549_v39  ;;  %5274 = vmatprep.subr.bf16.mxu1 %v5580_v61 }
  0x95   : > { %1500 = vmatprep.mubr.bf16.mxu0 %v5550_v40 }
  0x96   : > { %5255 = vmatmul.mubr.msk.bf16.gmra.mxu1 %vm1179_vm0, %v5562_v41 }
  0x97   : > { %5258 = vmatprep.mubr.msk.bf16.mxu1 %vm1179_vm0, %v5569_v42  ;;  %5275 = vmatpush3.bf16.msra.mxu1 %v5580_v61 }
  0x98   : > { %5276 = vmatprep.subr.bf16.mxu1 %v5581_v62 }
  0x9b   : > { %5277 = vmatpush3.bf16.msra.mxu1 %v5581_v62 }
  0x9c   : > { %1501 = vmatmul.mubr.bf16.gmra.mxu0 %v5552_v43 }
  0x9d   : > { %1508 = vmatprep.mubr.bf16.mxu0 %v5555_v44 }
  0x9e   : > { %5259 = vmatmul.mubr.msk.bf16.gmra.mxu1 %vm1179_vm0, %v5570_v45 }
  0xa4   : > { %1509 = vmatmul.mubr.bf16.gmra.mxu0 %v5557_v46 }
  0xa5   : > { %1516 = vmatprep.mubr.bf16.mxu0 %v5558_v47 }
  0xac   : > { %1517 = vmatmul.mubr.bf16.gmra.mxu0 %v5560_v48 }
  0xad   : > { %1524 = vmatprep.mubr.bf16.mxu0 %v5563_v49 }
  0xb4   : > { %1525 = vmatmul.mubr.bf16.gmra.mxu0 %v5565_v50 }
  0xb5   : > { %1532 = vmatprep.mubr.bf16.mxu0 %v5566_v51 }
  0xbc   : > { %1533 = vmatmul.mubr.bf16.gmra.mxu0 %v5568_v52 }
  0xbd   : > { %1540 = vmatprep.mubr.bf16.mxu0 %v5571_v53 }
  0xc4   : > { %1541 = vmatmul.mubr.bf16.gmra.mxu0 %v5573_v54 }
  0xec   : > { %v4941_v63 = vpop.f32.mrf.mxu0 }
  0xee   : > { %v4942_v1 = vpop.f32.mrf.mxu0  ;;  %v5017_v3 = vpop.f32.mrf.mxu1 }
  0xef   : > { %v4943_v2 = vadd.f32 %v4942_v1, %v4941_v63 }
  0xf0   : > { %v4944_v4 = vpop.f32.mrf.mxu0  ;;  %v5018_v6 = vpop.f32.mrf.mxu1 }
  0xf1   : > { %v1245_v5 = vadd.f32 %v4943_v2, %v6441_v0  ;;  %v5019_v7 = vadd.f32 %v5018_v6, %v5017_v3 }
  0xf2   : > { %v4945_v8 = vpop.f32.mrf.mxu0  ;;  %v5020_v10 = vpop.f32.mrf.mxu1 }
  0xf3   : > { %v4946_v9 = vadd.f32 %v4945_v8, %v4944_v4  ;;  %v6444_v11 = vadd.f32 %v5019_v7, %v1245_v5 }
  0xf4   : > { %v4947_v12 = vpop.f32.mrf.mxu0  ;;  %v5021_v14 = vpop.f32.mrf.mxu1 }
  0xf5   : > { %v1248_v13 = vadd.f32 %v4946_v9, %v6441_v0  ;;  %v5022_v15 = vadd.f32 %v5021_v14, %v5020_v10 }
  0xf6   : > { %v4948_v16 = vpop.f32.mrf.mxu0  ;;  %v5023_v18 = vpop.f32.mrf.mxu1 }
  0xf7   : > { %v4949_v17 = vadd.f32 %v4948_v16, %v4947_v12  ;;  %v6447_v19 = vadd.f32 %v5022_v15, %v1248_v13 }
  0xf8   : > { %v4950_v20 = vpop.f32.mrf.mxu0  ;;  %v5024_v22 = vpop.f32.mrf.mxu1 }
  0xf9   : > { %v1253_v21 = vadd.f32 %v4949_v17, %v6441_v0  ;;  %v5025_v23 = vadd.f32 %v5024_v22, %v5023_v18 }
  0xfa   : > { %v4951_v24 = vpop.f32.mrf.mxu0  ;;  %v5026_v26 = vpop.f32.mrf.mxu1 }
  0xfb   : > { %v4952_v25 = vadd.f32 %v4951_v24, %v4950_v20  ;;  %v6450_v27 = vadd.f32 %v5025_v23, %v1253_v21 }
  0xfc   : > { %v4953_v28 = vpop.f32.mrf.mxu0  ;;  %v5027_v30 = vpop.f32.mrf.mxu1 }
  0xfd   : > { %v1256_v29 = vadd.f32 %v4952_v25, %v6441_v0  ;;  %v5028_v31 = vadd.f32 %v5027_v30, %v5026_v26 }
  0xfe   : > { %v4954_v32 = vpop.f32.mrf.mxu0  ;;  %v5029_v34 = vpop.f32.mrf.mxu1 }
  0xff   : > { %v4955_v33 = vadd.f32 %v4954_v32, %v4953_v28  ;;  %v6453_v35 = vadd.f32 %v5028_v31, %v1256_v29 }
 0x100   : > { %v4956_v36 = vpop.f32.mrf.mxu0  ;;  %v5030_v38 = vpop.f32.mrf.mxu1 }
 0x101   : > { %v1261_v37 = vadd.f32 %v4955_v33, %v6441_v0  ;;  %v5031_v39 = vadd.f32 %v5030_v38, %v5029_v34 }
 0x102   : > { %v4957_v40 = vpop.f32.mrf.mxu0  ;;  %v5032_v42 = vpop.f32.mrf.mxu1 }
 0x103   : > { %v4958_v41 = vadd.f32 %v4957_v40, %v4956_v36  ;;  %v6456_v43 = vadd.f32 %v5031_v39, %v1261_v37 }
 0x104   : > { %v4959_v44 = vpop.f32.mrf.mxu0  ;;  %v5033_v46 = vpop.f32.mrf.mxu1 }
 0x105   : > { %v1264_v45 = vadd.f32 %v4958_v41, %v6441_v0  ;;  %v5034_v47 = vadd.f32 %v5033_v46, %v5032_v42 }
 0x106   : > { %v4960_v48 = vpop.f32.mrf.mxu0  ;;  %v5035_v50 = vpop.f32.mrf.mxu1 }
 0x107   : > { %v4961_v49 = vadd.f32 %v4960_v48, %v4959_v44  ;;  %v6459_v51 = vadd.f32 %v5034_v47, %v1264_v45 }
 0x108   : > { %v4962_v52 = vpop.f32.mrf.mxu0  ;;  %v5036_v54 = vpop.f32.mrf.mxu1 }
 0x109   : > { %v1269_v53 = vadd.f32 %v4961_v49, %v6441_v0  ;;  %v5037_v55 = vadd.f32 %v5036_v54, %v5035_v50 }
 0x10a   : > { %v4963_v56 = vpop.f32.mrf.mxu0  ;;  %v5038_v58 = vpop.f32.mrf.mxu1 }
 0x10b   : > { %v4964_v57 = vadd.f32 %v4963_v56, %v4962_v52  ;;  %v6462_v59 = vadd.f32 %v5037_v55, %v1269_v53 }
 0x10c   : > { %v4965_v60 = vpop.f32.mrf.mxu0  ;;  %v5039_v62 = vpop.f32.mrf.mxu1 }
 0x10d   : > { %v1272_v61 = vadd.f32 %v4964_v57, %v6441_v0  ;;  %v5040_v63 = vadd.f32 %v5039_v62, %v5038_v58  ;;  %v5583_v62 = vld [vmem:[%s7801_s3 + $0x10] sm:$0xff]  }
 0x10e   : > { %v4966_v1 = vpop.f32.mrf.mxu0  ;;  %v5041_v3 = vpop.f32.mrf.mxu1 }
 0x10f   : > { %v4967_v2 = vadd.f32 %v4966_v1, %v4965_v60  ;;  %v6465_v4 = vadd.f32 %v5040_v63, %v1272_v61  ;;  %v5582_v61 = vld [vmem:[%s7801_s3 + $0x18] sm:$0xff]  }
 0x110   : > { %v4968_v5 = vpop.f32.mrf.mxu0  ;;  %v5042_v7 = vpop.f32.mrf.mxu1  ;;  %5298 = vmatprep.subr.bf16.mxu0 %v5582_v61 }
 0x111   : > { %v1277_v6 = vadd.f32 %v4967_v2, %v6441_v0  ;;  %v5043_v8 = vadd.f32 %v5042_v7, %v5041_v3  ;;  %5299 = vmatpush3.bf16.msra.mxu0 %v5582_v61 }
 0x112   : > { %v4969_v9 = vpop.f32.mrf.mxu0  ;;  %v5044_v12 = vpop.f32.mrf.mxu1  ;;  %5300 = vmatprep.subr.bf16.mxu0 %v5583_v62 }
 0x113   : > { %v4970_v10 = vadd.f32 %v4969_v9, %v4968_v5  ;;  %v6468_v13 = vadd.f32 %v5043_v8, %v1277_v6  ;;  %v5584_v9 = vld [vmem:[%s7801_s3 + $0x8] sm:$0xff]  }
 0x114   : > { %v4971_v14 = vpop.f32.mrf.mxu0  ;;  %v5045_v16 = vpop.f32.mrf.mxu1 }
 0x115   : > { %v1280_v15 = vadd.f32 %v4970_v10, %v6441_v0  ;;  %v5046_v17 = vadd.f32 %v5045_v16, %v5044_v12  ;;  %5301 = vmatpush3.bf16.msra.mxu0 %v5583_v62 }
 0x116   : > { %v4972_v18 = vpop.f32.mrf.mxu0  ;;  %v5047_v21 = vpop.f32.mrf.mxu1  ;;  %5302 = vmatprep.subr.bf16.mxu0 %v5584_v9 }
 0x117   : > { %v4973_v20 = vadd.f32 %v4972_v18, %v4971_v14  ;;  %v6471_v22 = vadd.f32 %v5046_v17, %v1280_v15 }
 0x118   : > { %v4974_v23 = vpop.f32.mrf.mxu0  ;;  %v5048_v25 = vpop.f32.mrf.mxu1 }
 0x119   : > { %v1285_v24 = vadd.f32 %v4973_v20, %v6441_v0  ;;  %v5049_v26 = vadd.f32 %v5048_v25, %v5047_v21  ;;  %5303 = vmatpush3.bf16.msra.mxu0 %v5584_v9 }
 0x11a   : > { %v4975_v28 = vpop.f32.mrf.mxu0  ;;  %v5050_v30 = vpop.f32.mrf.mxu1 }
 0x11b   : > { %v4976_v29 = vadd.f32 %v4975_v28, %v4974_v23  ;;  %v6474_v31 = vadd.f32 %v5049_v26, %v1285_v24 }
 0x11c   : > { %v4977_v32 = vpop.f32.mrf.mxu0  ;;  %v5051_v34 = vpop.f32.mrf.mxu1 }
 0x11d   : > { %v1288_v33 = vadd.f32 %v4976_v29, %v6441_v0  ;;  %v5052_v36 = vadd.f32 %v5051_v34, %v5050_v30 }
 0x11e   : > { %v4978_v37 = vpop.f32.mrf.mxu0  ;;  %v5053_v39 = vpop.f32.mrf.mxu1 }
 0x11f   : > { %v4979_v38 = vadd.f32 %v4978_v37, %v4977_v32  ;;  %v6477_v40 = vadd.f32 %v5052_v36, %v1288_v33 }
 0x120   : > { %v4980_v41 = vpop.f32.mrf.mxu0  ;;  %v5054_v44 = vpop.f32.mrf.mxu1 }
 0x121   : > { %v1293_v42 = vadd.f32 %v4979_v38, %v6441_v0  ;;  %v5055_v45 = vadd.f32 %v5054_v44, %v5053_v39 }
 0x122   : > { %v4981_v46 = vpop.f32.mrf.mxu0  ;;  %v5056_v48 = vpop.f32.mrf.mxu1 }
 0x123   : > { %v4982_v47 = vadd.f32 %v4981_v46, %v4980_v41  ;;  %v6480_v49 = vadd.f32 %v5055_v45, %v1293_v42 }
 0x124   : > { %v4983_v50 = vpop.f32.mrf.mxu0  ;;  %v5057_v53 = vpop.f32.mrf.mxu1 }
 0x125   : > { %v1296_v52 = vadd.f32 %v4982_v47, %v6441_v0  ;;  %v5058_v54 = vadd.f32 %v5057_v53, %v5056_v48 }
 0x126   : > { %v4984_v55 = vpop.f32.mrf.mxu0  ;;  %v5059_v57 = vpop.f32.mrf.mxu1 }
 0x127   : > { %v4985_v56 = vadd.f32 %v4984_v55, %v4983_v50  ;;  %v6483_v58 = vadd.f32 %v5058_v54, %v1296_v52 }
 0x128   : > { %v4986_v60 = vpop.f32.mrf.mxu0  ;;  %v5060_v1 = vpop.f32.mrf.mxu1 }
 0x129   : > { %v1301_v63 = vadd.f32 %v4985_v56, %v6441_v0  ;;  %v5061_v2 = vadd.f32 %v5060_v1, %v5059_v57 }
 0x12a   : > { %v4987_v3 = vpop.f32.mrf.mxu0  ;;  %v5062_v6 = vpop.f32.mrf.mxu1 }
 0x12b   : > { %v4988_v5 = vadd.f32 %v4987_v3, %v4986_v60  ;;  %v6492_v7 = vadd.f32 %v5061_v2, %v1301_v63 }
 0x12c   : > { %v4989_v8 = vpop.f32.mrf.mxu0  ;;  %v5063_v12 = vpop.f32.mrf.mxu1 }
 0x12d   : > { %v1304_v10 = vadd.f32 %v4988_v5, %v6441_v0  ;;  %v5064_v14 = vadd.f32 %v5063_v12, %v5062_v6 }
 0x12e   : > { %v4990_v15 = vpop.f32.mrf.mxu0  ;;  %v5065_v17 = vpop.f32.mrf.mxu1 }
 0x12f   : > { %v4991_v16 = vadd.f32 %v4990_v15, %v4989_v8  ;;  %v6498_v18 = vadd.f32 %v5064_v14, %v1304_v10 }
 0x130   : > { %v4992_v20 = vpop.f32.mrf.mxu0  ;;  %v5066_v23 = vpop.f32.mrf.mxu1 }
 0x131   : > { %v1309_v21 = vadd.f32 %v4991_v16, %v6441_v0  ;;  %v5067_v24 = vadd.f32 %v5066_v23, %v5065_v17 }
 0x132   : > { %v4993_v25 = vpop.f32.mrf.mxu0  ;;  %v5068_v28 = vpop.f32.mrf.mxu1 }
 0x133   : > { %v4994_v26 = vadd.f32 %v4993_v25, %v4992_v20  ;;  %v6501_v29 = vadd.f32 %v5067_v24, %v1309_v21 }
 0x134   : > { %v4995_v30 = vpop.f32.mrf.mxu0  ;;  %v5069_v33 = vpop.f32.mrf.mxu1 }
 0x135   : > { %v1312_v32 = vadd.f32 %v4994_v26, %v6441_v0  ;;  %v5070_v34 = vadd.f32 %v5069_v33, %v5068_v28 }
 0x136   : > { %v4996_v36 = vpop.f32.mrf.mxu0  ;;  %v5071_v38 = vpop.f32.mrf.mxu1 }
 0x137   : > { %v4997_v37 = vadd.f32 %v4996_v36, %v4995_v30  ;;  %v6504_v39 = vadd.f32 %v5070_v34, %v1312_v32 }
 0x138   : > { %v4998_v41 = vpop.f32.mrf.mxu0  ;;  %v5072_v44 = vpop.f32.mrf.mxu1 }
 0x139   : > { %v1317_v42 = vadd.f32 %v4997_v37, %v6441_v0  ;;  %v5073_v45 = vadd.f32 %v5072_v44, %v5071_v38 }
 0x13a   : > { %v4999_v46 = vpop.f32.mrf.mxu0  ;;  %v5074_v48 = vpop.f32.mrf.mxu1 }
 0x13b   : > { %v5000_v47 = vadd.f32 %v4999_v46, %v4998_v41  ;;  %v6507_v50 = vadd.f32 %v5073_v45, %v1317_v42 }
 0x13c   : > { %v5093_v52 = vpop.f32.mrf.mxu0  ;;  %v5075_v54 = vpop.f32.mrf.mxu1 }
 0x13d   : > { %v1320_v53 = vadd.f32 %v5000_v47, %v6441_v0  ;;  %v5076_v55 = vadd.f32 %v5075_v54, %v5074_v48 }
 0x13e   : > { %v5094_v56 = vpop.f32.mrf.mxu0  ;;  %v5244_v60 = vpop.f32.mrf.mxu1 }
 0x13f   : > { %v5095_v57 = vadd.f32 %v5094_v56, %v5093_v52  ;;  %v6510_v61 = vadd.f32 %v5076_v55, %v1320_v53 }
 0x140   : > { %v5096_v62 = vpop.f32.mrf.mxu0  ;;  %v1583_v1 = vpop.f32.mrf.mxu1 }
 0x141   : > { %v1471_v63 = vadd.f32 %v5095_v57, %v6444_v11 }
 0x142   : > { %v5097_v2 = vpop.f32.mrf.mxu0  ;;  %v5245_v6 = vpop.f32.mrf.mxu1 }
 0x143   : > { %v5098_v3 = vadd.f32 %v5097_v2, %v5096_v62  ;;  %v6513_v5 = vadd.f32 %v1583_v1, %v1471_v63 }
 0x144   : > { %v5099_v8 = vpop.f32.mrf.mxu0  ;;  %v1586_v10 = vpop.f32.mrf.mxu1 }
 0x145   : > { %v1682_v9 = vmin.f32 %v6513_v5, 0.0  ;;  %v1474_v0 = vadd.f32 %v5098_v3, %v6447_v19  ;;  %vm1662_vm1 = vcmp.gt.f32.partialorder %v6513_v5, 0.0 }
 0x146   : > { %v5100_v12 = vpop.f32.mrf.mxu0  ;;  %v5248_v20 = vpop.f32.mrf.mxu1 }
 0x147   : > { %v1702_v14 = vmul.f32 1.442695, %v1682_v9  ;;  %v5101_v15 = vadd.f32 %v5100_v12, %v5099_v8  ;;  %v1587_v16 = vadd.f32 %v1586_v10, %v1474_v0 }
 0x148   : > { %v5102_v17 = vpop.f32.mrf.mxu0  ;;  %v1599_v30 = vpop.f32.mrf.mxu1 }
 0x149   : > { %5672 = vpow2.f32 %v1702_v14  ;;  %v1479_v11 = vadd.f32 %v5101_v15, %v6450_v27  ;;  %v1683_v21 = vmin.f32 %v1587_v16, 0.0  ;;  %vm1663_vm2 = vcmp.gt.f32.partialorder %v1587_v16, 0.0 }
 0x14a   : > { %v5103_v23 = vpop.f32.mrf.mxu0  ;;  %v5249_v27 = vpop.f32.mrf.mxu1 }
 0x14b   : > { %v6518_v24 = vadd.f32 %v5244_v60, %v1479_v11  ;;  %v1704_v25 = vmul.f32 1.442695, %v1683_v21  ;;  %v5104_v26 = vadd.f32 %v5103_v23, %v5102_v17 }
 0x14c   : > { %v5105_v28 = vpop.f32.mrf.mxu0  ;;  %v1602_v52 = vpop.f32.mrf.mxu1 }
 0x14d   : > { %v1684_v19 = vmin.f32 %v6518_v24, 0.0  ;;  %5674 = vpow2.f32 %v1704_v25  ;;  %v1482_v32 = vadd.f32 %v5104_v26, %v6453_v35  ;;  %vm1664_vm3 = vcmp.gt.f32.partialorder %v6518_v24, 0.0 }
 0x14e   : > { %v5106_v33 = vpop.f32.mrf.mxu0  ;;  %v5252_v2 = vpop.f32.mrf.mxu1 }
 0x14f   : > { %v1706_v34 = vmul.f32 1.442695, %v1684_v19  ;;  %v6522_v36 = vadd.f32 %v5245_v6, %v1482_v32  ;;  %v5107_v37 = vadd.f32 %v5106_v33, %v5105_v28 }
 0x150   : > { %v5108_v38 = vpop.f32.mrf.mxu0  ;;  %v1615_v17 = vpop.f32.mrf.mxu1 }
 0x151   : > { %5676 = vpow2.f32 %v1706_v34  ;;  %v1685_v41 = vmin.f32 %v6522_v36, 0.0  ;;  %v1487_v42 = vadd.f32 %v5107_v37, %v6456_v43  ;;  %vm1665_vm4 = vcmp.gt.f32.partialorder %v6522_v36, 0.0 }
 0x152   : > { %v5109_v44 = vpop.f32.mrf.mxu0  ;;  %v5253_v32 = vpop.f32.mrf.mxu1 }
 0x153   : > { %v1708_v45 = vmul.f32 1.442695, %v1685_v41  ;;  %v5110_v46 = vadd.f32 %v5109_v44, %v5108_v38  ;;  %v6526_v47 = vadd.f32 %v1599_v30, %v1487_v42 }
 0x154   : > { %v5111_v48 = vpop.f32.mrf.mxu0  ;;  %v1618_v44 = vpop.f32.mrf.mxu1 }
 0x155   : > { %5678 = vpow2.f32 %v1708_v45  ;;  %v1686_v35 = vmin.f32 %v6526_v47, 0.0  ;;  %v1490_v53 = vadd.f32 %v5110_v46, %v6459_v51  ;;  %vm1666_vm5 = vcmp.gt.f32.partialorder %v6526_v47, 0.0 }
 0x156   : > { %v5673_v54 = vpop.eup %5672  ;;  %v5112_v55 = vpop.f32.mrf.mxu0 }
 0x157   : > { %v1710_v56 = vmul.f32 1.442695, %v1686_v35  ;;  %v5113_v57 = vadd.f32 %v5112_v55, %v5111_v48  ;;  %v6530_v60 = vadd.f32 %v1602_v52, %v1490_v53  ;;  %v4737_v43 = vadd.f32 -1.0, %v5673_v54 }
 0x158   : > { %v5114_v62 = vpop.f32.mrf.mxu0 }
 0x159   : > { %5680 = vpow2.f32 %v1710_v56  ;;  %v1495_v63 = vadd.f32 %v5113_v57, %v6462_v59  ;;  %v1687_v1 = vmin.f32 %v6530_v60, 0.0  ;;  %v1762_v12 = vsel %vm1662_vm1, %v6513_v5, %v4737_v43  ;;  %v6554_v56 = vpop.f32.mrf.mxu1 }
 0x15a   : > { %v5675_v3 = vpop.eup %5674  ;;  %v5115_v6 = vpop.f32.mrf.mxu0  ;;  %vm1667_vm6 = vcmp.gt.f32.partialorder %v6530_v60, 0.0 }
 0x15b   : > { %v6535_v8 = vadd.f32 %v5248_v20, %v1495_v63  ;;  %v1712_v51 = vmul.f32 1.442695, %v1687_v1  ;;  %v5116_v9 = vadd.f32 %v5115_v6, %v5114_v62  ;;  %v4738_v0 = vadd.f32 -1.0, %v5675_v3 }
 0x15c   : > { %v5117_v10 = vpop.f32.mrf.mxu0 }
 0x15d   : > { %v1688_v14 = vmin.f32 %v6535_v8, 0.0  ;;  %5682 = vpow2.f32 %v1712_v51  ;;  %v1498_v59 = vadd.f32 %v5116_v9, %v6465_v4  ;;  %v1763_v15 = vsel %vm1663_vm2, %v1587_v16, %v4738_v0  ;;  %v1631_v51 = vpop.f32.mrf.mxu1 }
 0x15e   : > { %v5677_v11 = vpop.eup %5676  ;;  %v5118_v21 = vpop.f32.mrf.mxu0  ;;  %v1782_v23 = vpack.c.bf16 %v1763_v15, %v1762_v12  ;;  %vm1668_vm7 = vcmp.gt.f32.partialorder %v6535_v8, 0.0 }
 0x15f   : > { %v1714_v25 = vmul.f32 1.442695, %v1688_v14  ;;  %v6540_v20 = vadd.f32 %v5249_v27, %v1498_v59  ;;  %v5119_v26 = vadd.f32 %v5118_v21, %v5117_v10  ;;  %v4739_v30 = vadd.f32 -1.0, %v5677_v11  ;;  %v5257_v21 = vpop.f32.mrf.mxu1 }
 0x160   : > { %v5120_v28 = vpop.f32.mrf.mxu0  ;;  %5278 = vmatprep.mubr.bf16.mxu1 %v1782_v23 }
 0x161   : > { %v1689_v19 = vmin.f32 %v6540_v20, 0.0  ;;  %v1503_v5 = vadd.f32 %v5119_v26, %v6468_v13  ;;  %5684 = vpow2.f32 %v1714_v25  ;;  %v1764_v41 = vsel %vm1664_vm3, %v6518_v24, %v4739_v30 }
 0x162   : > { %v5679_v33 = vpop.eup %5678  ;;  %v5121_v4 = vpop.f32.mrf.mxu0  ;;  %vm1669_vm8 = vcmp.gt.f32.partialorder %v6540_v20, 0.0 }
 0x163   : > { %v4740_v16 = vadd.f32 -1.0, %v5679_v33  ;;  %v1716_v34 = vmul.f32 1.442695, %v1689_v19  ;;  %v5122_v37 = vadd.f32 %v5121_v4, %v5120_v28  ;;  %v6544_v38 = vadd.f32 %v1615_v17, %v1503_v5 }
 0x164   : > { %v5123_v27 = vpop.f32.mrf.mxu0 }
 0x165   : > { %v1765_v42 = vsel %vm1665_vm4, %v6522_v36, %v4740_v16  ;;  %5686 = vpow2.f32 %v1716_v34  ;;  %v1690_v13 = vmin.f32 %v6544_v38, 0.0  ;;  %v1506_v52 = vadd.f32 %v5122_v37, %v6471_v22 }
 0x166   : > { %v5681_v45 = vpop.eup %5680  ;;  %v1783_v46 = vpack.c.bf16 %v1765_v42, %v1764_v41  ;;  %v5124_v48 = vpop.f32.mrf.mxu0  ;;  %vm1670_vm9 = vcmp.gt.f32.partialorder %v6544_v38, 0.0 }
 0x167   : > { %v1718_v35 = vmul.f32 1.442695, %v1690_v13  ;;  %v5125_v53 = vadd.f32 %v5124_v48, %v5123_v27  ;;  %v6552_v54 = vadd.f32 %v1618_v44, %v1506_v52  ;;  %v4741_v36 = vadd.f32 -1.0, %v5681_v45 }
 0x168   : > { %v5126_v55 = vpop.f32.mrf.mxu0  ;;  %5279 = vmatmul.mubr.bf16.vlgmr.msra.gmra.mxu1 %v1783_v46 }
 0x169   : > { %v1511_v24 = vadd.f32 %v5125_v53, %v6474_v31  ;;  %5688 = vpow2.f32 %v1718_v35  ;;  %v1691_v62 = vmin.f32 %v6552_v54, 0.0  ;;  %v1766_v0 = vsel %vm1666_vm5, %v6526_v47, %v4741_v36 }
 0x16a   : > { %v5683_v57 = vpop.eup %5682  ;;  %v5127_v43 = vpop.f32.mrf.mxu0  ;;  %vm1671_vm10 = vcmp.gt.f32.partialorder %v6552_v54, 0.0 }
 0x16b   : > { %v6558_v63 = vadd.f32 %v5252_v2, %v1511_v24  ;;  %v5128_v1 = vadd.f32 %v5127_v43, %v5126_v55  ;;  %v4742_v22 = vadd.f32 -1.0, %v5683_v57  ;;  %v1720_v3 = vmul.f32 1.442695, %v1691_v62 }
 0x16c   : > { %v5129_v6 = vpop.f32.mrf.mxu0 }
 0x16d   : > { %v1692_v9 = vmin.f32 %v6558_v63, 0.0  ;;  %v1514_v31 = vadd.f32 %v5128_v1, %v6477_v40  ;;  %v1767_v10 = vsel %vm1667_vm6, %v6530_v60, %v4742_v22  ;;  %5690 = vpow2.f32 %v1720_v3 }
 0x16e   : > { %v5130_v2 = vpop.f32.mrf.mxu0  ;;  %v1784_v12 = vpack.c.bf16 %v1767_v10, %v1766_v0  ;;  %v5685_v14 = vpop.eup %5684  ;;  %vm1672_vm11 = vcmp.gt.f32.partialorder %v6558_v63, 0.0 }
 0x16f   : > { %v1722_v59 = vmul.f32 1.442695, %v1692_v9  ;;  %v6566_v15 = vadd.f32 %v5253_v32, %v1514_v31  ;;  %v5131_v17 = vadd.f32 %v5130_v2, %v5129_v6  ;;  %v4743_v26 = vadd.f32 -1.0, %v5685_v14  ;;  %v1634_v32 = vpop.f32.mrf.mxu1 }
 0x170   : > { %v5132_v11 = vpop.f32.mrf.mxu0  ;;  %5282 = vmatprep.mubr.bf16.mxu1 %v1784_v12 }
 0x171   : > { %v1693_v23 = vmin.f32 %v6566_v15, 0.0  ;;  %v1519_v25 = vadd.f32 %v5131_v17, %v6480_v49  ;;  %5692 = vpow2.f32 %v1722_v59  ;;  %v1768_v16 = vsel %vm1668_vm7, %v6535_v8, %v4743_v26  ;;  %v6580_v45 = vpop.f32.mrf.mxu1 }
 0x172   : > { %v5687_v40 = vpop.eup %5686  ;;  %v5133_v47 = vpop.f32.mrf.mxu0  ;;  %vm1673_vm12 = vcmp.gt.f32.partialorder %v6566_v15, 0.0 }
 0x173   : > { %v1724_v60 = vmul.f32 1.442695, %v1693_v23  ;;  %v5134_v28 = vadd.f32 %v5133_v47, %v5132_v11  ;;  %v6570_v30 = vadd.f32 %v1631_v51, %v1519_v25  ;;  %v4744_v19 = vadd.f32 -1.0, %v5687_v40  ;;  %v1647_v36 = vpop.f32.mrf.mxu1 }
 0x174   : > { %v5135_v5 = vpop.f32.mrf.mxu0 }
 0x175   : > { %5694 = vpow2.f32 %v1724_v60  ;;  %v1694_v33 = vmin.f32 %v6570_v30, 0.0  ;;  %v1522_v4 = vadd.f32 %v5134_v28, %v6483_v58  ;;  %v1769_v34 = vsel %vm1669_vm8, %v6540_v20, %v4744_v19  ;;  %v5261_v31 = vpop.f32.mrf.mxu1 }
 0x176   : > { %v5136_v49 = vpop.f32.mrf.mxu0  ;;  %v5689_v37 = vpop.eup %5688  ;;  %v1785_v13 = vpack.c.bf16 %v1769_v34, %v1768_v16  ;;  %vm1674_vm13 = vcmp.gt.f32.partialorder %v6570_v30, 0.0 }
 0x177   : > { %v1726_v27 = vmul.f32 1.442695, %v1694_v33  ;;  %v5137_v41 = vadd.f32 %v5136_v49, %v5135_v5  ;;  %v6578_v42 = vadd.f32 %v1634_v32, %v1522_v4  ;;  %v4745_v52 = vadd.f32 -1.0, %v5689_v37  ;;  %v1650_v11 = vpop.f32.mrf.mxu1 }
 0x178   : > { %v5138_v44 = vpop.f32.mrf.mxu0  ;;  %5283 = vmatmul.mubr.bf16.gmra.mxu1 %v1785_v13 }
 0x179   : > { %5696 = vpow2.f32 %v1726_v27  ;;  %v1527_v46 = vadd.f32 %v5137_v41, %v6492_v7  ;;  %v1695_v58 = vmin.f32 %v6578_v42, 0.0  ;;  %v1770_v43 = vsel %vm1670_vm9, %v6544_v38, %v4745_v52 }
 0x17a   : > { %v5139_v48 = vpop.f32.mrf.mxu0  ;;  %v5691_v8 = vpop.eup %5690  ;;  %vm1675_vm14 = vcmp.gt.f32.partialorder %v6578_v42, 0.0 }
 0x17b   : > { %v6585_v20 = vadd.f32 %v6554_v56, %v1527_v46  ;;  %v1728_v35 = vmul.f32 1.442695, %v1695_v58  ;;  %v5140_v53 = vadd.f32 %v5139_v48, %v5138_v44  ;;  %v4746_v24 = vadd.f32 -1.0, %v5691_v8 }
 0x17c   : > { %v5141_v55 = vpop.f32.mrf.mxu0 }
 0x17d   : > { %v1696_v7 = vmin.f32 %v6585_v20, 0.0  ;;  %5698 = vpow2.f32 %v1728_v35  ;;  %v1530_v57 = vadd.f32 %v5140_v53, %v6498_v18  ;;  %v1771_v56 = vsel %vm1671_vm10, %v6552_v54, %v4746_v24 }
 0x17e   : > { %v5142_v62 = vpop.f32.mrf.mxu0  ;;  %v5693_v1 = vpop.eup %5692  ;;  %v1786_v51 = vpack.c.bf16 %v1771_v56, %v1770_v43  ;;  %vm1676_vm15 = vcmp.gt.f32.partialorder %v6585_v20, 0.0  ;;  %vm2133_vm10 = vcmask 523264  }
 0x17f   : > { %v1730_v22 = vmul.f32 1.442695, %v1696_v7  ;;  %v6593_v3 = vadd.f32 %v5257_v21, %v1530_v57  ;;  %v5143_v6 = vadd.f32 %v5142_v62, %v5141_v55  ;;  %v4747_v12 = vadd.f32 -1.0, %v5693_v1 }
 0x180   : > { %v5144_v9 = vpop.f32.mrf.mxu0  ;;  %5286 = vmatprep.mubr.bf16.mxu1 %v1786_v51  ;;  %v5585_v51 = vld [vmem:[%s7801_s3] sm:$0xff]  }
 0x181   : > { %5700 = vpow2.f32 %v1730_v22  ;;  %v1697_v0 = vmin.f32 %v6593_v3, 0.0  ;;  %v1535_v10 = vadd.f32 %v5143_v6, %v6501_v29  ;;  %v1772_v29 = vsel %vm1672_vm11, %v6558_v63, %v4747_v12  ;;  %5304 = vmatprep.subr.bf16.mxu0 %v5585_v51 }
 0x182   : > { %v5695_v18 = vpop.eup %5694  ;;  %v5145_v2 = vpop.f32.mrf.mxu0  ;;  %vm1677_vm1 = vcmp.gt.f32.partialorder %v6593_v3, 0.0  ;;  %5305 = vmatpush3.bf16.msra.mxu0 %v5585_v51 }
 0x183   : > { %v1732_v38 = vmul.f32 1.442695, %v1697_v0  ;;  %v5146_v14 = vadd.f32 %v5145_v2, %v5144_v9  ;;  %v1648_v54 = vadd.f32 %v1647_v36, %v1535_v10  ;;  %v4748_v59 = vadd.f32 -1.0, %v5695_v18  ;;  %v5586_v9 = vld [vmem:[%s7802_s4 + $0x8] sm:$0xff]   ;;  %v6625_v0 = vld [vmem:[%s7805_s7 + $0x1] ss:$0 sm:$0xff] }
 0x184   : > { %v5147_v17 = vpop.f32.mrf.mxu0  ;;  %5326 = vmatprep.subr.bf16.mxu1 %v5586_v9 }
 0x185   : > { %5702 = vpow2.f32 %v1732_v38  ;;  %v1538_v21 = vadd.f32 %v5146_v14, %v6504_v39  ;;  %v1698_v23 = vmin.f32 %v1648_v54, 0.0  ;;  %v1773_v47 = vsel %vm1673_vm12, %v6566_v15, %v4748_v59  ;;  %5327 = vmatpush3.bf16.msra.mxu1 %v5586_v9 }
 0x186   : > { %v5697_v25 = vpop.eup %5696  ;;  %v5148_v40 = vpop.f32.mrf.mxu0  ;;  %v1787_v19 = vpack.c.bf16 %v1773_v47, %v1772_v29  ;;  %vm1678_vm2 = vcmp.gt.f32.partialorder %v1648_v54, 0.0 }
 0x187   : > { %v1734_v26 = vmul.f32 1.442695, %v1698_v23  ;;  %v5149_v60 = vadd.f32 %v5148_v40, %v5147_v17  ;;  %v1651_v28 = vadd.f32 %v1650_v11, %v1538_v21  ;;  %v4749_v32 = vadd.f32 -1.0, %v5697_v25 }
 0x188   : > { %v5150_v5 = vpop.f32.mrf.mxu0  ;;  %5287 = vmatmul.mubr.bf16.gmra.mxu1 %v1787_v19 }
 0x189   : > { %5704 = vpow2.f32 %v1734_v26  ;;  %v1543_v33 = vadd.f32 %v5149_v60, %v6507_v50  ;;  %v1699_v4 = vmin.f32 %v1651_v28, 0.0  ;;  %v1774_v37 = vsel %vm1674_vm13, %v6570_v30, %v4749_v32 }
 0x18a   : > { %v5699_v39 = vpop.eup %5698  ;;  %v5151_v49 = vpop.f32.mrf.mxu0  ;;  %vm1679_vm3 = vcmp.gt.f32.partialorder %v1651_v28, 0.0 }
 0x18b   : > { %v1656_v16 = vadd.f32 %v6580_v45, %v1543_v33  ;;  %v1736_v63 = vmul.f32 1.442695, %v1699_v4  ;;  %v5152_v34 = vadd.f32 %v5151_v49, %v5150_v5  ;;  %v4750_v15 = vadd.f32 -1.0, %v5699_v39 }
 0x18d   : > { %v1700_v27 = vmin.f32 %v1656_v16, 0.0  ;;  %5706 = vpow2.f32 %v1736_v63  ;;  %v1546_v41 = vadd.f32 %v5152_v34, %v6510_v61  ;;  %v1775_v50 = vsel %vm1675_vm14, %v6578_v42, %v4750_v15 }
 0x18e   : > { %v5701_v13 = vpop.eup %5700  ;;  %v1788_v44 = vpack.c.bf16 %v1775_v50, %v1774_v37  ;;  %vm1680_vm4 = vcmp.gt.f32.partialorder %v1656_v16, 0.0 }
 0x18f   : > { %v1738_v46 = vmul.f32 1.442695, %v1700_v27  ;;  %v1659_v58 = vadd.f32 %v5261_v31, %v1546_v41  ;;  %v4751_v48 = vadd.f32 -1.0, %v5701_v13  ;;  %v5587_v31 = vld [vmem:[%s7802_s4] sm:$0xff]  }
 0x190   : > { %5290 = vmatprep.mubr.bf16.mxu1 %v1788_v44  ;;  %5328 = vmatprep.subr.bf16.mxu1 %v5587_v31 }
 0x191   : > { %5708 = vpow2.f32 %v1738_v46  ;;  %v1701_v45 = vmin.f32 %v1659_v58, 0.0  ;;  %v1776_v61 = vsel %vm1676_vm15, %v6585_v20, %v4751_v48  ;;  %vm1681_vm5 = vcmp.gt.f32.partialorder %v1659_v58, 0.0  ;;  %5329 = vmatpush3.bf16.msra.mxu1 %v5587_v31 }
 0x192   : > { %v5703_v52 = vpop.eup %5702 }
 0x193   : > { %v1740_v8 = vmul.f32 1.442695, %v1701_v45  ;;  %v4752_v35 = vadd.f32 -1.0, %v5703_v52 }
 0x195   : > { %5710 = vpow2.f32 %v1740_v8  ;;  %v1777_v30 = vsel %vm1677_vm1, %v6593_v3, %v4752_v35 }
 0x196   : > { %v5705_v42 = vpop.eup %5704  ;;  %v1789_v53 = vpack.c.bf16 %v1777_v30, %v1776_v61 }
 0x197   : > { %v4753_v55 = vadd.f32 -1.0, %v5705_v42 }
 0x198   : > { %5291 = vmatmul.mubr.bf16.gmra.mxu1 %v1789_v53 }
 0x199   : > { %v1778_v7 = vsel %vm1678_vm2, %v1648_v54, %v4753_v55 }
 0x19a   : > { %v5707_v24 = vpop.eup %5706 }
 0x19b   : > { %v4754_v36 = vadd.f32 -1.0, %v5707_v24 }
 0x19d   : > { %v1779_v57 = vsel %vm1679_vm3, %v1651_v28, %v4754_v36 }
 0x19e   : > { %v5709_v62 = vpop.eup %5708  ;;  %v1790_v43 = vpack.c.bf16 %v1779_v57, %v1778_v7 }
 0x19f   : > { %v4755_v56 = vadd.f32 -1.0, %v5709_v62 }
 0x1a0   : > { %5294 = vmatprep.mubr.bf16.mxu1 %v1790_v43 }
 0x1a1   : > { %v1780_v20 = vsel %vm1680_vm4, %v1656_v16, %v4755_v56 }
 0x1a2   : > { %v5711_v1 = vpop.eup %5710 }
 0x1a3   : > { %v4756_v22 = vadd.f32 -1.0, %v5711_v1 }
 0x1a5   : > { %v1781_v3 = vsel %vm1681_vm5, %v1659_v58, %v4756_v22 }
 0x1a6   : > { %v1791_v6 = vpack.c.bf16 %v1781_v3, %v1780_v20 }
 0x1a8   : > { %5295 = vmatmul.mubr.bf16.gmra.mxu1 %v1791_v6 }
 0x228   : > { %v5280_v10 = vpop.f32.mrf.mxu1 }
 0x229   : > { %v1900_v18 = vadd.f32 %v5280_v10, %v6625_v0 }
 0x22a   : > { %v1891_v2 = vpop.f32.mrf.mxu1 }
 0x22b   : > { %v1992_v12 = vmin.f32 %v1900_v18, 0.0  ;;  %v1892_v38 = vadd.f32 %v1891_v2, %v6625_v0  ;;  %vm1972_vm9 = vcmp.gt.f32.partialorder %v1900_v18, 0.0 }
 0x22c   : > { %v5281_v14 = vpop.f32.mrf.mxu1 }
 0x22d   : > { %v2014_v54 = vmul.f32 1.442695, %v1992_v12  ;;  %v1990_v59 = vmin.f32 %v1892_v38, 0.0  ;;  %v1903_v17 = vadd.f32 %v5281_v14, %v6625_v0  ;;  %vm1970_vm7 = vcmp.gt.f32.partialorder %v1892_v38, 0.0 }
 0x22e   : > { %v1894_v11 = vpop.f32.mrf.mxu1 }
 0x22f   : > { %v2010_v21 = vmul.f32 1.442695, %v1990_v59  ;;  %v1993_v23 = vmin.f32 %v1903_v17, 0.0  ;;  %v1895_v25 = vadd.f32 %v1894_v11, %v6625_v0  ;;  %5712 = vpow2.f32 %v2014_v54 }
 0x230   : > { %vm1973_vm6 = vcmp.gt.f32.partialorder %v1903_v17, 0.0 }
 0x231   : > { %v2016_v40 = vmul.f32 1.442695, %v1993_v23  ;;  %5714 = vpow2.f32 %v2010_v21  ;;  %v1991_v29 = vmin.f32 %v1895_v25, 0.0  ;;  %vm1971_vm8 = vcmp.gt.f32.partialorder %v1895_v25, 0.0 }
 0x233   : > { %5716 = vpow2.f32 %v2016_v40  ;;  %v2012_v47 = vmul.f32 1.442695, %v1991_v29 }
 0x235   : > { %5718 = vpow2.f32 %v2012_v47 }
 0x238   : > { %v5284_v26 = vpop.f32.mrf.mxu1 }
 0x239   : > { %v6632_v60 = vadd.f32 %v5284_v26, %v6625_v0 }
 0x23a   : > { %v1907_v28 = vpop.f32.mrf.mxu1 }
 0x23b   : > { %v1996_v19 = vmin.f32 %v6632_v60, 0.0  ;;  %v6636_v5 = vadd.f32 %v1907_v28, %v6625_v0  ;;  %vm1976_vm14 = vcmp.gt.f32.partialorder %v6632_v60, 0.0 }
 0x23c   : > { %v5285_v32 = vpop.f32.mrf.mxu1  ;;  %v5713_v33 = vpop.eup %5712 }
 0x23d   : > { %v2022_v4 = vmul.f32 1.442695, %v1996_v19  ;;  %v1994_v39 = vmin.f32 %v6636_v5, 0.0  ;;  %v1919_v49 = vadd.f32 %v5285_v32, %v6625_v0  ;;  %v4767_v46 = vadd.f32 -1.0, %v5713_v33 }
 0x23e   : > { %v5715_v16 = vpop.eup %5714  ;;  %v1910_v63 = vpop.f32.mrf.mxu1  ;;  %vm1974_vm12 = vcmp.gt.f32.partialorder %v6636_v5, 0.0 }
 0x23f   : > { %v2018_v15 = vmul.f32 1.442695, %v1994_v39  ;;  %v1997_v37 = vmin.f32 %v1919_v49, 0.0  ;;  %v1911_v41 = vadd.f32 %v1910_v63, %v6625_v0  ;;  %v4765_v50 = vadd.f32 -1.0, %v5715_v16 }
 0x240   : > { %v5717_v34 = vpop.eup %5716  ;;  %5720 = vpow2.f32 %v2022_v4  ;;  %v2072_v61 = vsel %vm1972_vm9, %v1900_v18, %v4767_v46  ;;  %vm1977_vm11 = vcmp.gt.f32.partialorder %v1919_v49, 0.0 }
 0x241   : > { %v4768_v27 = vadd.f32 -1.0, %v5717_v34  ;;  %v2024_v13 = vmul.f32 1.442695, %v1997_v37  ;;  %5722 = vpow2.f32 %v2018_v15  ;;  %v1995_v58 = vmin.f32 %v1911_v41, 0.0 }
 0x242   : > { %v5719_v44 = vpop.eup %5718  ;;  %v2070_v8 = vsel %vm1970_vm7, %v1892_v38, %v4765_v50  ;;  %vm1975_vm13 = vcmp.gt.f32.partialorder %v1911_v41, 0.0 }
 0x243   : > { %v4766_v45 = vadd.f32 -1.0, %v5719_v44  ;;  %5724 = vpow2.f32 %v2024_v13  ;;  %v2073_v48 = vsel %vm1973_vm6, %v1903_v17, %v4768_v27  ;;  %v2020_v52 = vmul.f32 1.442695, %v1995_v58 }
 0x244   : > { %v2091_v42 = vpack.c.bf16 %v2073_v48, %v2072_v61 }
 0x245   : > { %v2071_v35 = vsel %vm1971_vm8, %v1895_v25, %v4766_v45  ;;  %5726 = vpow2.f32 %v2020_v52 }
 0x246   : > { %v2090_v30 = vpack.c.bf16 %v2071_v35, %v2070_v8 }
 0x248   : > { %v5288_v53 = vpop.f32.mrf.mxu1  ;;  %5306 = vmatprep.mubr.msk.bf16.mxu0 %vm2133_vm10, %v2090_v30 }
 0x249   : > { %v6643_v55 = vadd.f32 %v5288_v53, %v6625_v0  ;;  %5307 = vmatmul.mubr.msk.bf16.vlgmr.msra.gmra.mxu0 %vm2133_vm10, %v2091_v42 }
 0x24a   : > { %v1923_v24 = vpop.f32.mrf.mxu1 }
 0x24b   : > { %v2000_v36 = vmin.f32 %v6643_v55, 0.0  ;;  %v6648_v7 = vadd.f32 %v1923_v24, %v6625_v0  ;;  %vm1980_vm3 = vcmp.gt.f32.partialorder %v6643_v55, 0.0 }
 0x24c   : > { %v5289_v57 = vpop.f32.mrf.mxu1 }
 0x24d   : > { %v1998_v62 = vmin.f32 %v6648_v7, 0.0  ;;  %v5721_v43 = vpop.eup %5720  ;;  %v1935_v56 = vadd.f32 %v5289_v57, %v6625_v0  ;;  %v2030_v20 = vmul.f32 1.442695, %v2000_v36  ;;  %vm1978_vm1 = vcmp.gt.f32.partialorder %v6648_v7, 0.0 }
 0x24e   : > { %v1926_v1 = vpop.f32.mrf.mxu1  ;;  %v5723_v22 = vpop.eup %5722  ;;  %v4771_v38 = vadd.f32 -1.0, %v5721_v43 }
 0x24f   : > { %v2026_v3 = vmul.f32 1.442695, %v1998_v62  ;;  %v2001_v51 = vmin.f32 %v1935_v56, 0.0  ;;  %v1927_v9 = vadd.f32 %v1926_v1, %v6625_v0  ;;  %v4769_v10 = vadd.f32 -1.0, %v5723_v22 }
 0x250   : > { %v5725_v6 = vpop.eup %5724  ;;  %v2076_v21 = vsel %vm1976_vm14, %v6632_v60, %v4771_v38  ;;  %vm1981_vm15 = vcmp.gt.f32.partialorder %v1935_v56, 0.0 }
 0x251   : > { %v4772_v31 = vadd.f32 -1.0, %v5725_v6  ;;  %5728 = vpow2.f32 %v2026_v3  ;;  %v2032_v18 = vmul.f32 1.442695, %v2001_v51  ;;  %v1999_v2 = vmin.f32 %v1927_v9, 0.0 }
 0x252   : > { %v5727_v12 = vpop.eup %5726  ;;  %5730 = vpow2.f32 %v2030_v20  ;;  %v2074_v17 = vsel %vm1974_vm12, %v6636_v5, %v4769_v10  ;;  %vm1979_vm2 = vcmp.gt.f32.partialorder %v1927_v9, 0.0 }
 0x253   : > { %v4770_v14 = vadd.f32 -1.0, %v5727_v12  ;;  %5732 = vpow2.f32 %v2032_v18  ;;  %v2028_v54 = vmul.f32 1.442695, %v1999_v2  ;;  %v2077_v59 = vsel %vm1977_vm11, %v1919_v49, %v4772_v31 }
 0x254   : > { %v2093_v40 = vpack.c.bf16 %v2077_v59, %v2076_v21 }
 0x255   : > { %v2075_v11 = vsel %vm1975_vm13, %v1911_v41, %v4770_v14  ;;  %5734 = vpow2.f32 %v2028_v54  ;;  %vm2304_vm13 = vcmask 261120  }
 0x256   : > { %v2092_v23 = vpack.c.bf16 %v2075_v11, %v2074_v17 }
 0x258   : > { %v5292_v25 = vpop.f32.mrf.mxu1  ;;  %5310 = vmatprep.mubr.msk.bf16.mxu0 %vm2133_vm10, %v2092_v23 }
 0x259   : > { %v6658_v29 = vadd.f32 %v5292_v25, %v6625_v0  ;;  %5311 = vmatmul.mubr.msk.bf16.gmra.mxu0 %vm2133_vm10, %v2093_v40 }
 0x25a   : > { %v1939_v47 = vpop.f32.mrf.mxu1 }
 0x25b   : > { %v2004_v26 = vmin.f32 %v6658_v29, 0.0  ;;  %v6664_v28 = vadd.f32 %v1939_v47, %v6625_v0  ;;  %vm1984_vm7 = vcmp.gt.f32.partialorder %v6658_v29, 0.0 }
 0x25c   : > { %v5293_v19 = vpop.f32.mrf.mxu1 }
 0x25d   : > { %v2038_v5 = vmul.f32 1.442695, %v2004_v26  ;;  %v2002_v60 = vmin.f32 %v6664_v28, 0.0  ;;  %v1951_v32 = vadd.f32 %v5293_v19, %v6625_v0  ;;  %vm1982_vm5 = vcmp.gt.f32.partialorder %v6664_v28, 0.0 }
 0x25e   : > { %v1942_v33 = vpop.f32.mrf.mxu1  ;;  %v5729_v49 = vpop.eup %5728 }
 0x25f   : > { %v2034_v4 = vmul.f32 1.442695, %v2002_v60  ;;  %v2005_v39 = vmin.f32 %v1951_v32, 0.0  ;;  %v1943_v16 = vadd.f32 %v1942_v33, %v6625_v0  ;;  %v5731_v63 = vpop.eup %5730  ;;  %5736 = vpow2.f32 %v2038_v5 }
 0x260   : > { %v5733_v15 = vpop.eup %5732  ;;  %v4773_v27 = vadd.f32 -1.0, %v5729_v49  ;;  %v4775_v13 = vadd.f32 -1.0, %v5731_v63  ;;  %vm1985_vm4 = vcmp.gt.f32.partialorder %v1951_v32, 0.0 }
 0x261   : > { %v2040_v34 = vmul.f32 1.442695, %v2005_v39  ;;  %5738 = vpow2.f32 %v2034_v4  ;;  %v2003_v37 = vmin.f32 %v1943_v16, 0.0  ;;  %v4776_v41 = vadd.f32 -1.0, %v5733_v15  ;;  %v5588_v4 = vld [vmem:[%s7803_s5 + $0x18] sm:$0xff]  }
 0x262   : > { %v5735_v50 = vpop.eup %5734  ;;  %v2078_v45 = vsel %vm1978_vm1, %v6648_v7, %v4773_v27  ;;  %v2080_v52 = vsel %vm1980_vm3, %v6643_v55, %v4775_v13  ;;  %vm1983_vm6 = vcmp.gt.f32.partialorder %v1943_v16, 0.0  ;;  %5350 = vmatprep.subr.bf16.mxu0 %v5588_v4  ;;  %v6694_v39 = vld [vmem:[%s7805_s7 + $0x2] ss:$0 sm:$0xff] }
 0x263   : > { %5740 = vpow2.f32 %v2040_v34  ;;  %v2036_v44 = vmul.f32 1.442695, %v2003_v37  ;;  %v4774_v46 = vadd.f32 -1.0, %v5735_v50  ;;  %v2081_v58 = vsel %vm1981_vm15, %v1935_v56, %v4776_v41  ;;  %5351 = vmatpush3.bf16.msra.mxu0 %v5588_v4 }
 0x264   : > { %v2095_v61 = vpack.c.bf16 %v2081_v58, %v2080_v52 }
 0x265   : > { %5742 = vpow2.f32 %v2036_v44  ;;  %v2079_v48 = vsel %vm1979_vm2, %v1927_v9, %v4774_v46 }
 0x266   : > { %v2094_v8 = vpack.c.bf16 %v2079_v48, %v2078_v45 }
 0x268   : > { %v5296_v35 = vpop.f32.mrf.mxu1  ;;  %5314 = vmatprep.mubr.msk.bf16.mxu0 %vm2133_vm10, %v2094_v8 }
 0x269   : > { %v1964_v30 = vadd.f32 %v5296_v35, %v6625_v0  ;;  %5315 = vmatmul.mubr.msk.bf16.gmra.mxu0 %vm2133_vm10, %v2095_v61 }
 0x26a   : > { %v1955_v42 = vpop.f32.mrf.mxu1 }
 0x26b   : > { %v2008_v53 = vmin.f32 %v1964_v30, 0.0  ;;  %v1956_v24 = vadd.f32 %v1955_v42, %v6625_v0  ;;  %vm1988_vm12 = vcmp.gt.f32.partialorder %v1964_v30, 0.0 }
 0x26c   : > { %v5297_v36 = vpop.f32.mrf.mxu1  ;;  %v5737_v62 = vpop.eup %5736 }
 0x26d   : > { %v2006_v57 = vmin.f32 %v1956_v24, 0.0  ;;  %v1967_v7 = vadd.f32 %v5297_v36, %v6625_v0  ;;  %v2046_v56 = vmul.f32 1.442695, %v2008_v53  ;;  %v4779_v18 = vadd.f32 -1.0, %v5737_v62 }
 0x26e   : > { %v1958_v43 = vpop.f32.mrf.mxu1  ;;  %v5739_v55 = vpop.eup %5738  ;;  %vm1986_vm9 = vcmp.gt.f32.partialorder %v1956_v24, 0.0 }
 0x26f   : > { %v2042_v1 = vmul.f32 1.442695, %v2006_v57  ;;  %v2009_v20 = vmin.f32 %v1967_v7, 0.0  ;;  %v1959_v3 = vadd.f32 %v1958_v43, %v6625_v0  ;;  %v4777_v51 = vadd.f32 -1.0, %v5739_v55 }
 0x270   : > { %v5741_v22 = vpop.eup %5740  ;;  %v2084_v54 = vsel %vm1984_vm7, %v6658_v29, %v4779_v18  ;;  %vm1989_vm8 = vcmp.gt.f32.partialorder %v1967_v7, 0.0 }
 0x271   : > { %v4780_v6 = vadd.f32 -1.0, %v5741_v22  ;;  %5744 = vpow2.f32 %v2042_v1  ;;  %v2048_v9 = vmul.f32 1.442695, %v2009_v20  ;;  %v2007_v31 = vmin.f32 %v1959_v3, 0.0 }
 0x272   : > { %v5743_v10 = vpop.eup %5742  ;;  %5746 = vpow2.f32 %v2046_v56  ;;  %v2082_v0 = vsel %vm1982_vm5, %v6664_v28, %v4777_v51  ;;  %vm1987_vm11 = vcmp.gt.f32.partialorder %v1959_v3, 0.0 }
 0x273   : > { %v4778_v2 = vadd.f32 -1.0, %v5743_v10  ;;  %5748 = vpow2.f32 %v2048_v9  ;;  %v2044_v12 = vmul.f32 1.442695, %v2007_v31  ;;  %v2085_v38 = vsel %vm1985_vm4, %v1951_v32, %v4780_v6 }
 0x274   : > { %v2097_v17 = vpack.c.bf16 %v2085_v38, %v2084_v54 }
 0x275   : > { %v2083_v14 = vsel %vm1983_vm6, %v1943_v16, %v4778_v2  ;;  %5750 = vpow2.f32 %v2044_v12 }
 0x276   : > { %v2096_v59 = vpack.c.bf16 %v2083_v14, %v2082_v0 }
 0x278   : > { %5318 = vmatprep.mubr.msk.bf16.mxu0 %vm2133_vm10, %v2096_v59 }
 0x279   : > { %5319 = vmatmul.mubr.msk.bf16.gmra.mxu0 %vm2133_vm10, %v2097_v17 }
 0x27e   : > { %v5745_v11 = vpop.eup %5744 }
 0x27f   : > { %v5747_v21 = vpop.eup %5746  ;;  %v4781_v25 = vadd.f32 -1.0, %v5745_v11 }
 0x280   : > { %v5749_v23 = vpop.eup %5748  ;;  %v4783_v26 = vadd.f32 -1.0, %v5747_v21 }
 0x281   : > { %v4784_v40 = vadd.f32 -1.0, %v5749_v23  ;;  %v2086_v29 = vsel %vm1986_vm9, %v1956_v24, %v4781_v25  ;;  %v5589_v23 = vld [vmem:[%s7803_s5 + $0x10] sm:$0xff]   ;;  %v5590_v25 = vld [vmem:[%s7803_s5 + $0x8] sm:$0xff]  }
 0x282   : > { %v5751_v47 = vpop.eup %5750  ;;  %v2088_v60 = vsel %vm1988_vm12, %v1964_v30, %v4783_v26  ;;  %5352 = vmatprep.subr.bf16.mxu0 %v5589_v23  ;;  %v5594_v26 = vld [vmem:[%s7804_s6 + $0x18c] ss:$28 sps:$4 sm:$0xff]  }
 0x283   : > { %v4782_v28 = vadd.f32 -1.0, %v5751_v47  ;;  %v2089_v19 = vsel %vm1989_vm8, %v1967_v7, %v4784_v40  ;;  %5353 = vmatpush3.bf16.msra.mxu0 %v5589_v23  ;;  %v5591_v40 = vld [vmem:[%s7803_s5] sm:$0xff]   ;;  %3276 = vmatprep.subr.bf16.mxu1 %v5594_v26 }
 0x284   : > { %v2099_v33 = vpack.c.bf16 %v2089_v19, %v2088_v60  ;;  %5354 = vmatprep.subr.bf16.mxu0 %v5590_v25  ;;  %v5592_v47 = vld [vmem:[%s7804_s6 + $0x188] ss:$28 sps:$4 sm:$0xff]   ;;  %v5595_v19 = vld [vmem:[%s7804_s6 + $0x150] ss:$28 sps:$4 sm:$0xff]  }
 0x285   : > { %v2087_v5 = vsel %vm1987_vm11, %v1959_v3, %v4782_v28  ;;  %v5597_v28 = vld [vmem:[%s7804_s6 + $0x154] ss:$28 sps:$4 sm:$0xff]  }
 0x286   : > { %v2098_v32 = vpack.c.bf16 %v2087_v5, %v2086_v29  ;;  %v6795_v29 = vld [vmem:[%s7805_s7 + $0x3] ss:$0 sm:$0xff] }
 0x287   : > { %5355 = vmatpush3.bf16.msra.mxu0 %v5590_v25 }
 0x288   : > { %5322 = vmatprep.mubr.msk.bf16.mxu0 %vm2133_vm10, %v2098_v32  ;;  %5356 = vmatprep.subr.bf16.mxu0 %v5591_v40 }
 0x289   : > { %5323 = vmatmul.mubr.msk.bf16.gmra.mxu0 %vm2133_vm10, %v2099_v33 }
 0x28b   : > { %5357 = vmatpush3.bf16.msra.mxu0 %v5591_v40 }
 0x309   : > { %v5308_v49 = vpop.f32.mrf.mxu0 }
 0x30a   : > { %v2207_v16 = vadd.f32 %v5308_v49, %v6694_v39 }
 0x30b   : > { %v2198_v63 = vpop.f32.mrf.mxu0 }
 0x30c   : > { %4350 = vst.msk [vmem:[%s6699_s22 + $0x10] sm:$0xff] %vm2304_vm13, %v2207_v16  ;;  %v2199_v34 = vadd.f32 %v2198_v63, %v6694_v39 }
 0x30d   : > { %v5309_v15 = vpop.f32.mrf.mxu0 }
 0x30e   : > { %4348 = vst.msk [vmem:[%s6699_s22] sm:$0xff] %vm2304_vm13, %v2199_v34  ;;  %v2210_v37 = vadd.f32 %v5309_v15, %v6694_v39 }
 0x30f   : > { %v2201_v27 = vpop.f32.mrf.mxu0 }
 0x310   : > { %4351 = vst.msk [vmem:[%s6699_s22 + $0x18] sm:$0xff] %vm2304_vm13, %v2210_v37  ;;  %v2202_v41 = vadd.f32 %v2201_v27, %v6694_v39  ;;  %v2278_v13 = vpack.c.bf16 %v2210_v37, %v2207_v16 }
 0x312   : > { %v2277_v50 = vpack.c.bf16 %v2202_v41, %v2199_v34  ;;  %4349 = vst.msk [vmem:[%s6699_s22 + $0x8] sm:$0xff] %vm2304_vm13, %v2202_v41 }
 0x314   : > { %5330 = vmatprep.mubr.msk.bf16.mxu1 %vm2304_vm13, %v2277_v50 }
 0x315   : > { %5331 = vmatmul.mubr.msk.bf16.vlgmr.msra.gmra.mxu1 %vm2304_vm13, %v2278_v13 }
 0x316   : > { %3277 = vmatpush1.bf16.msra.mxu1 %v5592_v47 }
 0x317   : > { %3278 = vmatprep.subr.bf16.mxu1 %v5597_v28 }
 0x319   : > { %v5312_v44 = vpop.f32.mrf.mxu0 }
 0x31a   : > { %v2223_v46 = vadd.f32 %v5312_v44, %v6694_v39  ;;  %3279 = vmatpush1.bf16.msra.mxu1 %v5595_v19 }
 0x31b   : > { %v2214_v58 = vpop.f32.mrf.mxu0 }
 0x31c   : > { %4354 = vst.msk [vmem:[%s6699_s22 + $0x30] sm:$0xff] %vm2304_vm13, %v2223_v46  ;;  %v2215_v45 = vadd.f32 %v2214_v58, %v6694_v39 }
 0x31d   : > { %v5313_v48 = vpop.f32.mrf.mxu0 }
 0x31e   : > { %4352 = vst.msk [vmem:[%s6699_s22 + $0x20] sm:$0xff] %vm2304_vm13, %v2215_v45  ;;  %v2226_v52 = vadd.f32 %v5313_v48, %v6694_v39 }
 0x31f   : > { %v2217_v8 = vpop.f32.mrf.mxu0 }
 0x320   : > { %4355 = vst.msk [vmem:[%s6699_s22 + $0x38] sm:$0xff] %vm2304_vm13, %v2226_v52  ;;  %v2218_v35 = vadd.f32 %v2217_v8, %v6694_v39  ;;  %v2280_v30 = vpack.c.bf16 %v2226_v52, %v2223_v46 }
 0x322   : > { %v2279_v61 = vpack.c.bf16 %v2218_v35, %v2215_v45  ;;  %4353 = vst.msk [vmem:[%s6699_s22 + $0x28] sm:$0xff] %vm2304_vm13, %v2218_v35 }
 0x324   : > { %5334 = vmatprep.mubr.msk.bf16.mxu1 %vm2304_vm13, %v2279_v61 }
 0x325   : > { %5335 = vmatmul.mubr.msk.bf16.gmra.mxu1 %vm2304_vm13, %v2280_v30 }
 0x329   : > { %v5316_v42 = vpop.f32.mrf.mxu0 }
 0x32a   : > { %v2239_v53 = vadd.f32 %v5316_v42, %v6694_v39 }
 0x32b   : > { %v2230_v24 = vpop.f32.mrf.mxu0 }
 0x32c   : > { %4358 = vst.msk [vmem:[%s6699_s22 + $0x50] sm:$0xff] %vm2304_vm13, %v2239_v53  ;;  %v2231_v36 = vadd.f32 %v2230_v24, %v6694_v39 }
 0x32d   : > { %v5317_v57 = vpop.f32.mrf.mxu0 }
 0x32e   : > { %4356 = vst.msk [vmem:[%s6699_s22 + $0x40] sm:$0xff] %vm2304_vm13, %v2231_v36  ;;  %v2242_v62 = vadd.f32 %v5317_v57, %v6694_v39 }
 0x32f   : > { %v2233_v7 = vpop.f32.mrf.mxu0 }
 0x330   : > { %4359 = vst.msk [vmem:[%s6699_s22 + $0x58] sm:$0xff] %vm2304_vm13, %v2242_v62  ;;  %v2234_v43 = vadd.f32 %v2233_v7, %v6694_v39  ;;  %v2282_v56 = vpack.c.bf16 %v2242_v62, %v2239_v53 }
 0x332   : > { %v2281_v55 = vpack.c.bf16 %v2234_v43, %v2231_v36  ;;  %4357 = vst.msk [vmem:[%s6699_s22 + $0x48] sm:$0xff] %vm2304_vm13, %v2234_v43 }
 0x334   : > { %5338 = vmatprep.mubr.msk.bf16.mxu1 %vm2304_vm13, %v2281_v55 }
 0x335   : > { %5339 = vmatmul.mubr.msk.bf16.gmra.mxu1 %vm2304_vm13, %v2282_v56 }
 0x339   : > { %v5320_v1 = vpop.f32.mrf.mxu0 }
 0x33a   : > { %v2255_v22 = vadd.f32 %v5320_v1, %v6694_v39 }
 0x33b   : > { %v2246_v20 = vpop.f32.mrf.mxu0 }
 0x33c   : > { %4362 = vst.msk [vmem:[%s6699_s22 + $0x70] sm:$0xff] %vm2304_vm13, %v2255_v22  ;;  %v2247_v3 = vadd.f32 %v2246_v20, %v6694_v39 }
 0x33d   : > { %v5321_v6 = vpop.f32.mrf.mxu0 }
 0x33e   : > { %4360 = vst.msk [vmem:[%s6699_s22 + $0x60] sm:$0xff] %vm2304_vm13, %v2247_v3  ;;  %v2258_v51 = vadd.f32 %v5321_v6, %v6694_v39 }
 0x33f   : > { %v2249_v9 = vpop.f32.mrf.mxu0 }
 0x340   : > { %4363 = vst.msk [vmem:[%s6699_s22 + $0x78] sm:$0xff] %vm2304_vm13, %v2258_v51  ;;  %v2250_v31 = vadd.f32 %v2249_v9, %v6694_v39  ;;  %v2284_v18 = vpack.c.bf16 %v2258_v51, %v2255_v22 }
 0x342   : > { %v2283_v10 = vpack.c.bf16 %v2250_v31, %v2247_v3  ;;  %4361 = vst.msk [vmem:[%s6699_s22 + $0x68] sm:$0xff] %vm2304_vm13, %v2250_v31 }
 0x344   : > { %5342 = vmatprep.mubr.msk.bf16.mxu1 %vm2304_vm13, %v2283_v10 }
 0x345   : > { %5343 = vmatmul.mubr.msk.bf16.gmra.mxu1 %vm2304_vm13, %v2284_v18 }
 0x349   : > { %v5324_v2 = vpop.f32.mrf.mxu0 }
 0x34a   : > { %v2271_v12 = vadd.f32 %v5324_v2, %v6694_v39 }
 0x34b   : > { %v2262_v38 = vpop.f32.mrf.mxu0 }
 0x34c   : > { %4366 = vst.msk [vmem:[%s6699_s22 + $0x90] sm:$0xff] %vm2304_vm13, %v2271_v12  ;;  %v2263_v0 = vadd.f32 %v2262_v38, %v6694_v39 }
 0x34d   : > { %v5325_v14 = vpop.f32.mrf.mxu0 }
 0x34e   : > { %4364 = vst.msk [vmem:[%s6699_s22 + $0x80] sm:$0xff] %vm2304_vm13, %v2263_v0  ;;  %v2274_v54 = vadd.f32 %v5325_v14, %v6694_v39 }
 0x34f   : > { %v2265_v59 = vpop.f32.mrf.mxu0 }
 0x350   : > { %4367 = vst.msk [vmem:[%s6699_s22 + $0x98] sm:$0xff] %vm2304_vm13, %v2274_v54  ;;  %v2266_v17 = vadd.f32 %v2265_v59, %v6694_v39  ;;  %v2286_v21 = vpack.c.bf16 %v2274_v54, %v2271_v12 }
 0x352   : > { %v2285_v11 = vpack.c.bf16 %v2266_v17, %v2263_v0  ;;  %4365 = vst.msk [vmem:[%s6699_s22 + $0x88] sm:$0xff] %vm2304_vm13, %v2266_v17 }
 0x354   : > { %5346 = vmatprep.mubr.msk.bf16.mxu1 %vm2304_vm13, %v2285_v11 }
 0x355   : > { %5347 = vmatmul.mubr.msk.bf16.gmra.mxu1 %vm2304_vm13, %v2286_v21 }
 0x3d5   : > { %v5332_v5 = vpop.f32.mrf.mxu1 }
 0x3d6   : > { %v2378_v60 = vadd.f32 %v5332_v5, %v6795_v29 }
 0x3d7   : > { %v2369_v32 = vpop.f32.mrf.mxu1 }
 0x3d8   : > { %v2470_v33 = vmin.f32 %v2378_v60, 0.0  ;;  %v2370_v4 = vadd.f32 %v2369_v32, %v6795_v29  ;;  %vm2450_vm2 = vcmp.gt.f32.partialorder %v2378_v60, 0.0 }
 0x3d9   : > { %v5333_v39 = vpop.f32.mrf.mxu1 }
 0x3da   : > { %v2492_v49 = vmul.f32 1.442695, %v2470_v33  ;;  %v2468_v16 = vmin.f32 %v2370_v4, 0.0  ;;  %v2381_v63 = vadd.f32 %v5333_v39, %v6795_v29  ;;  %vm2448_vm15 = vcmp.gt.f32.partialorder %v2370_v4, 0.0 }
 0x3db   : > { %v2372_v34 = vpop.f32.mrf.mxu1 }
 0x3dc   : > { %v2488_v15 = vmul.f32 1.442695, %v2468_v16  ;;  %v2471_v37 = vmin.f32 %v2381_v63, 0.0  ;;  %v2373_v27 = vadd.f32 %v2372_v34, %v6795_v29  ;;  %5752 = vpow2.f32 %v2492_v49 }
 0x3dd   : > { %vm2451_vm14 = vcmp.gt.f32.partialorder %v2381_v63, 0.0 }
 0x3de   : > { %v2494_v41 = vmul.f32 1.442695, %v2471_v37  ;;  %5754 = vpow2.f32 %v2488_v15  ;;  %v2469_v50 = vmin.f32 %v2373_v27, 0.0  ;;  %vm2449_vm1 = vcmp.gt.f32.partialorder %v2373_v27, 0.0 }
 0x3e0   : > { %5756 = vpow2.f32 %v2494_v41  ;;  %v2490_v13 = vmul.f32 1.442695, %v2469_v50 }
 0x3e2   : > { %5758 = vpow2.f32 %v2490_v13 }
 0x3e5   : > { %v5336_v44 = vpop.f32.mrf.mxu1 }
 0x3e6   : > { %v6802_v46 = vadd.f32 %v5336_v44, %v6795_v29 }
 0x3e7   : > { %v2385_v58 = vpop.f32.mrf.mxu1 }
 0x3e8   : > { %v2474_v45 = vmin.f32 %v6802_v46, 0.0  ;;  %v6806_v48 = vadd.f32 %v2385_v58, %v6795_v29  ;;  %vm2454_vm6 = vcmp.gt.f32.partialorder %v6802_v46, 0.0 }
 0x3e9   : > { %v5337_v52 = vpop.f32.mrf.mxu1  ;;  %v5753_v8 = vpop.eup %5752 }
 0x3ea   : > { %v2500_v35 = vmul.f32 1.442695, %v2474_v45  ;;  %v2472_v61 = vmin.f32 %v6806_v48, 0.0  ;;  %v2397_v30 = vadd.f32 %v5337_v52, %v6795_v29  ;;  %v4813_v1 = vadd.f32 -1.0, %v5753_v8 }
 0x3eb   : > { %v5755_v42 = vpop.eup %5754  ;;  %v2388_v53 = vpop.f32.mrf.mxu1  ;;  %vm2452_vm4 = vcmp.gt.f32.partialorder %v6806_v48, 0.0 }
 0x3ec   : > { %v2496_v36 = vmul.f32 1.442695, %v2472_v61  ;;  %v2475_v57 = vmin.f32 %v2397_v30, 0.0  ;;  %v2389_v7 = vadd.f32 %v2388_v53, %v6795_v29  ;;  %v4811_v43 = vadd.f32 -1.0, %v5755_v42 }
 0x3ed   : > { %v5757_v24 = vpop.eup %5756  ;;  %5760 = vpow2.f32 %v2500_v35  ;;  %v2550_v31 = vsel %vm2450_vm2, %v2378_v60, %v4813_v1  ;;  %vm2455_vm3 = vcmp.gt.f32.partialorder %v2397_v30, 0.0 }
 0x3ee   : > { %v4814_v62 = vadd.f32 -1.0, %v5757_v24  ;;  %v2502_v55 = vmul.f32 1.442695, %v2475_v57  ;;  %5762 = vpow2.f32 %v2496_v36  ;;  %v2473_v22 = vmin.f32 %v2389_v7, 0.0 }
 0x3ef   : > { %v5759_v56 = vpop.eup %5758  ;;  %v2548_v51 = vsel %vm2448_vm15, %v2370_v4, %v4811_v43  ;;  %vm2453_vm5 = vcmp.gt.f32.partialorder %v2389_v7, 0.0 }
 0x3f0   : > { %v4812_v20 = vadd.f32 -1.0, %v5759_v56  ;;  %5764 = vpow2.f32 %v2502_v55  ;;  %v2551_v3 = vsel %vm2451_vm14, %v2381_v63, %v4814_v62  ;;  %v2498_v6 = vmul.f32 1.442695, %v2473_v22 }
 0x3f1   : > { %v2569_v18 = vpack.c.bf16 %v2551_v3, %v2550_v31 }
 0x3f2   : > { %v2549_v9 = vsel %vm2449_vm1, %v2373_v27, %v4812_v20  ;;  %5766 = vpow2.f32 %v2498_v6 }
 0x3f3   : > { %v2568_v10 = vpack.c.bf16 %v2549_v9, %v2548_v51 }
 0x3f5   : > { %v5340_v2 = vpop.f32.mrf.mxu1  ;;  %5358 = vmatprep.mubr.msk.bf16.mxu0 %vm2133_vm10, %v2568_v10 }
 0x3f6   : > { %v6813_v12 = vadd.f32 %v5340_v2, %v6795_v29  ;;  %5359 = vmatmul.mubr.msk.bf16.vlgmr.msra.gmra.mxu0 %vm2133_vm10, %v2569_v18 }
 0x3f7   : > { %v2401_v38 = vpop.f32.mrf.mxu1 }
 0x3f8   : > { %v2478_v0 = vmin.f32 %v6813_v12, 0.0  ;;  %v6818_v14 = vadd.f32 %v2401_v38, %v6795_v29  ;;  %vm2458_vm11 = vcmp.gt.f32.partialorder %v6813_v12, 0.0 }
 0x3f9   : > { %v5341_v54 = vpop.f32.mrf.mxu1 }
 0x3fa   : > { %v2476_v59 = vmin.f32 %v6818_v14, 0.0  ;;  %v5761_v17 = vpop.eup %5760  ;;  %v2413_v11 = vadd.f32 %v5341_v54, %v6795_v29  ;;  %v2508_v25 = vmul.f32 1.442695, %v2478_v0  ;;  %vm2456_vm8 = vcmp.gt.f32.partialorder %v6818_v14, 0.0 }
 0x3fb   : > { %v2404_v21 = vpop.f32.mrf.mxu1  ;;  %v5763_v23 = vpop.eup %5762  ;;  %v4817_v4 = vadd.f32 -1.0, %v5761_v17 }
 0x3fc   : > { %v2504_v40 = vmul.f32 1.442695, %v2476_v59  ;;  %v2479_v26 = vmin.f32 %v2413_v11, 0.0  ;;  %v2405_v28 = vadd.f32 %v2404_v21, %v6795_v29  ;;  %v4815_v5 = vadd.f32 -1.0, %v5763_v23 }
 0x3fd   : > { %v5765_v47 = vpop.eup %5764  ;;  %v2554_v15 = vsel %vm2454_vm6, %v6802_v46, %v4817_v4  ;;  %vm2459_vm7 = vcmp.gt.f32.partialorder %v2413_v11, 0.0 }
 0x3fe   : > { %v4818_v19 = vadd.f32 -1.0, %v5765_v47  ;;  %5768 = vpow2.f32 %v2504_v40  ;;  %v2510_v60 = vmul.f32 1.442695, %v2479_v26  ;;  %v2477_v32 = vmin.f32 %v2405_v28, 0.0 }
 0x3ff   : > { %v5767_v33 = vpop.eup %5766  ;;  %5770 = vpow2.f32 %v2508_v25  ;;  %v2552_v63 = vsel %vm2452_vm4, %v6806_v48, %v4815_v5  ;;  %vm2457_vm9 = vcmp.gt.f32.partialorder %v2405_v28, 0.0 }
 0x400   : > { %v4816_v39 = vadd.f32 -1.0, %v5767_v33  ;;  %5772 = vpow2.f32 %v2510_v60  ;;  %v2506_v49 = vmul.f32 1.442695, %v2477_v32  ;;  %v2555_v16 = vsel %vm2455_vm3, %v2397_v30, %v4818_v19 }
 0x401   : > { %v2571_v41 = vpack.c.bf16 %v2555_v16, %v2554_v15 }
 0x402   : > { %v2553_v34 = vsel %vm2453_vm5, %v2389_v7, %v4816_v39  ;;  %5774 = vpow2.f32 %v2506_v49 }
 0x403   : > { %v2570_v37 = vpack.c.bf16 %v2553_v34, %v2552_v63 }
 0x405   : > { %v5344_v27 = vpop.f32.mrf.mxu1  ;;  %5362 = vmatprep.mubr.msk.bf16.mxu0 %vm2133_vm10, %v2570_v37 }
 0x406   : > { %v6828_v50 = vadd.f32 %v5344_v27, %v6795_v29  ;;  %5363 = vmatmul.mubr.msk.bf16.gmra.mxu0 %vm2133_vm10, %v2571_v41 }
 0x407   : > { %v2417_v13 = vpop.f32.mrf.mxu1 }
 0x408   : > { %v2482_v44 = vmin.f32 %v6828_v50, 0.0  ;;  %v6834_v58 = vadd.f32 %v2417_v13, %v6795_v29  ;;  %vm2462_vm15 = vcmp.gt.f32.partialorder %v6828_v50, 0.0 }
 0x409   : > { %v5345_v45 = vpop.f32.mrf.mxu1 }
 0x40a   : > { %v2516_v48 = vmul.f32 1.442695, %v2482_v44  ;;  %v2480_v46 = vmin.f32 %v6834_v58, 0.0  ;;  %v2429_v52 = vadd.f32 %v5345_v45, %v6795_v29  ;;  %vm2460_vm13 = vcmp.gt.f32.partialorder %v6834_v58, 0.0 }
 0x40b   : > { %v2420_v8 = vpop.f32.mrf.mxu1  ;;  %v5769_v30 = vpop.eup %5768 }
 0x40c   : > { %v2512_v35 = vmul.f32 1.442695, %v2480_v46  ;;  %v2483_v61 = vmin.f32 %v2429_v52, 0.0  ;;  %v2421_v42 = vadd.f32 %v2420_v8, %v6795_v29  ;;  %v5771_v53 = vpop.eup %5770  ;;  %5776 = vpow2.f32 %v2516_v48 }
 0x40d   : > { %v5773_v36 = vpop.eup %5772  ;;  %v4819_v62 = vadd.f32 -1.0, %v5769_v30  ;;  %v4821_v55 = vadd.f32 -1.0, %v5771_v53  ;;  %vm2463_vm12 = vcmp.gt.f32.partialorder %v2429_v52, 0.0  ;;  %v5606_v30 = vld [vmem:[%s7804_s6 + $0x15c] ss:$28 sps:$4 sm:$0xff]  }
 0x40e   : > { %v2518_v24 = vmul.f32 1.442695, %v2483_v61  ;;  %5778 = vpow2.f32 %v2512_v35  ;;  %v2481_v57 = vmin.f32 %v2421_v42, 0.0  ;;  %v4822_v7 = vadd.f32 -1.0, %v5773_v36  ;;  %v5600_v35 = vld [vmem:[%s7804_s6 + $0x194] ss:$28 sps:$4 sm:$0xff]  }
 0x40f   : > { %v5775_v43 = vpop.eup %5774  ;;  %v2556_v20 = vsel %vm2456_vm8, %v6818_v14, %v4819_v62  ;;  %v2558_v6 = vsel %vm2458_vm11, %v6813_v12, %v4821_v55  ;;  %vm2461_vm14 = vcmp.gt.f32.partialorder %v2421_v42, 0.0  ;;  %v5598_v61 = vld [vmem:[%s7804_s6 + $0x190] ss:$28 sps:$4 sm:$0xff]   ;;  %3409 = vmatprep.subr.bf16.mxu0 %v5600_v35  ;;  %v5603_v53 = vld [vmem:[%s7804_s6 + $0x11c] ss:$28 sps:$4 sm:$0xff]  }
 0x410   : > { %5780 = vpow2.f32 %v2518_v24  ;;  %v2514_v56 = vmul.f32 1.442695, %v2481_v57  ;;  %v4820_v1 = vadd.f32 -1.0, %v5775_v43  ;;  %v2559_v22 = vsel %vm2459_vm7, %v2413_v11, %v4822_v7  ;;  %3410 = vmatpush1.bf16.msra.mxu0 %v5598_v61  ;;  %v5612_v24 = vld [vmem:[%s7804_s6 + $0x124] ss:$28 sps:$4 sm:$0xff]   ;;  %3280 = vmatprep.subr.bf16.mxu1 %v5603_v53 }
 0x411   : > { %v2573_v31 = vpack.c.bf16 %v2559_v22, %v2558_v6  ;;  %3411 = vmatprep.subr.bf16.mxu0 %v5606_v30  ;;  %v5601_v36 = vld [vmem:[%s7804_s6 + $0x118] ss:$28 sps:$4 sm:$0xff]   ;;  %v5610_v57 = vld [vmem:[%s7804_s6 + $0x120] ss:$28 sps:$4 sm:$0xff]   ;;  %v5618_v7 = vld [vmem:[%s7804_s6 + $0xec] ss:$28 sps:$4 sm:$0xff]  }
 0x412   : > { %5782 = vpow2.f32 %v2514_v56  ;;  %v2557_v3 = vsel %vm2457_vm9, %v2405_v28, %v4820_v1  ;;  %3281 = vmatpush1.bf16.msra.mxu1 %v5601_v36  ;;  %v5609_v62 = vld [vmem:[%s7804_s6 + $0xe4] ss:$28 sps:$4 sm:$0xff]   ;;  %v5615_v56 = vld [vmem:[%s7804_s6 + $0xac] ss:$28 sps:$4 sm:$0xff]   ;;  %v5621_v1 = vld [vmem:[%s7804_s6 + $0xb4] ss:$28 sps:$4 sm:$0xff]  }
 0x413   : > { %v2572_v51 = vpack.c.bf16 %v2557_v3, %v2556_v20  ;;  %v5607_v43 = vld [vmem:[%s7804_s6 + $0xe0] ss:$28 sps:$4 sm:$0xff]   ;;  %v5616_v55 = vld [vmem:[%s7804_s6 + $0xe8] ss:$28 sps:$4 sm:$0xff]   ;;  %3282 = vmatprep.subr.bf16.mxu1 %v5609_v62  ;;  %v5619_v20 = vld [vmem:[%s7804_s6 + $0xb0] ss:$28 sps:$4 sm:$0xff]  }
 0x414   : > { %v5613_v22 = vld [vmem:[%s7804_s6 + $0xa8] ss:$28 sps:$4 sm:$0xff]   ;;  %v5624_v3 = vld [vmem:[%s7804_s6 + $0x74] ss:$28 sps:$4 sm:$0xff]   ;;  %v5627_v6 = vld [vmem:[%s7804_s6 + $0x7c] ss:$28 sps:$4 sm:$0xff]  }
 0x415   : > { %v5348_v9 = vpop.f32.mrf.mxu1  ;;  %5366 = vmatprep.mubr.msk.bf16.mxu0 %vm2133_vm10, %v2572_v51  ;;  %v5622_v51 = vld [vmem:[%s7804_s6 + $0x70] ss:$28 sps:$4 sm:$0xff]   ;;  %v5640_v36 = vld [vmem:[%s7804_s6 + $0x198] ss:$28 sps:$4 sm:$0xff]  }
 0x416   : > { %v2442_v10 = vadd.f32 %v5348_v9, %v6795_v29  ;;  %5367 = vmatmul.mubr.msk.bf16.gmra.mxu0 %vm2133_vm10, %v2573_v31  ;;  %3283 = vmatpush1.bf16.msra.mxu1 %v5607_v43  ;;  %v5625_v9 = vld [vmem:[%s7804_s6 + $0x78] ss:$28 sps:$4 sm:$0xff]   ;;  %v5645_v43 = vld [vmem:[%s7804_s6 + $0x164] ss:$28 sps:$4 sm:$0xff]  }
 0x417   : > { %v2433_v18 = vpop.f32.mrf.mxu1  ;;  %3284 = vmatprep.subr.bf16.mxu1 %v5615_v56  ;;  %v5630_v31 = vld [vmem:[%s7804_s6 + $0x3c] ss:$28 sps:$4 sm:$0xff]  }
 0x418   : > { %v2486_v2 = vmin.f32 %v2442_v10, 0.0  ;;  %v2434_v38 = vadd.f32 %v2433_v18, %v6795_v29  ;;  %vm2466_vm4 = vcmp.gt.f32.partialorder %v2442_v10, 0.0  ;;  %v5628_v18 = vld [vmem:[%s7804_s6 + $0x38] ss:$28 sps:$4 sm:$0xff]  }
 0x419   : > { %v5349_v0 = vpop.f32.mrf.mxu1  ;;  %v5777_v59 = vpop.eup %5776 }
 0x41a   : > { %v2484_v54 = vmin.f32 %v2434_v38, 0.0  ;;  %v2445_v14 = vadd.f32 %v5349_v0, %v6795_v29  ;;  %v2524_v11 = vmul.f32 1.442695, %v2486_v2  ;;  %v4825_v60 = vadd.f32 -1.0, %v5777_v59  ;;  %3285 = vmatpush1.bf16.msra.mxu1 %v5613_v22  ;;  %v5631_v2 = vld [vmem:[%s7804_s6 + $0x40] ss:$28 sps:$4 sm:$0xff]  }
 0x41b   : > { %v2436_v17 = vpop.f32.mrf.mxu1  ;;  %v5779_v12 = vpop.eup %5778  ;;  %vm2464_vm2 = vcmp.gt.f32.partialorder %v2434_v38, 0.0  ;;  %3286 = vmatprep.subr.bf16.mxu1 %v5624_v3  ;;  %v5639_v0 = vld [vmem:[%s7804_s6 + $0xc] ss:$28 sps:$4 sm:$0xff]  }
 0x41c   : > { %v2520_v21 = vmul.f32 1.442695, %v2484_v54  ;;  %v2487_v25 = vmin.f32 %v2445_v14, 0.0  ;;  %v2437_v40 = vadd.f32 %v2436_v17, %v6795_v29  ;;  %v4823_v26 = vadd.f32 -1.0, %v5779_v12  ;;  %v5634_v54 = vld [vmem:[%s7804_s6] ss:$28 sps:$4 sm:$0xff]  }
 0x41d   : > { %v5781_v23 = vpop.eup %5780  ;;  %v2562_v49 = vsel %vm2462_vm15, %v6828_v50, %v4825_v60  ;;  %vm2467_vm1 = vcmp.gt.f32.partialorder %v2445_v14, 0.0  ;;  %v5637_v59 = vld [vmem:[%s7804_s6 + $0x8] ss:$28 sps:$4 sm:$0xff]   ;;  %v5642_v17 = vld [vmem:[%s7804_s6 + $0x19c] ss:$28 sps:$4 sm:$0xff]  }
 0x41e   : > { %v4826_v47 = vadd.f32 -1.0, %v5781_v23  ;;  %5784 = vpow2.f32 %v2520_v21  ;;  %v2526_v28 = vmul.f32 1.442695, %v2487_v25  ;;  %v2485_v19 = vmin.f32 %v2437_v40, 0.0  ;;  %3287 = vmatpush1.bf16.msra.mxu1 %v5622_v51  ;;  %v6949_v12 = vld [vmem:[%s7804_s6 + $0x1a0] ss:$28 sps:$4 sm:$0xff]  }
 0x41f   : > { %v5783_v5 = vpop.eup %5782  ;;  %5786 = vpow2.f32 %v2524_v11  ;;  %v2560_v29 = vsel %vm2460_vm13, %v6834_v58, %v4823_v26  ;;  %vm2465_vm3 = vcmp.gt.f32.partialorder %v2437_v40, 0.0  ;;  %3288 = vmatprep.subr.bf16.mxu1 %v5630_v31  ;;  %v6955_v21 = vld [vmem:[%s7805_s7 + $0x4] ss:$0 sm:$0xff] }
 0x420   : > { %v4824_v32 = vadd.f32 -1.0, %v5783_v5  ;;  %5788 = vpow2.f32 %v2526_v28  ;;  %v2522_v33 = vmul.f32 1.442695, %v2485_v19  ;;  %v2563_v4 = vsel %vm2463_vm12, %v2429_v52, %v4826_v47 }
 0x421   : > { %v2575_v63 = vpack.c.bf16 %v2563_v4, %v2562_v49 }
 0x422   : > { %v2561_v39 = vsel %vm2461_vm14, %v2421_v42, %v4824_v32  ;;  %5790 = vpow2.f32 %v2522_v33  ;;  %v5604_v42 = vld [vmem:[%s7804_s6 + $0x158] ss:$28 sps:$4 sm:$0xff]   ;;  %3289 = vmatpush1.bf16.msra.mxu1 %v5628_v18 }
 0x423   : > { %v2574_v16 = vpack.c.bf16 %v2561_v39, %v2560_v29  ;;  %3412 = vmatpush1.bf16.msra.mxu0 %v5604_v42 }
 0x424   : > { %3413 = vmatprep.subr.bf16.mxu0 %v5612_v24 }
 0x425   : > { %5370 = vmatprep.mubr.msk.bf16.mxu0 %vm2133_vm10, %v2574_v16 }
 0x426   : > { %5371 = vmatmul.mubr.msk.bf16.gmra.mxu0 %vm2133_vm10, %v2575_v63 }
 0x427   : > { %3414 = vmatpush1.bf16.msra.mxu0 %v5610_v57 }
 0x428   : > { %3415 = vmatprep.subr.bf16.mxu0 %v5618_v7 }
 0x42b   : > { %v5785_v34 = vpop.eup %5784  ;;  %3416 = vmatpush1.bf16.msra.mxu0 %v5616_v55 }
 0x42c   : > { %v5787_v15 = vpop.eup %5786  ;;  %v4827_v27 = vadd.f32 -1.0, %v5785_v34  ;;  %3417 = vmatprep.subr.bf16.mxu0 %v5621_v1  ;;  %v5659_v1 = vld [vmem:[%s7804_s6 + $0x168] ss:$28 sps:$4 sm:$0xff]  }
 0x42d   : > { %v5789_v37 = vpop.eup %5788  ;;  %v4829_v44 = vadd.f32 -1.0, %v5787_v15 }
 0x42e   : > { %v4830_v41 = vadd.f32 -1.0, %v5789_v37  ;;  %v2564_v50 = vsel %vm2464_vm2, %v2434_v38, %v4827_v27  ;;  %v5636_v38 = vld [vmem:[%s7804_s6 + $0x4] ss:$28 sps:$4 sm:$0xff]  }
 0x42f   : > { %v5791_v13 = vpop.eup %5790  ;;  %v2566_v46 = vsel %vm2466_vm4, %v2442_v10, %v4829_v44  ;;  %3418 = vmatpush1.bf16.msra.mxu0 %v5619_v20  ;;  %v5633_v10 = vld [vmem:[%s7804_s6 + $0x44] ss:$28 sps:$4 sm:$0xff]   ;;  %3290 = vmatprep.subr.bf16.mxu1 %v5636_v38 }
 0x430   : > { %v4828_v45 = vadd.f32 -1.0, %v5791_v13  ;;  %v2567_v58 = vsel %vm2467_vm1, %v2445_v14, %v4830_v41  ;;  %3419 = vmatprep.subr.bf16.mxu0 %v5627_v6  ;;  %3291 = vmatpush1.bf16.msra.mxu1 %v5634_v54  ;;  %v6120_v14 = vmov 0   ;;  %v5643_v20 = vld [vmem:[%s7804_s6 + $0x160] ss:$28 sps:$4 sm:$0xff]   ;;  %v5648_v6 = vld [vmem:[%s7804_s6 + $0x12c] ss:$28 sps:$4 sm:$0xff]  }
 0x431   : > { %v2577_v8 = vpack.c.bf16 %v2567_v58, %v2566_v46  ;;  %3308 = vmatprep.mubr.bf16.mxu1 %v6120_v14  ;;  %3542 = vmatprep.subr.bf16.mxu1 %v5642_v17  ;;  %v5660_v17 = vld [vmem:[%s7804_s6 + $0x130] ss:$28 sps:$4 sm:$0xff]  }
 0x432   : > { %v2565_v48 = vsel %vm2465_vm3, %v2437_v40, %v4828_v45 }
 0x433   : > { %v2576_v52 = vpack.c.bf16 %v2565_v48, %v2564_v50  ;;  %3420 = vmatpush1.bf16.msra.mxu0 %v5625_v9 }
 0x434   : > { %3421 = vmatprep.subr.bf16.mxu0 %v5633_v10 }
 0x435   : > { %5374 = vmatprep.mubr.msk.bf16.mxu0 %vm2133_vm10, %v2576_v52 }
 0x436   : > { %5375 = vmatmul.mubr.msk.bf16.gmra.mxu0 %vm2133_vm10, %v2577_v8 }
 0x437   : > { %3422 = vmatpush1.bf16.msra.mxu0 %v5631_v2  ;;  %3441 = vmatprep.mubr.bf16.mxu0 %v6120_v14 }
 0x438   : > { %3423 = vmatprep.subr.bf16.mxu0 %v5639_v0 }
 0x43b   : > { %3424 = vmatpush1.bf16.msra.mxu0 %v5637_v59  ;;  %v5646_v59 = vld [vmem:[%s7804_s6 + $0x128] ss:$28 sps:$4 sm:$0xff]  }
 0x43c   : > { %5378 = vmatprep.subr.bf16.mxu0 %v6949_v12 }
 0x4b6   : > { %v5360_v11 = vpop.f32.mrf.mxu0 }
 0x4b7   : > { %v6962_v28 = vadd.f32 %v5360_v11, %v6955_v21 }
 0x4b8   : > { %v2675_v23 = vpop.f32.mrf.mxu0 }
 0x4b9   : > { %v2676_v25 = vadd.f32 %v2675_v23, %v6955_v21  ;;  %v2776_v33 = vmin.f32 %v6962_v28, 0.0  ;;  %vm2756_vm7 = vcmp.gt.f32.partialorder %v6962_v28, 0.0  ;;  %v5651_v23 = vld [vmem:[%s7804_s6 + $0xf4] ss:$28 sps:$4 sm:$0xff]  }
 0x4ba   : > { %v5361_v40 = vpop.f32.mrf.mxu0 }
 0x4bb   : > { %v2774_v47 = vmin.f32 %v2676_v25, 0.0  ;;  %v6959_v26 = vadd.f32 %v5361_v40, %v6955_v21  ;;  %v2798_v49 = vmul.f32 1.442695, %v2776_v33  ;;  %vm2754_vm10 = vcmp.gt.f32.partialorder %v2676_v25, 0.0  ;;  %v5665_v33 = vld [vmem:[%s7804_s6 + $0xc0] ss:$28 sps:$4 sm:$0xff]  }
 0x4bc   : > { %v2678_v19 = vpop.f32.mrf.mxu0 }
 0x4bd   : > { %v2794_v5 = vmul.f32 1.442695, %v2774_v47  ;;  %v2777_v60 = vmin.f32 %v6959_v26, 0.0  ;;  %v2679_v32 = vadd.f32 %v2678_v19, %v6955_v21  ;;  %vm2757_vm6 = vcmp.gt.f32.partialorder %v6959_v26, 0.0  ;;  %v5664_v47 = vld [vmem:[%s7804_s6 + $0xf8] ss:$28 sps:$4 sm:$0xff]  }
 0x4bf   : > { %5792 = vpow2.f32 %v2794_v5  ;;  %v2775_v4 = vmin.f32 %v2679_v32, 0.0  ;;  %v2800_v29 = vmul.f32 1.442695, %v2777_v60  ;;  %vm2755_vm5 = vcmp.gt.f32.partialorder %v2679_v32, 0.0  ;;  %v5649_v5 = vld [vmem:[%s7804_s6 + $0xf0] ss:$28 sps:$4 sm:$0xff]  }
 0x4c1   : > { %v2796_v39 = vmul.f32 1.442695, %v2775_v4 }
 0x4c3   : > { %5794 = vpow2.f32 %v2796_v39 }
 0x4c4   : > { %5796 = vpow2.f32 %v2800_v29 }
 0x4c5   : > { %5798 = vpow2.f32 %v2798_v49 }
 0x4c6   : > { %v5364_v16 = vpop.f32.mrf.mxu0 }
 0x4c7   : > { %v6975_v13 = vadd.f32 %v5364_v16, %v6955_v21 }
 0x4c8   : > { %v2691_v63 = vpop.f32.mrf.mxu0 }
 0x4c9   : > { %v6968_v34 = vadd.f32 %v2691_v63, %v6955_v21  ;;  %v2780_v52 = vmin.f32 %v6975_v13, 0.0  ;;  %vm2760_vm12 = vcmp.gt.f32.partialorder %v6975_v13, 0.0 }
 0x4ca   : > { %v5365_v15 = vpop.f32.mrf.mxu0 }
 0x4cb   : > { %v2778_v37 = vmin.f32 %v6968_v34, 0.0  ;;  %v6972_v27 = vadd.f32 %v5365_v15, %v6955_v21  ;;  %v2806_v7 = vmul.f32 1.442695, %v2780_v52  ;;  %vm2758_vm8 = vcmp.gt.f32.partialorder %v6968_v34, 0.0 }
 0x4cc   : > { %v5793_v41 = vpop.eup %5792  ;;  %v2694_v44 = vpop.f32.mrf.mxu0 }
 0x4cd   : > { %v2802_v45 = vmul.f32 1.442695, %v2778_v37  ;;  %v2781_v58 = vmin.f32 %v6972_v27, 0.0  ;;  %v6979_v50 = vadd.f32 %v2694_v44, %v6955_v21  ;;  %v4845_v48 = vadd.f32 -1.0, %v5793_v41 }
 0x4ce   : > { %vm2761_vm11 = vcmp.gt.f32.partialorder %v6972_v27, 0.0 }
 0x4cf   : > { %5800 = vpow2.f32 %v2802_v45  ;;  %v2779_v8 = vmin.f32 %v6979_v50, 0.0  ;;  %v2808_v30 = vmul.f32 1.442695, %v2781_v58  ;;  %v2854_v53 = vsel %vm2754_vm10, %v2676_v25, %v4845_v48  ;;  %v5652_v45 = vld [vmem:[%s7804_s6 + $0xb8] ss:$28 sps:$4 sm:$0xff]  }
 0x4d0   : > { %v5795_v46 = vpop.eup %5794  ;;  %vm2759_vm9 = vcmp.gt.f32.partialorder %v6979_v50, 0.0 }
 0x4d1   : > { %v4846_v35 = vadd.f32 -1.0, %v5795_v46  ;;  %v5797_v61 = vpop.eup %5796  ;;  %v2804_v42 = vmul.f32 1.442695, %v2779_v8 }
 0x4d2   : > { %v5799_v57 = vpop.eup %5798  ;;  %v4848_v55 = vadd.f32 -1.0, %v5797_v61 }
 0x4d3   : > { %v2855_v24 = vsel %vm2755_vm5, %v2679_v32, %v4846_v35  ;;  %5802 = vpow2.f32 %v2804_v42  ;;  %v4847_v22 = vadd.f32 -1.0, %v5799_v57  ;;  %v5654_v32 = vld [vmem:[%s7804_s6 + $0xbc] ss:$28 sps:$4 sm:$0xff]  }
 0x4d4   : > { %v6986_v62 = vpack.c.bf16 %v2855_v24, %v2854_v53  ;;  %5804 = vpow2.f32 %v2808_v30  ;;  %v2857_v51 = vsel %vm2757_vm6, %v6959_v26, %v4848_v55  ;;  %v5656_v35 = vld [vmem:[%s7804_s6 + $0x80] ss:$28 sps:$4 sm:$0xff]   ;;  %v5663_v53 = vld [vmem:[%s7804_s6 + $0x4c] ss:$28 sps:$4 sm:$0xff]  }
 0x4d5   : > { %5806 = vpow2.f32 %v2806_v7  ;;  %v2856_v10 = vsel %vm2756_vm7, %v6962_v28, %v4847_v22  ;;  %v5670_v24 = vld [vmem:[%s7804_s6 + $0x50] ss:$28 sps:$4 sm:$0xff]  }
 0x4d6   : > { %v5368_v56 = vpop.f32.mrf.mxu0  ;;  %3309 = vmatmul.mubr.bf16.vlgmr.msra.gmra.mxu1 %v6986_v62  ;;  %3442 = vmatmul.mubr.bf16.vlgmr.msra.gmra.mxu0 %v6986_v62  ;;  %v7013_v2 = vpack.c.bf16 %v2857_v51, %v2856_v10 }
 0x4d7   : > { %3543 = vmatpush1.bf16.msra.mxu1 %v5640_v36  ;;  %3318 = vmatprep.mubr.bf16.mxu1 %v6120_v14  ;;  %v7016_v38 = vadd.f32 %v5368_v56, %v6955_v21 }
 0x4d8   : > { %v2707_v3 = vpop.f32.mrf.mxu0  ;;  %3451 = vmatprep.mubr.bf16.mxu0 %v6120_v14  ;;  %3544 = vmatprep.subr.bf16.mxu1 %v5645_v43 }
 0x4d9   : > { %v7007_v9 = vadd.f32 %v2707_v3, %v6955_v21  ;;  %5379 = vmatpush3.bf16.msra.mxu0 %v6949_v12  ;;  %v2784_v28 = vmin.f32 %v7016_v38, 0.0  ;;  %vm2764_vm1 = vcmp.gt.f32.partialorder %v7016_v38, 0.0 }
 0x4da   : > { %v5369_v31 = vpop.f32.mrf.mxu0  ;;  %5380 = vmatprep.subr.bf16.mxu0 %v5659_v1 }
 0x4db   : > { %v2782_v18 = vmin.f32 %v7007_v9, 0.0  ;;  %3545 = vmatpush1.bf16.msra.mxu1 %v5643_v20  ;;  %v7019_v0 = vadd.f32 %v5369_v31, %v6955_v21  ;;  %v2814_v15 = vmul.f32 1.442695, %v2784_v28  ;;  %v5671_v20 = vld [vmem:[%s7804_s6 + $0x18] ss:$28 sps:$4 sm:$0xff]   ;;  %vm2762_vm13 = vcmp.gt.f32.partialorder %v7007_v9, 0.0 }
 0x4dc   : > { %v2710_v54 = vpop.f32.mrf.mxu0  ;;  %3546 = vmatprep.subr.bf16.mxu1 %v5648_v6  ;;  %v5801_v12 = vpop.eup %5800 }
 0x4dd   : > { %v2810_v11 = vmul.f32 1.442695, %v2782_v18  ;;  %5381 = vmatpush3.bf16.msra.mxu0 %v5659_v1  ;;  %v2785_v25 = vmin.f32 %v7019_v0, 0.0  ;;  %v7032_v40 = vadd.f32 %v2710_v54, %v6955_v21  ;;  %v4849_v26 = vadd.f32 -1.0, %v5801_v12  ;;  %v5661_v1 = vld [vmem:[%s7804_s6 + $0x48] ss:$28 sps:$4 sm:$0xff]  }
 0x4de   : > { %3319 = vmatmul.mubr.bf16.gmra.mxu1 %v7013_v2  ;;  %3452 = vmatmul.mubr.bf16.gmra.mxu0 %v7013_v2  ;;  %v5667_v18 = vld [vmem:[%s7804_s6 + $0x10] ss:$28 sps:$4 sm:$0xff]   ;;  %vm2765_vm15 = vcmp.gt.f32.partialorder %v7019_v0, 0.0 }
 0x4df   : > { %3328 = vmatprep.mubr.bf16.mxu1 %v6120_v14  ;;  %3461 = vmatprep.mubr.bf16.mxu0 %v6120_v14  ;;  %5808 = vpow2.f32 %v2810_v11  ;;  %v2783_v19 = vmin.f32 %v7032_v40, 0.0  ;;  %v2816_v29 = vmul.f32 1.442695, %v2785_v25  ;;  %v2858_v16 = vsel %vm2758_vm8, %v6968_v34, %v4849_v26  ;;  %v5658_v34 = vld [vmem:[%s7804_s6 + $0x84] ss:$28 sps:$4 sm:$0xff]  }
 0x4e0   : > { %3547 = vmatpush1.bf16.msra.mxu1 %v5646_v59  ;;  %5382 = vmatprep.subr.bf16.mxu0 %v5660_v17  ;;  %v5803_v60 = vpop.eup %5802  ;;  %vm2763_vm14 = vcmp.gt.f32.partialorder %v7032_v40, 0.0 }
 0x4e1   : > { %3548 = vmatprep.subr.bf16.mxu1 %v5651_v23  ;;  %5383 = vmatpush3.bf16.msra.mxu0 %v5660_v17  ;;  %v4850_v4 = vadd.f32 -1.0, %v5803_v60  ;;  %v2812_v39 = vmul.f32 1.442695, %v2783_v19  ;;  %v5805_v49 = vpop.eup %5804 }
 0x4e2   : > { %5384 = vmatprep.subr.bf16.mxu0 %v5664_v47  ;;  %v5807_v37 = vpop.eup %5806  ;;  %v4852_v58 = vadd.f32 -1.0, %v5805_v49 }
 0x4e3   : > { %v2859_v63 = vsel %vm2759_vm9, %v6979_v50, %v4850_v4  ;;  %5810 = vpow2.f32 %v2812_v39  ;;  %v5666_v50 = vld [vmem:[%s7804_s6 + $0x88] ss:$28 sps:$4 sm:$0xff]   ;;  %v4851_v46 = vadd.f32 -1.0, %v5807_v37 }
 0x4e4   : > { %3549 = vmatpush1.bf16.msra.mxu1 %v5649_v5  ;;  %v7056_v41 = vpack.c.bf16 %v2859_v63, %v2858_v16  ;;  %5812 = vpow2.f32 %v2816_v29  ;;  %v2861_v61 = vsel %vm2761_vm11, %v6972_v27, %v4852_v58 }
 0x4e5   : > { %3550 = vmatprep.subr.bf16.mxu1 %v5654_v32  ;;  %5385 = vmatpush3.bf16.msra.mxu0 %v5664_v47  ;;  %5814 = vpow2.f32 %v2814_v15  ;;  %v2860_v27 = vsel %vm2760_vm12, %v6975_v13, %v4851_v46  ;;  %v5669_v13 = vld [vmem:[%s7804_s6 + $0x14] ss:$28 sps:$4 sm:$0xff]  }
 0x4e6   : > { %v5372_v44 = vpop.f32.mrf.mxu0  ;;  %5386 = vmatprep.subr.bf16.mxu0 %v5665_v33  ;;  %3329 = vmatmul.mubr.bf16.gmra.mxu1 %v7056_v41  ;;  %v7094_v55 = vpack.c.bf16 %v2861_v61, %v2860_v27 }
 0x4e7   : > { %3462 = vmatmul.mubr.bf16.gmra.mxu0 %v7056_v41  ;;  %3338 = vmatprep.mubr.bf16.mxu1 %v6120_v14  ;;  %v7092_v57 = vadd.f32 %v5372_v44, %v6955_v21 }
 0x4e8   : > { %v2723_v48 = vpop.f32.mrf.mxu0  ;;  %3471 = vmatprep.mubr.bf16.mxu0 %v6120_v14  ;;  %3551 = vmatpush1.bf16.msra.mxu1 %v5652_v45 }
 0x4e9   : > { %v7070_v52 = vadd.f32 %v2723_v48, %v6955_v21  ;;  %5387 = vmatpush3.bf16.msra.mxu0 %v5665_v33  ;;  %3552 = vmatprep.subr.bf16.mxu1 %v5658_v34  ;;  %v2788_v51 = vmin.f32 %v7092_v57, 0.0  ;;  %vm2768_vm10 = vcmp.gt.f32.partialorder %v7092_v57, 0.0 }
 0x4ea   : > { %v5373_v8 = vpop.f32.mrf.mxu0  ;;  %5388 = vmatprep.subr.bf16.mxu0 %v5666_v50 }
 0x4eb   : > { %v2786_v30 = vmin.f32 %v7070_v52, 0.0  ;;  %v7081_v42 = vadd.f32 %v5373_v8, %v6955_v21  ;;  %v2822_v23 = vmul.f32 1.442695, %v2788_v51  ;;  %vm2766_vm2 = vcmp.gt.f32.partialorder %v7070_v52, 0.0 }
 0x4ec   : > { %v2726_v36 = vpop.f32.mrf.mxu0  ;;  %v5809_v43 = vpop.eup %5808  ;;  %3553 = vmatpush1.bf16.msra.mxu1 %v5656_v35 }
 0x4ed   : > { %v2818_v7 = vmul.f32 1.442695, %v2786_v30  ;;  %v7097_v56 = vadd.f32 %v2726_v36, %v6955_v21  ;;  %5389 = vmatpush3.bf16.msra.mxu0 %v5666_v50  ;;  %v2789_v22 = vmin.f32 %v7081_v42, 0.0  ;;  %3554 = vmatprep.subr.bf16.mxu1 %v5663_v53  ;;  %v4853_v6 = vadd.f32 -1.0, %v5809_v43 }
 0x4ee   : > { %5390 = vmatprep.subr.bf16.mxu0 %v5670_v24  ;;  %3339 = vmatmul.mubr.bf16.gmra.mxu1 %v7094_v55  ;;  %vm2769_vm4 = vcmp.gt.f32.partialorder %v7081_v42, 0.0 }
 0x4ef   : > { %5816 = vpow2.f32 %v2818_v7  ;;  %v2787_v3 = vmin.f32 %v7097_v56, 0.0  ;;  %3472 = vmatmul.mubr.bf16.gmra.mxu0 %v7094_v55  ;;  %3348 = vmatprep.mubr.bf16.mxu1 %v6120_v14  ;;  %v2824_v59 = vmul.f32 1.442695, %v2789_v22  ;;  %v2862_v12 = vsel %vm2762_vm13, %v7007_v9, %v4853_v6 }
 0x4f0   : > { %3481 = vmatprep.mubr.bf16.mxu0 %v6120_v14  ;;  %v5811_v31 = vpop.eup %5810  ;;  %3555 = vmatpush1.bf16.msra.mxu1 %v5661_v1  ;;  %vm2767_vm3 = vcmp.gt.f32.partialorder %v7097_v56, 0.0 }
 0x4f1   : > { %v2820_v10 = vmul.f32 1.442695, %v2787_v3  ;;  %5391 = vmatpush3.bf16.msra.mxu0 %v5670_v24  ;;  %v4854_v54 = vadd.f32 -1.0, %v5811_v31  ;;  %3556 = vmatprep.subr.bf16.mxu1 %v5669_v13  ;;  %v5813_v17 = vpop.eup %5812 }
 0x4f2   : > { %5392 = vmatprep.subr.bf16.mxu0 %v5671_v20  ;;  %v5815_v25 = vpop.eup %5814  ;;  %v4856_v28 = vadd.f32 -1.0, %v5813_v17 }
 0x4f3   : > { %5818 = vpow2.f32 %v2820_v10  ;;  %v2863_v11 = vsel %vm2763_vm14, %v7032_v40, %v4854_v54  ;;  %v4855_v5 = vadd.f32 -1.0, %v5815_v25 }
 0x4f4   : > { %v7122_v47 = vpack.c.bf16 %v2863_v11, %v2862_v12  ;;  %3557 = vmatpush1.bf16.msra.mxu1 %v5667_v18  ;;  %5820 = vpow2.f32 %v2824_v59  ;;  %v2865_v60 = vsel %vm2765_vm15, %v7019_v0, %v4856_v28 }
 0x4f5   : > { %5393 = vmatpush3.bf16.msra.mxu0 %v5671_v20  ;;  %5822 = vpow2.f32 %v2822_v23  ;;  %v2864_v39 = vsel %vm2764_vm1, %v7016_v38, %v4855_v5 }
 0x4f6   : > { %v5376_v26 = vpop.f32.mrf.mxu0  ;;  %3349 = vmatmul.mubr.bf16.gmra.mxu1 %v7122_v47  ;;  %v7142_v63 = vpack.c.bf16 %v2865_v60, %v2864_v39 }
 0x4f7   : > { %3482 = vmatmul.mubr.bf16.gmra.mxu0 %v7122_v47  ;;  %3358 = vmatprep.mubr.bf16.mxu1 %v6120_v14  ;;  %v7140_v49 = vadd.f32 %v5376_v26, %v6955_v21 }
 0x4f8   : > { %v2739_v19 = vpop.f32.mrf.mxu0  ;;  %3491 = vmatprep.mubr.bf16.mxu0 %v6120_v14 }
 0x4f9   : > { %v7127_v9 = vadd.f32 %v2739_v19, %v6955_v21  ;;  %v2792_v38 = vmin.f32 %v7140_v49, 0.0  ;;  %vm2772_vm8 = vcmp.gt.f32.partialorder %v7140_v49, 0.0 }
 0x4fa   : > { %v5377_v40 = vpop.f32.mrf.mxu0 }
 0x4fb   : > { %v2790_v32 = vmin.f32 %v7127_v9, 0.0  ;;  %v7136_v33 = vadd.f32 %v5377_v40, %v6955_v21  ;;  %v2830_v35 = vmul.f32 1.442695, %v2792_v38  ;;  %vm2770_vm5 = vcmp.gt.f32.partialorder %v7127_v9, 0.0 }
 0x4fc   : > { %v2742_v4 = vpop.f32.mrf.mxu0  ;;  %v5817_v29 = vpop.eup %5816 }
 0x4fd   : > { %v2826_v16 = vmul.f32 1.442695, %v2790_v32  ;;  %v2743_v15 = vadd.f32 %v2742_v4, %v6955_v21  ;;  %v2793_v0 = vmin.f32 %v7136_v33, 0.0  ;;  %v4857_v37 = vadd.f32 -1.0, %v5817_v29 }
 0x4fe   : > { %3359 = vmatmul.mubr.bf16.gmra.mxu1 %v7142_v63  ;;  %vm2773_vm7 = vcmp.gt.f32.partialorder %v7136_v33, 0.0 }
 0x4ff   : > { %5824 = vpow2.f32 %v2826_v16  ;;  %v2791_v44 = vmin.f32 %v2743_v15, 0.0  ;;  %3492 = vmatmul.mubr.bf16.gmra.mxu0 %v7142_v63  ;;  %3368 = vmatprep.mubr.bf16.mxu1 %v6120_v14  ;;  %v2832_v21 = vmul.f32 1.442695, %v2793_v0  ;;  %v2866_v48 = vsel %vm2766_vm2, %v7070_v52, %v4857_v37 }
 0x500   : > { %v5819_v45 = vpop.eup %5818  ;;  %3501 = vmatprep.mubr.bf16.mxu0 %v6120_v14  ;;  %vm2771_vm6 = vcmp.gt.f32.partialorder %v2743_v15, 0.0 }
 0x501   : > { %v4858_v58 = vadd.f32 -1.0, %v5819_v45  ;;  %v2828_v34 = vmul.f32 1.442695, %v2791_v44  ;;  %v5821_v50 = vpop.eup %5820 }
 0x502   : > { %v5823_v61 = vpop.eup %5822  ;;  %v4860_v30 = vadd.f32 -1.0, %v5821_v50 }
 0x503   : > { %v2867_v46 = vsel %vm2767_vm3, %v7097_v56, %v4858_v58  ;;  %5826 = vpow2.f32 %v2828_v34  ;;  %v4859_v53 = vadd.f32 -1.0, %v5823_v61 }
 0x504   : > { %v7155_v8 = vpack.c.bf16 %v2867_v46, %v2866_v48  ;;  %5828 = vpow2.f32 %v2832_v21  ;;  %v2869_v52 = vsel %vm2769_vm4, %v7081_v42, %v4860_v30 }
 0x505   : > { %5830 = vpow2.f32 %v2830_v35  ;;  %v2868_v36 = vsel %vm2768_vm10, %v7092_v57, %v4859_v53 }
 0x506   : > { %3369 = vmatmul.mubr.bf16.gmra.mxu1 %v7155_v8  ;;  %v2881_v27 = vpack.c.bf16 %v2869_v52, %v2868_v36 }
 0x507   : > { %3502 = vmatmul.mubr.bf16.gmra.mxu0 %v7155_v8  ;;  %3378 = vmatprep.mubr.bf16.mxu1 %v6120_v14 }
 0x508   : > { %3511 = vmatprep.mubr.bf16.mxu0 %v6120_v14 }
 0x50c   : > { %v5825_v24 = vpop.eup %5824 }
 0x50d   : > { %v4861_v7 = vadd.f32 -1.0, %v5825_v24 }
 0x50e   : > { %3379 = vmatmul.mubr.bf16.gmra.mxu1 %v2881_v27 }
 0x50f   : > { %3512 = vmatmul.mubr.bf16.gmra.mxu0 %v2881_v27  ;;  %3388 = vmatprep.mubr.bf16.mxu1 %v6120_v14  ;;  %v2870_v42 = vsel %vm2770_vm5, %v7127_v9, %v4861_v7 }
 0x510   : > { %v5827_v43 = vpop.eup %5826  ;;  %3521 = vmatprep.mubr.bf16.mxu0 %v6120_v14 }
 0x511   : > { %v4862_v56 = vadd.f32 -1.0, %v5827_v43  ;;  %v5829_v1 = vpop.eup %5828 }
 0x512   : > { %v5831_v20 = vpop.eup %5830  ;;  %v4864_v57 = vadd.f32 -1.0, %v5829_v1 }
 0x513   : > { %v2871_v22 = vsel %vm2771_vm6, %v2743_v15, %v4862_v56  ;;  %v4863_v3 = vadd.f32 -1.0, %v5831_v20 }
 0x514   : > { %v2882_v13 = vpack.c.bf16 %v2871_v22, %v2870_v42  ;;  %v2873_v6 = vsel %vm2773_vm7, %v7136_v33, %v4864_v57 }
 0x515   : > { %v2872_v51 = vsel %vm2772_vm8, %v7140_v49, %v4863_v3 }
 0x516   : > { %3389 = vmatmul.mubr.bf16.gmra.mxu1 %v2882_v13  ;;  %v2883_v31 = vpack.c.bf16 %v2873_v6, %v2872_v51 }
 0x517   : > { %3522 = vmatmul.mubr.bf16.gmra.mxu0 %v2882_v13  ;;  %3398 = vmatprep.mubr.bf16.mxu1 %v6120_v14 }
 0x518   : > { %3531 = vmatprep.mubr.bf16.mxu0 %v6120_v14 }
 0x51e   : > { %3399 = vmatmul.mubr.bf16.gmra.mxu1 %v2883_v31 }
 0x51f   : > { %3532 = vmatmul.mubr.bf16.gmra.mxu0 %v2883_v31  ;;  %3574 = vmatprep.mubr.bf16.mxu1 %v6120_v14 }
 0x520   : > { %5394 = vmatprep.mubr.bf16.mxu0 %v6986_v62 }
 0x526   : > { %3575 = vmatmul.mubr.bf16.vlgmr.msra.gmra.mxu1 %v6986_v62  ;;  %v2953_v62 = vlaneseq }
 0x527   : > { %5395 = vmatmul.mubr.bf16.vlgmr.msra.gmra.mxu0 %v7013_v2  ;;  %3584 = vmatprep.mubr.bf16.mxu1 %v6120_v14 }
 0x528   : > { %5398 = vmatprep.mubr.bf16.mxu0 %v7056_v41 }
 0x52e   : > { %3585 = vmatmul.mubr.bf16.gmra.mxu1 %v7013_v2  ;;  %v7199_v2 = vshrl.u32 %v2953_v62, 7 }
 0x52f   : > { %5399 = vmatmul.mubr.bf16.gmra.mxu0 %v7094_v55  ;;  %3594 = vmatprep.mubr.bf16.mxu1 %v6120_v14 }
 0x530   : > { %5402 = vmatprep.mubr.bf16.mxu0 %v7122_v47  ;;  %v2955_v18 = vsub.s32 0, %v7199_v2  ;;  %v2963_v54 = vsub.s32 2, %v7199_v2  ;;  %v2967_v59 = vsub.s32 3, %v7199_v2  ;;  %v2971_v36 = vsub.s32 4, %v7199_v2 }
 0x531   : > { %v2979_v22 = vsub.s32 6, %v7199_v2 }
 0x536   : > { %3595 = vmatmul.mubr.bf16.gmra.mxu1 %v7056_v41  ;;  %v4865_v41 = vld [vmem:[%s7805_s7 + $0x5] ss:$8 sm:$0xf] }
 0x537   : > { %5403 = vmatmul.mubr.bf16.gmra.mxu0 %v7142_v63  ;;  %3604 = vmatprep.mubr.bf16.mxu1 %v6120_v14 }
 0x538   : > { %5406 = vmatprep.mubr.bf16.mxu0 %v7155_v8 }
 0x53e   : > { %3605 = vmatmul.mubr.bf16.gmra.mxu1 %v7094_v55  ;;  %v4866_v55 = vld [vmem:[%s7805_s7 + $0x5] ss:$8 sm:$0x70] }
 0x53f   : > { %5407 = vmatmul.mubr.bf16.gmra.mxu0 %v2881_v27  ;;  %3614 = vmatprep.mubr.bf16.mxu1 %v6120_v14  ;;  %v7207_v10 = vor.u32 %v4866_v55, %v4865_v41 }
 0x540   : > { %5410 = vmatprep.mubr.bf16.mxu0 %v2882_v13 }
 0x541   : > { %v7214_v17 = vrot.slane %v7207_v10, %v2955_v18  ;;  %v7217_v12 = vrot.slane %v7207_v10, %v2963_v54  ;;  %v7223_v23 = vrot.slane %v7207_v10, %v2967_v59  ;;  %v7248_v54 = vrot.slane %v7207_v10, %v2971_v36 }
 0x546   : > { %3615 = vmatmul.mubr.bf16.gmra.mxu1 %v7122_v47 }
 0x547   : > { %5411 = vmatmul.mubr.bf16.gmra.mxu0 %v2883_v31  ;;  %3624 = vmatprep.mubr.bf16.mxu1 %v6120_v14 }
 0x54e   : > { %3625 = vmatmul.mubr.bf16.gmra.mxu1 %v7142_v63 }
 0x54f   : > { %3634 = vmatprep.mubr.bf16.mxu1 %v6120_v14 }
 0x556   : > { %3635 = vmatmul.mubr.bf16.gmra.mxu1 %v7155_v8 }
 0x557   : > { %3644 = vmatprep.mubr.bf16.mxu1 %v6120_v14 }
 0x55e   : > { %3645 = vmatmul.mubr.bf16.gmra.mxu1 %v2881_v27 }
 0x55f   : > { %3654 = vmatprep.mubr.bf16.mxu1 %v6120_v14 }
 0x566   : > { %3655 = vmatmul.mubr.bf16.gmra.mxu1 %v2882_v13  ;;  %v2975_v13 = vsub.s32 5, %v7199_v2 }
 0x567   : > { %3664 = vmatprep.mubr.bf16.mxu1 %v6120_v14  ;;  %v2959_v14 = vsub.s32 1, %v7199_v2 }
 0x569   : > { %v7220_v11 = vrot.slane %v7207_v10, %v2959_v14 }
 0x56e   : > { %3665 = vmatmul.mubr.bf16.gmra.mxu1 %v2883_v31 }
 0x596   : > { %v3310_v25 = vpop.f32.mrf.mxu1  ;;  %v3443_v47 = vpop.f32.mrf.mxu0 }
 0x597   : > { %v3311_v26 = vadd.f32 %v3310_v25, %v7214_v17  ;;  %v3444_v28 = vadd.f32 %v3443_v47, %v7217_v12 }
 0x598   : > { %v3312_v19 = vpop.f32.mrf.mxu1  ;;  %v3445_v5 = vpop.f32.mrf.mxu0 }
 0x599   : > { %v3788_v9 = vmul.f32 0.5, %v3311_v26  ;;  %v3790_v40 = vmul.f32 0.5, %v3444_v28  ;;  %v3313_v60 = vadd.f32 %v3312_v19, %v7220_v11  ;;  %v3446_v32 = vadd.f32 %v3445_v5, %v7223_v23 }
 0x59a   : > { %v3314_v33 = vpop.f32.mrf.mxu1  ;;  %v3447_v4 = vpop.f32.mrf.mxu0  ;;  %v7251_v26 = vrot.slane %v7207_v10, %v2979_v22  ;;  %v7254_v28 = vrot.slane %v7207_v10, %v2975_v13 }
 0x59b   : > { %5832 = vtanh.f32 %v3788_v9  ;;  %v3789_v29 = vmul.f32 0.5, %v3313_v60  ;;  %v3791_v39 = vmul.f32 0.5, %v3446_v32  ;;  %v3315_v49 = vadd.f32 %v3314_v33, %v7214_v17 }
 0x59c   : > { %5834 = vtanh.f32 %v3790_v40  ;;  %v3448_v16 = vadd.f32 %v3447_v4, %v7217_v12  ;;  %v3316_v63 = vpop.f32.mrf.mxu1  ;;  %v3449_v15 = vpop.f32.mrf.mxu0 }
 0x59d   : > { %5836 = vtanh.f32 %v3789_v29  ;;  %v3795_v0 = vmul.f32 0.5, %v3315_v49  ;;  %v3317_v37 = vadd.f32 %v3316_v63, %v7220_v11  ;;  %v3450_v44 = vadd.f32 %v3449_v15, %v7223_v23 }
 0x59e   : > { %5838 = vtanh.f32 %v3791_v39  ;;  %v3797_v45 = vmul.f32 0.5, %v3448_v16  ;;  %v3320_v38 = vpop.f32.mrf.mxu1  ;;  %v3453_v58 = vpop.f32.mrf.mxu0 }
 0x59f   : > { %5840 = vtanh.f32 %v3795_v0  ;;  %v3796_v34 = vmul.f32 0.5, %v3317_v37  ;;  %v3798_v21 = vmul.f32 0.5, %v3450_v44  ;;  %v3321_v50 = vadd.f32 %v3320_v38, %v7214_v17 }
 0x5a0   : > { %5842 = vtanh.f32 %v3797_v45  ;;  %v3454_v48 = vadd.f32 %v3453_v58, %v7217_v12  ;;  %v3322_v46 = vpop.f32.mrf.mxu1  ;;  %v3455_v8 = vpop.f32.mrf.mxu0 }
 0x5a1   : > { %5844 = vtanh.f32 %v3796_v34  ;;  %v3802_v35 = vmul.f32 0.5, %v3321_v50  ;;  %v3323_v61 = vadd.f32 %v3322_v46, %v7220_v11  ;;  %v3456_v30 = vadd.f32 %v3455_v8, %v7223_v23 }
 0x5a2   : > { %5846 = vtanh.f32 %v3798_v21  ;;  %v3804_v53 = vmul.f32 0.5, %v3454_v48  ;;  %v3324_v52 = vpop.f32.mrf.mxu1  ;;  %v3457_v24 = vpop.f32.mrf.mxu0 }
 0x5a3   : > { %5848 = vtanh.f32 %v3802_v35  ;;  %v3803_v27 = vmul.f32 0.5, %v3323_v61  ;;  %v3805_v7 = vmul.f32 0.5, %v3456_v30  ;;  %v3325_v43 = vadd.f32 %v3324_v52, %v7214_v17 }
 0x5a4   : > { %5850 = vtanh.f32 %v3804_v53  ;;  %v3458_v56 = vadd.f32 %v3457_v24, %v7217_v12  ;;  %v3326_v1 = vpop.f32.mrf.mxu1  ;;  %v3459_v42 = vpop.f32.mrf.mxu0 }
 0x5a5   : > { %5852 = vtanh.f32 %v3803_v27  ;;  %v3809_v20 = vmul.f32 0.5, %v3325_v43  ;;  %v3327_v57 = vadd.f32 %v3326_v1, %v7220_v11  ;;  %v3460_v3 = vadd.f32 %v3459_v42, %v7223_v23 }
 0x5a6   : > { %5854 = vtanh.f32 %v3805_v7  ;;  %v3811_v6 = vmul.f32 0.5, %v3458_v56  ;;  %v3330_v62 = vpop.f32.mrf.mxu1 }
 0x5a7   : > { %5856 = vtanh.f32 %v3809_v20  ;;  %v3810_v51 = vmul.f32 0.5, %v3327_v57  ;;  %v3812_v31 = vmul.f32 0.5, %v3460_v3  ;;  %v3463_v41 = vpop.f32.mrf.mxu0  ;;  %v3331_v18 = vadd.f32 %v3330_v62, %v7214_v17 }
 0x5a8   : > { %v5833_v55 = vpop.eup %5832  ;;  %5858 = vtanh.f32 %v3811_v6  ;;  %v3464_v2 = vadd.f32 %v3463_v41, %v7217_v12  ;;  %v3332_v25 = vpop.f32.mrf.mxu1 }
 0x5a9   : > { %v5835_v14 = vpop.eup %5834  ;;  %v4068_v59 = vmul.f32 0.5, %v5833_v55  ;;  %5860 = vtanh.f32 %v3810_v51  ;;  %v3465_v47 = vpop.f32.mrf.mxu0  ;;  %v3816_v9 = vmul.f32 0.5, %v3331_v18  ;;  %v3333_v4 = vadd.f32 %v3332_v25, %v7220_v11 }
 0x5aa   : > { %v5837_v19 = vpop.eup %5836  ;;  %v4070_v5 = vmul.f32 0.5, %v5835_v14  ;;  %5862 = vtanh.f32 %v3812_v31  ;;  %v3818_v40 = vmul.f32 0.5, %v3464_v2  ;;  %v3466_v29 = vadd.f32 %v3465_v47, %v7223_v23  ;;  %v3334_v10 = vpop.f32.mrf.mxu1 }
 0x5ab   : > { %v5839_v60 = vpop.eup %5838  ;;  %v4208_v32 = vadd.f32 0.5, %v4068_v59  ;;  %v4069_v33 = vmul.f32 0.5, %v5837_v19  ;;  %v3467_v39 = vpop.f32.mrf.mxu0  ;;  %5864 = vtanh.f32 %v3816_v9  ;;  %v3335_v15 = vadd.f32 %v3334_v10, %v7214_v17 }
 0x5ac   : > { %v5841_v49 = vpop.eup %5840  ;;  %v4210_v16 = vadd.f32 0.5, %v4070_v5  ;;  %v4071_v63 = vmul.f32 0.5, %v5839_v60  ;;  %5866 = vtanh.f32 %v3818_v40  ;;  %v3817_v45 = vmul.f32 0.5, %v3333_v4  ;;  %v3336_v38 = vpop.f32.mrf.mxu1 }
 0x5ad   : > { %v5843_v0 = vpop.eup %5842  ;;  %4368 = vst [vmem:[%s7259_s17] sm:$0xff] %v4208_v32  ;;  %v4209_v37 = vadd.f32 0.5, %v4069_v33  ;;  %v4075_v44 = vmul.f32 0.5, %v5841_v49  ;;  %v3469_v58 = vpop.f32.mrf.mxu0  ;;  %v3819_v48 = vmul.f32 0.5, %v3466_v29  ;;  %v3823_v46 = vmul.f32 0.5, %v3335_v15 }
 0x5ae   : > { %v5845_v34 = vpop.eup %5844  ;;  %4370 = vst [vmem:[%s7259_s17 + $0x10] sm:$0xff] %v4210_v16  ;;  %v4211_v21 = vadd.f32 0.5, %v4071_v63  ;;  %v4077_v50 = vmul.f32 0.5, %v5843_v0  ;;  %5868 = vtanh.f32 %v3817_v45  ;;  %v3468_v30 = vadd.f32 %v3467_v39, %v7217_v12  ;;  %v3340_v53 = vpop.f32.mrf.mxu1 }
 0x5af   : > { %v5847_v8 = vpop.eup %5846  ;;  %4369 = vst [vmem:[%s7259_s17 + $0x8] sm:$0xff] %v4209_v37  ;;  %v4215_v35 = vadd.f32 0.5, %v4075_v44  ;;  %v4076_v61 = vmul.f32 0.5, %v5845_v34  ;;  %v3473_v52 = vpop.f32.mrf.mxu0  ;;  %5870 = vtanh.f32 %v3819_v48  ;;  %v3337_v7 = vadd.f32 %v3336_v38, %v7220_v11 }
 0x5b0   : > { %v5849_v24 = vpop.eup %5848  ;;  %4371 = vst [vmem:[%s7259_s17 + $0x18] sm:$0xff] %v4211_v21  ;;  %v4217_v36 = vadd.f32 0.5, %v4077_v50  ;;  %v4078_v27 = vmul.f32 0.5, %v5847_v8  ;;  %5872 = vtanh.f32 %v3823_v46  ;;  %v3825_v42 = vmul.f32 0.5, %v3468_v30  ;;  %v3342_v22 = vpop.f32.mrf.mxu1 }
 0x5b1   : > { %v5851_v43 = vpop.eup %5850  ;;  %4375 = vst [vmem:[%s7259_s17 + $0x38] sm:$0xff] %v4215_v35  ;;  %v4216_v56 = vadd.f32 0.5, %v4076_v61  ;;  %v4082_v1 = vmul.f32 0.5, %v5849_v24  ;;  %v3475_v13 = vpop.f32.mrf.mxu0  ;;  %v3824_v6 = vmul.f32 0.5, %v3337_v7  ;;  %v3470_v51 = vadd.f32 %v3469_v58, %v7223_v23 }
 0x5b2   : > { %v5853_v20 = vpop.eup %5852  ;;  %4377 = vst [vmem:[%s7259_s17 + $0x48] sm:$0xff] %v4217_v36  ;;  %v4218_v57 = vadd.f32 0.5, %v4078_v27  ;;  %v4084_v3 = vmul.f32 0.5, %v5851_v43  ;;  %5874 = vtanh.f32 %v3825_v42  ;;  %v3341_v55 = vadd.f32 %v3340_v53, %v7214_v17  ;;  %v3344_v18 = vpop.f32.mrf.mxu1 }
 0x5b3   : > { %v5855_v31 = vpop.eup %5854  ;;  %4376 = vst [vmem:[%s7259_s17 + $0x40] sm:$0xff] %v4216_v56  ;;  %v4222_v62 = vadd.f32 0.5, %v4082_v1  ;;  %v4083_v41 = vmul.f32 0.5, %v5853_v20  ;;  %v3477_v2 = vpop.f32.mrf.mxu0  ;;  %5876 = vtanh.f32 %v3824_v6  ;;  %v3826_v47 = vmul.f32 0.5, %v3470_v51 }
 0x5b4   : > { %v5857_v14 = vpop.eup %5856  ;;  %4378 = vst [vmem:[%s7259_s17 + $0x50] sm:$0xff] %v4218_v57  ;;  %v4224_v59 = vadd.f32 0.5, %v4084_v3  ;;  %v4085_v25 = vmul.f32 0.5, %v5855_v31  ;;  %v3830_v40 = vmul.f32 0.5, %v3341_v55  ;;  %v3474_v60 = vadd.f32 %v3473_v52, %v7217_v12  ;;  %v3346_v32 = vpop.f32.mrf.mxu1 }
 0x5b5   : > { %v5859_v19 = vpop.eup %5858  ;;  %4382 = vst [vmem:[%s7259_s17 + $0x70] sm:$0xff] %v4222_v62  ;;  %v4223_v5 = vadd.f32 0.5, %v4083_v41  ;;  %v4089_v9 = vmul.f32 0.5, %v5857_v14  ;;  %v3479_v33 = vpop.f32.mrf.mxu0  ;;  %5878 = vtanh.f32 %v3826_v47  ;;  %v3343_v39 = vadd.f32 %v3342_v22, %v7220_v11 }
 0x5b6   : > { %v5861_v4 = vpop.eup %5860  ;;  %4384 = vst [vmem:[%s7259_s17 + $0x80] sm:$0xff] %v4224_v59  ;;  %v4225_v29 = vadd.f32 0.5, %v4085_v25  ;;  %v4091_v10 = vmul.f32 0.5, %v5859_v19  ;;  %5880 = vtanh.f32 %v3830_v40  ;;  %v3832_v15 = vmul.f32 0.5, %v3474_v60  ;;  %v3350_v0 = vpop.f32.mrf.mxu1 }
 0x5b7   : > { %v5863_v49 = vpop.eup %5862  ;;  %4383 = vst [vmem:[%s7259_s17 + $0x78] sm:$0xff] %v4223_v5  ;;  %v4229_v16 = vadd.f32 0.5, %v4089_v9  ;;  %v4090_v63 = vmul.f32 0.5, %v5861_v4  ;;  %v3483_v37 = vpop.f32.mrf.mxu0  ;;  %v3831_v38 = vmul.f32 0.5, %v3343_v39  ;;  %v3476_v58 = vadd.f32 %v3475_v13, %v7223_v23 }
 0x5b8   : > { %4385 = vst [vmem:[%s7259_s17 + $0x88] sm:$0xff] %v4225_v29  ;;  %v4231_v44 = vadd.f32 0.5, %v4091_v10  ;;  %v4092_v45 = vmul.f32 0.5, %v5863_v49  ;;  %v5865_v34 = vpop.eup %5864  ;;  %5882 = vtanh.f32 %v3832_v15  ;;  %v3345_v50 = vadd.f32 %v3344_v18, %v7214_v17  ;;  %v3352_v46 = vpop.f32.mrf.mxu1 }
 0x5b9   : > { %4389 = vst [vmem:[%s7259_s17 + $0xa8] sm:$0xff] %v4229_v16  ;;  %v4230_v21 = vadd.f32 0.5, %v4090_v63  ;;  %v3478_v48 = vadd.f32 %v3477_v2, %v7217_v12  ;;  %v3485_v8 = vpop.f32.mrf.mxu0  ;;  %v5867_v35 = vpop.eup %5866  ;;  %v4096_v30 = vmul.f32 0.5, %v5865_v34  ;;  %5884 = vtanh.f32 %v3831_v38 }
 0x5ba   : > { %4391 = vst [vmem:[%s7259_s17 + $0xb8] sm:$0xff] %v4231_v44  ;;  %v4232_v61 = vadd.f32 0.5, %v4092_v45  ;;  %v3833_v53 = vmul.f32 0.5, %v3476_v58  ;;  %v4098_v52 = vmul.f32 0.5, %v5867_v35  ;;  %v3837_v24 = vmul.f32 0.5, %v3345_v50  ;;  %v3354_v7 = vpop.f32.mrf.mxu1 }
 0x5bb   : > { %4390 = vst [vmem:[%s7259_s17 + $0xb0] sm:$0xff] %v4230_v21  ;;  %v3839_v36 = vmul.f32 0.5, %v3478_v48  ;;  %v3347_v27 = vadd.f32 %v3346_v32, %v7220_v11  ;;  %v3487_v43 = vpop.f32.mrf.mxu0  ;;  %v5869_v56 = vpop.eup %5868  ;;  %v4236_v1 = vadd.f32 0.5, %v4096_v30  ;;  %v3480_v42 = vadd.f32 %v3479_v33, %v7223_v23 }
 0x5bc   : > { %4392 = vst [vmem:[%s7259_s17 + $0xc0] sm:$0xff] %v4232_v61  ;;  %5886 = vtanh.f32 %v3833_v53  ;;  %v3351_v22 = vadd.f32 %v3350_v0, %v7214_v17  ;;  %v5871_v13 = vpop.eup %5870  ;;  %v4238_v20 = vadd.f32 0.5, %v4098_v52  ;;  %v4097_v57 = vmul.f32 0.5, %v5869_v56  ;;  %v3356_v6 = vpop.f32.mrf.mxu1 }
 0x5bd   : > { %5888 = vtanh.f32 %v3837_v24  ;;  %v3838_v3 = vmul.f32 0.5, %v3347_v27  ;;  %v3489_v51 = vpop.f32.mrf.mxu0  ;;  %v5873_v31 = vpop.eup %5872  ;;  %4396 = vst [vmem:[%s7259_s17 + $0xe0] sm:$0xff] %v4236_v1  ;;  %v4099_v62 = vmul.f32 0.5, %v5871_v13  ;;  %v3840_v41 = vmul.f32 0.5, %v3480_v42 }
 0x5be   : > { %5890 = vtanh.f32 %v3839_v36  ;;  %v3844_v55 = vmul.f32 0.5, %v3351_v22  ;;  %4398 = vst [vmem:[%s7259_s17 + $0xf0] sm:$0xff] %v4238_v20  ;;  %v4237_v18 = vadd.f32 0.5, %v4097_v57  ;;  %v4103_v2 = vmul.f32 0.5, %v5873_v31  ;;  %v3360_v59 = vpop.f32.mrf.mxu1 }
 0x5bf   : > { %5892 = vtanh.f32 %v3838_v3  ;;  %v3484_v14 = vadd.f32 %v3483_v37, %v7217_v12  ;;  %v3493_v25 = vpop.f32.mrf.mxu0  ;;  %v5875_v47 = vpop.eup %5874  ;;  %v4239_v19 = vadd.f32 0.5, %v4099_v62  ;;  %v3353_v5 = vadd.f32 %v3352_v46, %v7220_v11 }
 0x5c0   : > { %5894 = vtanh.f32 %v3840_v41  ;;  %v3486_v9 = vadd.f32 %v3485_v8, %v7223_v23  ;;  %v5877_v40 = vpop.eup %5876  ;;  %4397 = vst [vmem:[%s7259_s17 + $0xe8] sm:$0xff] %v4237_v18  ;;  %v4243_v60 = vadd.f32 0.5, %v4103_v2  ;;  %v4105_v32 = vmul.f32 0.5, %v5875_v47  ;;  %v3362_v4 = vpop.f32.mrf.mxu1 }
 0x5c1   : > { %5896 = vtanh.f32 %v3844_v55  ;;  %v3846_v33 = vmul.f32 0.5, %v3484_v14  ;;  %v3495_v29 = vpop.f32.mrf.mxu0  ;;  %4399 = vst [vmem:[%s7259_s17 + $0xf8] sm:$0xff] %v4239_v19  ;;  %v4104_v10 = vmul.f32 0.5, %v5877_v40  ;;  %v3845_v39 = vmul.f32 0.5, %v3353_v5 }
 0x5c2   : > { %v3847_v49 = vmul.f32 0.5, %v3486_v9  ;;  %v3355_v16 = vadd.f32 %v3354_v7, %v7214_v17  ;;  %v5879_v63 = vpop.eup %5878  ;;  %4403 = vst [vmem:[%s7259_s17 + $0x118] sm:$0xff] %v4243_v60  ;;  %v4245_v15 = vadd.f32 0.5, %v4105_v32  ;;  %v3488_v0 = vadd.f32 %v3487_v43, %v7217_v12  ;;  %v3364_v44 = vpop.f32.mrf.mxu1 }
 0x5c3   : > { %5898 = vtanh.f32 %v3846_v33  ;;  %v3357_v37 = vadd.f32 %v3356_v6, %v7220_v11  ;;  %v3497_v45 = vpop.f32.mrf.mxu0  ;;  %v5881_v38 = vpop.eup %5880  ;;  %v4244_v58 = vadd.f32 0.5, %v4104_v10  ;;  %v4106_v34 = vmul.f32 0.5, %v5879_v63 }
 0x5c4   : > { %5900 = vtanh.f32 %v3845_v39  ;;  %v3851_v21 = vmul.f32 0.5, %v3355_v16  ;;  %4405 = vst [vmem:[%s7259_s17 + $0x128] sm:$0xff] %v4245_v15  ;;  %v4110_v50 = vmul.f32 0.5, %v5881_v38  ;;  %v3853_v48 = vmul.f32 0.5, %v3488_v0  ;;  %v3366_v8 = vpop.f32.mrf.mxu1 }
 0x5c5   : > { %5902 = vtanh.f32 %v3847_v49  ;;  %v3852_v46 = vmul.f32 0.5, %v3357_v37  ;;  %v7304_v35 = vpop.f32.mrf.mxu0  ;;  %v5883_v61 = vpop.eup %5882  ;;  %4404 = vst [vmem:[%s7259_s17 + $0x120] sm:$0xff] %v4244_v58  ;;  %v4246_v30 = vadd.f32 0.5, %v4106_v34  ;;  %v3490_v53 = vadd.f32 %v3489_v51, %v7223_v23 }
 0x5c6   : > { %5904 = vtanh.f32 %v3851_v21  ;;  %v3361_v52 = vadd.f32 %v3360_v59, %v7214_v17  ;;  %v5885_v24 = vpop.eup %5884  ;;  %v4250_v36 = vadd.f32 0.5, %v4110_v50  ;;  %v4112_v27 = vmul.f32 0.5, %v5883_v61  ;;  %v3370_v43 = vpop.f32.mrf.mxu1 }
 0x5c7   : > { %5906 = vtanh.f32 %v3853_v48  ;;  %v3494_v7 = vadd.f32 %v3493_v25, %v7217_v12  ;;  %v7310_v56 = vpop.f32.mrf.mxu0  ;;  %4406 = vst [vmem:[%s7259_s17 + $0x130] sm:$0xff] %v4246_v30  ;;  %v4111_v1 = vmul.f32 0.5, %v5885_v24  ;;  %v3854_v42 = vmul.f32 0.5, %v3490_v53 }
 0x5c8   : > { %5908 = vtanh.f32 %v3852_v46  ;;  %v3858_v22 = vmul.f32 0.5, %v3361_v52  ;;  %4410 = vst [vmem:[%s7259_s17 + $0x150] sm:$0xff] %v4250_v36  ;;  %v4252_v20 = vadd.f32 0.5, %v4112_v27  ;;  %v3363_v3 = vadd.f32 %v3362_v4, %v7220_v11  ;;  %v7316_v51 = vpop.f32.mrf.mxu1 }
 0x5c9   : > { %v5887_v13 = vpop.eup %5886  ;;  %v3860_v57 = vmul.f32 0.5, %v3494_v7  ;;  %v3496_v6 = vadd.f32 %v3495_v29, %v7223_v23  ;;  %v7318_v31 = vpop.f32.mrf.mxu0  ;;  %v4251_v41 = vadd.f32 0.5, %v4111_v1  ;;  %5910 = vtanh.f32 %v3854_v42 }
 0x5ca   : > { %v5889_v62 = vpop.eup %5888  ;;  %v4113_v55 = vmul.f32 0.5, %v5887_v13  ;;  %v3365_v18 = vadd.f32 %v3364_v44, %v7214_v17  ;;  %4412 = vst [vmem:[%s7259_s17 + $0x160] sm:$0xff] %v4252_v20  ;;  %5912 = vtanh.f32 %v3858_v22  ;;  %v3859_v59 = vmul.f32 0.5, %v3363_v3  ;;  %v7322_v47 = vpop.f32.mrf.mxu1 }
 0x5cb   : > { %v5891_v2 = vpop.eup %5890  ;;  %v4117_v14 = vmul.f32 0.5, %v5889_v62  ;;  %v3861_v25 = vmul.f32 0.5, %v3496_v6  ;;  %v7324_v19 = vpop.f32.mrf.mxu0  ;;  %4411 = vst [vmem:[%s7259_s17 + $0x158] sm:$0xff] %v4251_v41  ;;  %5914 = vtanh.f32 %v3860_v57  ;;  %v3498_v29 = vadd.f32 %v3497_v45, %v7217_v12 }
 0x5cc   : > { %v5893_v5 = vpop.eup %5892  ;;  %v4253_v9 = vadd.f32 0.5, %v4113_v55  ;;  %v4119_v40 = vmul.f32 0.5, %v5891_v2  ;;  %v3865_v60 = vmul.f32 0.5, %v3365_v18  ;;  %5916 = vtanh.f32 %v3859_v59  ;;  %v7328_v10 = vpop.f32.mrf.mxu1 }
 0x5cd   : > { %v5895_v32 = vpop.eup %5894  ;;  %v4257_v33 = vadd.f32 0.5, %v4117_v14  ;;  %v4118_v4 = vmul.f32 0.5, %v5893_v5  ;;  %v7330_v39 = vpop.f32.mrf.mxu0  ;;  %5918 = vtanh.f32 %v3861_v25  ;;  %v3367_v15 = vadd.f32 %v3366_v8, %v7220_v11 }
 0x5ce   : > { %v5897_v49 = vpop.eup %5896  ;;  %4413 = vst [vmem:[%s7259_s17 + $0x168] sm:$0xff] %v4253_v9  ;;  %v4259_v16 = vadd.f32 0.5, %v4119_v40  ;;  %v4120_v63 = vmul.f32 0.5, %v5895_v32  ;;  %5920 = vtanh.f32 %v3865_v60  ;;  %v3867_v44 = vmul.f32 0.5, %v3498_v29  ;;  %v7335_v38 = vpop.f32.mrf.mxu1 }
 0x5cf   : > { %4417 = vst [vmem:[%s7259_s17 + $0x188] sm:$0xff] %v4257_v33  ;;  %v4258_v0 = vadd.f32 0.5, %v4118_v4  ;;  %v4124_v37 = vmul.f32 0.5, %v5897_v49  ;;  %v7337_v45 = vpop.f32.mrf.mxu0  ;;  %v3866_v21 = vmul.f32 0.5, %v3367_v15  ;;  %v3500_v50 = vadd.f32 %v7304_v35, %v7223_v23 }
 0x5d0   : > { %v5899_v58 = vpop.eup %5898  ;;  %4419 = vst [vmem:[%s7259_s17 + $0x198] sm:$0xff] %v4259_v16  ;;  %v4260_v34 = vadd.f32 0.5, %v4120_v63  ;;  %v3371_v48 = vadd.f32 %v3370_v43, %v7214_v17  ;;  %5922 = vtanh.f32 %v3867_v44  ;;  %v3504_v30 = vadd.f32 %v7310_v56, %v7217_v12  ;;  %v7346_v53 = vpop.f32.mrf.mxu1 }
 0x5d1   : > { %v5901_v46 = vpop.eup %5900  ;;  %4418 = vst [vmem:[%s7259_s17 + $0x190] sm:$0xff] %v4258_v0  ;;  %v4264_v8 = vadd.f32 0.5, %v4124_v37  ;;  %v4126_v61 = vmul.f32 0.5, %v5899_v58  ;;  %v7348_v52 = vpop.f32.mrf.mxu0  ;;  %5924 = vtanh.f32 %v3866_v21  ;;  %v3868_v35 = vmul.f32 0.5, %v3500_v50 }
 0x5d2   : > { %v5903_v24 = vpop.eup %5902  ;;  %4420 = vst [vmem:[%s7259_s17 + $0x1a0] sm:$0xff] %v4260_v34  ;;  %v4125_v36 = vmul.f32 0.5, %v5901_v46  ;;  %v3872_v27 = vmul.f32 0.5, %v3371_v48  ;;  %v3874_v42 = vmul.f32 0.5, %v3504_v30  ;;  %v3373_v22 = vadd.f32 %v7316_v51, %v7220_v11  ;;  %v7354_v56 = vpop.f32.mrf.mxu1 }
 0x5d3   : > { %v5905_v7 = vpop.eup %5904  ;;  %4424 = vst [vmem:[%s7259_s17 + $0x1c0] sm:$0xff] %v4264_v8  ;;  %v4266_v43 = vadd.f32 0.5, %v4126_v61  ;;  %v4127_v1 = vmul.f32 0.5, %v5903_v24  ;;  %v7356_v13 = vpop.f32.mrf.mxu0  ;;  %5926 = vtanh.f32 %v3868_v35  ;;  %v3506_v6 = vadd.f32 %v7318_v31, %v7223_v23 }
 0x5d4   : > { %v5907_v20 = vpop.eup %5906  ;;  %v4265_v57 = vadd.f32 0.5, %v4125_v36  ;;  %v4131_v3 = vmul.f32 0.5, %v5905_v7  ;;  %5928 = vtanh.f32 %v3872_v27  ;;  %v3873_v18 = vmul.f32 0.5, %v3373_v22  ;;  %v7361_v51 = vpop.f32.mrf.mxu1 }
 0x5d5   : > { %v5909_v62 = vpop.eup %5908  ;;  %4426 = vst [vmem:[%s7259_s17 + $0x1d0] sm:$0xff] %v4266_v43  ;;  %v4267_v41 = vadd.f32 0.5, %v4127_v1  ;;  %v4133_v55 = vmul.f32 0.5, %v5907_v20  ;;  %v7363_v2 = vpop.f32.mrf.mxu0  ;;  %5930 = vtanh.f32 %v3874_v42  ;;  %v3875_v25 = vmul.f32 0.5, %v3506_v6 }
 0x5d6   : > { %4425 = vst [vmem:[%s7259_s17 + $0x1c8] sm:$0xff] %v4265_v57  ;;  %v4271_v14 = vadd.f32 0.5, %v4131_v3  ;;  %v4132_v59 = vmul.f32 0.5, %v5909_v62  ;;  %v5911_v5 = vpop.eup %5910  ;;  %5932 = vtanh.f32 %v3873_v18  ;;  %v3375_v9 = vadd.f32 %v7322_v47, %v7214_v17  ;;  %v7371_v60 = vpop.f32.mrf.mxu1 }
 0x5d7   : > { %4427 = vst [vmem:[%s7259_s17 + $0x1d8] sm:$0xff] %v4267_v41  ;;  %v4273_v31 = vadd.f32 0.5, %v4133_v55  ;;  %v3508_v40 = vadd.f32 %v7324_v19, %v7217_v12  ;;  %v7373_v32 = vpop.f32.mrf.mxu0  ;;  %v5913_v33 = vpop.eup %5912  ;;  %v4134_v29 = vmul.f32 0.5, %v5911_v5  ;;  %5934 = vtanh.f32 %v3875_v25 }
 0x5d8   : > { %4431 = vst [vmem:[%s7259_s17 + $0x1f8] sm:$0xff] %v4271_v14  ;;  %v4272_v4 = vadd.f32 0.5, %v4132_v59  ;;  %v3377_v49 = vadd.f32 %v7328_v10, %v7220_v11  ;;  %v5915_v16 = vpop.eup %5914  ;;  %v4138_v63 = vmul.f32 0.5, %v5913_v33  ;;  %v3879_v47 = vmul.f32 0.5, %v3375_v9  ;;  %v7381_v0 = vpop.f32.mrf.mxu1 }
 0x5d9   : > { %4433 = vst [vmem:[%s7259_s17 + $0x208] sm:$0xff] %v4273_v31  ;;  %v3881_v15 = vmul.f32 0.5, %v3508_v40  ;;  %v3510_v19 = vadd.f32 %v7330_v39, %v7223_v23  ;;  %v7383_v37 = vpop.f32.mrf.mxu0  ;;  %v5917_v44 = vpop.eup %5916  ;;  %v4274_v58 = vadd.f32 0.5, %v4134_v29  ;;  %v4140_v34 = vmul.f32 0.5, %v5915_v16 }
 0x5da   : > { %4432 = vst [vmem:[%s7259_s17 + $0x200] sm:$0xff] %v4272_v4  ;;  %v3880_v21 = vmul.f32 0.5, %v3377_v49  ;;  %v3381_v10 = vadd.f32 %v7335_v38, %v7214_v17  ;;  %v5919_v50 = vpop.eup %5918  ;;  %v4278_v48 = vadd.f32 0.5, %v4138_v63  ;;  %v4139_v46 = vmul.f32 0.5, %v5917_v44  ;;  %v7388_v39 = vpop.f32.mrf.mxu1 }
 0x5db   : > { %5936 = vtanh.f32 %v3879_v47  ;;  %v3882_v8 = vmul.f32 0.5, %v3510_v19  ;;  %v7390_v61 = vpop.f32.mrf.mxu0  ;;  %v5921_v30 = vpop.eup %5920  ;;  %4434 = vst [vmem:[%s7259_s17 + $0x210] sm:$0xff] %v4274_v58  ;;  %v4280_v24 = vadd.f32 0.5, %v4140_v34  ;;  %v4141_v36 = vmul.f32 0.5, %v5919_v50 }
 0x5dc   : > { %5938 = vtanh.f32 %v3881_v15  ;;  %v3886_v35 = vmul.f32 0.5, %v3381_v10  ;;  %4438 = vst [vmem:[%s7259_s17 + $0x230] sm:$0xff] %v4278_v48  ;;  %v4279_v27 = vadd.f32 0.5, %v4139_v46  ;;  %v4145_v38 = vmul.f32 0.5, %v5921_v30  ;;  %v7396_v43 = vpop.f32.mrf.mxu1 }
 0x5dd   : > { %5940 = vtanh.f32 %v3880_v21  ;;  %v3514_v7 = vadd.f32 %v7337_v45, %v7217_v12  ;;  %v7398_v1 = vpop.f32.mrf.mxu0  ;;  %v5923_v42 = vpop.eup %5922  ;;  %4440 = vst [vmem:[%s7259_s17 + $0x240] sm:$0xff] %v4280_v24  ;;  %v4281_v22 = vadd.f32 0.5, %v4141_v36  ;;  %v3383_v20 = vadd.f32 %v7346_v53, %v7220_v11 }
 0x5de   : > { %5942 = vtanh.f32 %v3882_v8  ;;  %v3516_v57 = vadd.f32 %v7348_v52, %v7223_v23  ;;  %v5925_v3 = vpop.eup %5924  ;;  %4439 = vst [vmem:[%s7259_s17 + $0x238] sm:$0xff] %v4279_v27  ;;  %v4285_v6 = vadd.f32 0.5, %v4145_v38  ;;  %v4147_v45 = vmul.f32 0.5, %v5923_v42  ;;  %v7406_v41 = vpop.f32.mrf.mxu1 }
 0x5df   : > { %5944 = vtanh.f32 %v3886_v35  ;;  %v3888_v62 = vmul.f32 0.5, %v3514_v7  ;;  %v7408_v55 = vpop.f32.mrf.mxu0  ;;  %4441 = vst [vmem:[%s7259_s17 + $0x248] sm:$0xff] %v4281_v22  ;;  %v4146_v18 = vmul.f32 0.5, %v5925_v3  ;;  %v3887_v14 = vmul.f32 0.5, %v3383_v20 }
 0x5e0   : > { %v3889_v59 = vmul.f32 0.5, %v3516_v57  ;;  %v3385_v53 = vadd.f32 %v7354_v56, %v7214_v17  ;;  %v5927_v25 = vpop.eup %5926  ;;  %4445 = vst [vmem:[%s7259_s17 + $0x268] sm:$0xff] %v4285_v6  ;;  %v4287_v52 = vadd.f32 0.5, %v4147_v45  ;;  %v3518_v5 = vadd.f32 %v7356_v13, %v7217_v12  ;;  %v7418_v9 = vpop.f32.mrf.mxu1 }
 0x5e1   : > { %5946 = vtanh.f32 %v3888_v62  ;;  %v3387_v31 = vadd.f32 %v7361_v51, %v7220_v11  ;;  %v7420_v40 = vpop.f32.mrf.mxu0  ;;  %v5929_v33 = vpop.eup %5928  ;;  %v4286_v4 = vadd.f32 0.5, %v4146_v18  ;;  %v4148_v29 = vmul.f32 0.5, %v5927_v25 }
 0x5e2   : > { %5948 = vtanh.f32 %v3887_v14  ;;  %v3893_v56 = vmul.f32 0.5, %v3385_v53  ;;  %v5931_v49 = vpop.eup %5930  ;;  %4447 = vst [vmem:[%s7259_s17 + $0x278] sm:$0xff] %v4287_v52  ;;  %v4152_v16 = vmul.f32 0.5, %v5929_v33  ;;  %v3895_v63 = vmul.f32 0.5, %v3518_v5  ;;  %v7423_v13 = vpop.f32.mrf.mxu1 }
 0x5e3   : > { %5950 = vtanh.f32 %v3889_v59  ;;  %v3894_v47 = vmul.f32 0.5, %v3387_v31  ;;  %v7425_v51 = vpop.f32.mrf.mxu0  ;;  %v5933_v15 = vpop.eup %5932  ;;  %4446 = vst [vmem:[%s7259_s17 + $0x270] sm:$0xff] %v4286_v4  ;;  %v4288_v19 = vadd.f32 0.5, %v4148_v29  ;;  %v4154_v44 = vmul.f32 0.5, %v5931_v49 }
 0x5e4   : > { %5952 = vtanh.f32 %v3893_v56  ;;  %v3520_v58 = vadd.f32 %v7363_v2, %v7223_v23  ;;  %v5935_v34 = vpop.eup %5934  ;;  %v4292_v21 = vadd.f32 0.5, %v4152_v16  ;;  %v4153_v10 = vmul.f32 0.5, %v5933_v15  ;;  %v7432_v48 = vpop.f32.mrf.mxu1 }
 0x5e5   : > { %5954 = vtanh.f32 %v3895_v63  ;;  %v3391_v50 = vadd.f32 %v7371_v60, %v7214_v17  ;;  %v7434_v46 = vpop.f32.mrf.mxu0  ;;  %4448 = vst [vmem:[%s7259_s17 + $0x280] sm:$0xff] %v4288_v19  ;;  %v4294_v8 = vadd.f32 0.5, %v4154_v44  ;;  %v4155_v30 = vmul.f32 0.5, %v5935_v34 }
 0x5e6   : > { %5956 = vtanh.f32 %v3894_v47  ;;  %v3896_v24 = vmul.f32 0.5, %v3520_v58  ;;  %4452 = vst [vmem:[%s7259_s17 + $0x2a0] sm:$0xff] %v4292_v21  ;;  %v4293_v2 = vadd.f32 0.5, %v4153_v10  ;;  %v3524_v35 = vadd.f32 %v7373_v32, %v7217_v12  ;;  %v7442_v27 = vpop.f32.mrf.mxu1 }
 0x5e7   : > { %v3900_v36 = vmul.f32 0.5, %v3391_v50  ;;  %v3393_v60 = vadd.f32 %v7381_v0, %v7220_v11  ;;  %v7444_v38 = vpop.f32.mrf.mxu0  ;;  %4454 = vst [vmem:[%s7259_s17 + $0x2b0] sm:$0xff] %v4294_v8  ;;  %v4295_v42 = vadd.f32 0.5, %v4155_v30  ;;  %v3526_v22 = vadd.f32 %v7383_v37, %v7223_v23 }
 0x5e8   : > { %v5937_v7 = vpop.eup %5936  ;;  %5958 = vtanh.f32 %v3896_v24  ;;  %v3395_v20 = vadd.f32 %v7388_v39, %v7214_v17  ;;  %4453 = vst [vmem:[%s7259_s17 + $0x2a8] sm:$0xff] %v4293_v2  ;;  %v3902_v0 = vmul.f32 0.5, %v3524_v35  ;;  %v7452_v6 = vpop.f32.mrf.mxu1  ;;  %v3528_v37 = vadd.f32 %v7390_v61, %v7217_v12 }
 0x5e9   : > { %v5939_v57 = vpop.eup %5938  ;;  %v4159_v32 = vmul.f32 0.5, %v5937_v7  ;;  %5960 = vtanh.f32 %v3900_v36  ;;  %v3901_v3 = vmul.f32 0.5, %v3393_v60  ;;  %v7454_v45 = vpop.f32.mrf.mxu0  ;;  %4455 = vst [vmem:[%s7259_s17 + $0x2b8] sm:$0xff] %v4295_v42  ;;  %v3903_v14 = vmul.f32 0.5, %v3526_v22 }
 0x5ea   : > { %v5941_v62 = vpop.eup %5940  ;;  %v4161_v18 = vmul.f32 0.5, %v5939_v57  ;;  %v3907_v59 = vmul.f32 0.5, %v3395_v20  ;;  %5962 = vtanh.f32 %v3902_v0  ;;  %v3397_v52 = vadd.f32 %v7396_v43, %v7220_v11  ;;  %v7461_v5 = vpop.f32.mrf.mxu1 }
 0x5eb   : > { %v5943_v39 = vpop.eup %5942  ;;  %v4299_v53 = vadd.f32 0.5, %v4159_v32  ;;  %v4160_v25 = vmul.f32 0.5, %v5941_v62  ;;  %v7463_v31 = vpop.f32.mrf.mxu0  ;;  %5964 = vtanh.f32 %v3901_v3  ;;  %v3909_v56 = vmul.f32 0.5, %v3528_v37 }
 0x5ec   : > { %v5945_v33 = vpop.eup %5944  ;;  %v4301_v4 = vadd.f32 0.5, %v4161_v18  ;;  %v4162_v29 = vmul.f32 0.5, %v5943_v39  ;;  %5966 = vtanh.f32 %v3903_v14  ;;  %v3908_v16 = vmul.f32 0.5, %v3397_v52  ;;  %v7466_v63 = vpop.f32.mrf.mxu1 }
 0x5ed   : > { %4459 = vst [vmem:[%s7259_s17 + $0x2d8] sm:$0xff] %v4299_v53  ;;  %v4300_v61 = vadd.f32 0.5, %v4160_v25  ;;  %v4166_v49 = vmul.f32 0.5, %v5945_v33  ;;  %v7468_v47 = vpop.f32.mrf.mxu0  ;;  %5968 = vtanh.f32 %v3907_v59  ;;  %v3530_v19 = vadd.f32 %v7398_v1, %v7223_v23 }
 0x5ee   : > { %v5947_v43 = vpop.eup %5946  ;;  %4461 = vst [vmem:[%s7259_s17 + $0x2e8] sm:$0xff] %v4301_v4  ;;  %v4302_v15 = vadd.f32 0.5, %v4162_v29  ;;  %v3401_v44 = vadd.f32 %v7406_v41, %v7214_v17  ;;  %5970 = vtanh.f32 %v3909_v56  ;;  %v3534_v10 = vadd.f32 %v7408_v55, %v7217_v12  ;;  %v7478_v50 = vpop.f32.mrf.mxu1 }
 0x5ef   : > { %v5949_v58 = vpop.eup %5948  ;;  %4460 = vst [vmem:[%s7259_s17 + $0x2e0] sm:$0xff] %v4300_v61  ;;  %v4306_v34 = vadd.f32 0.5, %v4166_v49  ;;  %v4168_v21 = vmul.f32 0.5, %v5947_v43  ;;  %v7480_v8 = vpop.f32.mrf.mxu0  ;;  %5972 = vtanh.f32 %v3908_v16  ;;  %v3910_v1 = vmul.f32 0.5, %v3530_v19 }
 0x5f0   : > { %v5951_v30 = vpop.eup %5950  ;;  %4462 = vst [vmem:[%s7259_s17 + $0x2f0] sm:$0xff] %v4302_v15  ;;  %v4167_v24 = vmul.f32 0.5, %v5949_v58  ;;  %v3914_v41 = vmul.f32 0.5, %v3401_v44  ;;  %v3916_v60 = vmul.f32 0.5, %v3534_v10  ;;  %v3403_v7 = vadd.f32 %v7418_v9, %v7220_v11  ;;  %v7486_v55 = vpop.f32.mrf.mxu1 }
 0x5f1   : > { %v5953_v2 = vpop.eup %5952  ;;  %4466 = vst [vmem:[%s7259_s17 + $0x310] sm:$0xff] %v4306_v34  ;;  %v4308_v36 = vadd.f32 0.5, %v4168_v21  ;;  %v4169_v35 = vmul.f32 0.5, %v5951_v30  ;;  %v7488_v42 = vpop.f32.mrf.mxu0  ;;  %5974 = vtanh.f32 %v3910_v1  ;;  %v3536_v32 = vadd.f32 %v7420_v40, %v7223_v23 }
 0x5f2   : > { %v5955_v22 = vpop.eup %5954  ;;  %v4307_v20 = vadd.f32 0.5, %v4167_v24  ;;  %v4173_v57 = vmul.f32 0.5, %v5953_v2  ;;  %5976 = vtanh.f32 %v3914_v41  ;;  %v3915_v18 = vmul.f32 0.5, %v3403_v7  ;;  %v7493_v9 = vpop.f32.mrf.mxu1 }
 0x5f3   : > { %v5957_v0 = vpop.eup %5956  ;;  %4468 = vst [vmem:[%s7259_s17 + $0x320] sm:$0xff] %v4308_v36  ;;  %v4309_v3 = vadd.f32 0.5, %v4169_v35  ;;  %v4175_v62 = vmul.f32 0.5, %v5955_v22  ;;  %v7495_v14 = vpop.f32.mrf.mxu0  ;;  %5978 = vtanh.f32 %v3916_v60  ;;  %v3917_v39 = vmul.f32 0.5, %v3536_v32 }
 0x5f4   : > { %4467 = vst [vmem:[%s7259_s17 + $0x318] sm:$0xff] %v4307_v20  ;;  %v4313_v59 = vadd.f32 0.5, %v4173_v57  ;;  %v4174_v37 = vmul.f32 0.5, %v5957_v0  ;;  %5980 = vtanh.f32 %v3915_v18  ;;  %v3405_v25 = vadd.f32 %v7423_v13, %v7214_v17  ;;  %v7503_v33 = vpop.f32.mrf.mxu1 }
 0x5f5   : > { %v5959_v53 = vpop.eup %5958  ;;  %4469 = vst [vmem:[%s7259_s17 + $0x328] sm:$0xff] %v4309_v3  ;;  %v4315_v40 = vadd.f32 0.5, %v4175_v62  ;;  %v3538_v52 = vadd.f32 %v7425_v51, %v7217_v12  ;;  %5982 = vtanh.f32 %v3917_v39  ;;  %v3407_v61 = vadd.f32 %v7432_v48, %v7220_v11  ;;  %v7508_v49 = vpop.f32.mrf.mxu0 }
 0x5f6   : > { %v5961_v4 = vpop.eup %5960  ;;  %4473 = vst [vmem:[%s7259_s17 + $0x348] sm:$0xff] %v4313_v59  ;;  %v4314_v29 = vadd.f32 0.5, %v4174_v37  ;;  %v4176_v56 = vmul.f32 0.5, %v5959_v53  ;;  %v3921_v43 = vmul.f32 0.5, %v3405_v25  ;;  %v3540_v12 = vadd.f32 %v7434_v46, %v7223_v23  ;;  %v7513_v13 = vpop.f32.mrf.mxu1 }
 0x5f7   : > { %4475 = vst [vmem:[%s7259_s17 + $0x358] sm:$0xff] %v4315_v40  ;;  %v4180_v16 = vmul.f32 0.5, %v5961_v4  ;;  %v3923_v17 = vmul.f32 0.5, %v3538_v52  ;;  %v5963_v51 = vpop.eup %5962  ;;  %v3922_v19 = vmul.f32 0.5, %v3407_v61  ;;  %v3577_v44 = vadd.f32 %v7442_v27, %v7248_v54  ;;  %v7523_v1 = vpop.f32.mrf.mxu0 }
 0x5f8   : > { %4474 = vst [vmem:[%s7259_s17 + $0x350] sm:$0xff] %v4314_v29  ;;  %v4316_v15 = vadd.f32 0.5, %v4176_v56  ;;  %v3718_v11 = vadd.f32 %v7444_v38, %v7251_v26  ;;  %v5965_v48 = vpop.eup %5964  ;;  %v4182_v34 = vmul.f32 0.5, %v5963_v51  ;;  %5984 = vtanh.f32 %v3921_v43  ;;  %v7520_v10 = vpop.f32.mrf.mxu1 }
 0x5f9   : > { %v4320_v58 = vadd.f32 0.5, %v4180_v16  ;;  %v3924_v21 = vmul.f32 0.5, %v3540_v12  ;;  %v5967_v23 = vpop.eup %5966  ;;  %v4181_v46 = vmul.f32 0.5, %v5965_v48  ;;  %5986 = vtanh.f32 %v3923_v17  ;;  %v7536_v59 = vpop.f32.mrf.mxu0 }
 0x5fa   : > { %4476 = vst [vmem:[%s7259_s17 + $0x360] sm:$0xff] %v4316_v15  ;;  %v3792_v30 = vmul.f32 0.5, %v3577_v44  ;;  %v3808_v24 = vmul.f32 0.5, %v3718_v11  ;;  %v5969_v27 = vpop.eup %5968  ;;  %v4322_v41 = vadd.f32 0.5, %v4182_v34  ;;  %v4183_v38 = vmul.f32 0.5, %v5967_v23  ;;  %v7528_v36 = vpop.f32.mrf.mxu1 }
 0x5fb   : > { %4480 = vst [vmem:[%s7259_s17 + $0x380] sm:$0xff] %v4320_v58  ;;  %5988 = vtanh.f32 %v3922_v19  ;;  %v3579_v2 = vadd.f32 %v7452_v6, %v7254_v28  ;;  %v5971_v35 = vpop.eup %5970  ;;  %v4321_v60 = vadd.f32 0.5, %v4181_v46  ;;  %v4187_v7 = vmul.f32 0.5, %v5969_v27  ;;  %v7556_v19 = vpop.f32.mrf.mxu0 }
 0x5fc   : > { %5990 = vtanh.f32 %v3924_v21  ;;  %v3710_v22 = vadd.f32 %v7454_v45, %v7251_v26  ;;  %v5973_v20 = vpop.eup %5972  ;;  %4482 = vst [vmem:[%s7259_s17 + $0x390] sm:$0xff] %v4322_v41  ;;  %v4323_v57 = vadd.f32 0.5, %v4183_v38  ;;  %v4189_v32 = vmul.f32 0.5, %v5971_v35  ;;  %v7533_v3 = vpop.f32.mrf.mxu1 }
 0x5fd   : > { %5992 = vtanh.f32 %v3792_v30  ;;  %v3793_v0 = vmul.f32 0.5, %v3579_v2  ;;  %4481 = vst [vmem:[%s7259_s17 + $0x388] sm:$0xff] %v4321_v60  ;;  %v4327_v6 = vadd.f32 0.5, %v4187_v7  ;;  %v4188_v62 = vmul.f32 0.5, %v5973_v20  ;;  %v7573_v35 = vpop.f32.mrf.mxu0 }
 0x5fe   : > { %5994 = vtanh.f32 %v3808_v24  ;;  %v3794_v18 = vmul.f32 0.5, %v3710_v22  ;;  %v5975_v37 = vpop.eup %5974  ;;  %4483 = vst [vmem:[%s7259_s17 + $0x398] sm:$0xff] %v4323_v57  ;;  %v4329_v45 = vadd.f32 0.5, %v4189_v32  ;;  %v3581_v39 = vadd.f32 %v7461_v5, %v7248_v54  ;;  %v7543_v40 = vpop.f32.mrf.mxu1 }
 0x5ff   : > { %5996 = vtanh.f32 %v3793_v0  ;;  %v3721_v53 = vadd.f32 %v7463_v31, %v7251_v26  ;;  %v5977_v25 = vpop.eup %5976  ;;  %4487 = vst [vmem:[%s7259_s17 + $0x3b8] sm:$0xff] %v4327_v6  ;;  %v4328_v52 = vadd.f32 0.5, %v4188_v62  ;;  %v4190_v4 = vmul.f32 0.5, %v5975_v37 }
 0x600   : > { %5998 = vtanh.f32 %v3794_v18  ;;  %v3583_v29 = vadd.f32 %v7466_v63, %v7254_v28  ;;  %v5979_v56 = vpop.eup %5978  ;;  %4489 = vst [vmem:[%s7259_s17 + $0x3c8] sm:$0xff] %v4329_v45  ;;  %v4194_v61 = vmul.f32 0.5, %v5977_v25  ;;  %v3799_v16 = vmul.f32 0.5, %v3581_v39  ;;  %v7551_v31 = vpop.f32.mrf.mxu1 }
 0x601   : > { %v3815_v43 = vmul.f32 0.5, %v3721_v53  ;;  %v3713_v5 = vadd.f32 %v7468_v47, %v7251_v26  ;;  %v5981_v17 = vpop.eup %5980  ;;  %4488 = vst [vmem:[%s7259_s17 + $0x3c0] sm:$0xff] %v4328_v52  ;;  %v4330_v12 = vadd.f32 0.5, %v4190_v4  ;;  %v4196_v51 = vmul.f32 0.5, %v5979_v56  ;;  %v7585_v52 = vpop.f32.mrf.mxu0 }
 0x602   : > { %v3800_v15 = vmul.f32 0.5, %v3583_v29  ;;  %v3587_v63 = vadd.f32 %v7478_v50, %v7248_v54  ;;  %v5983_v44 = vpop.eup %5982  ;;  %v4334_v11 = vadd.f32 0.5, %v4194_v61  ;;  %v4195_v48 = vmul.f32 0.5, %v5981_v17  ;;  %v7558_v47 = vpop.f32.mrf.mxu1 }
 0x603   : > { %6000 = vtanh.f32 %v3799_v16  ;;  %v3801_v58 = vmul.f32 0.5, %v3713_v5  ;;  %4490 = vst [vmem:[%s7259_s17 + $0x3d0] sm:$0xff] %v4330_v12  ;;  %v4336_v34 = vadd.f32 0.5, %v4196_v51  ;;  %v4197_v21 = vmul.f32 0.5, %v5983_v44 }
 0x604   : > { %6002 = vtanh.f32 %v3815_v43  ;;  %v3806_v23 = vmul.f32 0.5, %v3587_v63  ;;  %4494 = vst [vmem:[%s7259_s17 + $0x3f0] sm:$0xff] %v4334_v11  ;;  %v4335_v46 = vadd.f32 0.5, %v4195_v48  ;;  %v3734_v50 = vadd.f32 %v7480_v8, %v7251_v26  ;;  %v7566_v24 = vpop.f32.mrf.mxu1 }
 0x605   : > { %6004 = vtanh.f32 %v3800_v15  ;;  %v3589_v30 = vadd.f32 %v7486_v55, %v7254_v28  ;;  %v5985_v27 = vpop.eup %5984  ;;  %4496 = vst [vmem:[%s7259_s17 + $0x400] sm:$0xff] %v4336_v34  ;;  %v4337_v41 = vadd.f32 0.5, %v4197_v21  ;;  %v3726_v38 = vadd.f32 %v7488_v42, %v7251_v26 }
 0x606   : > { %6006 = vtanh.f32 %v3801_v58  ;;  %v3591_v2 = vadd.f32 %v7493_v9, %v7248_v54  ;;  %v5987_v60 = vpop.eup %5986  ;;  %4495 = vst [vmem:[%s7259_s17 + $0x3f8] sm:$0xff] %v4335_v46  ;;  %v4201_v8 = vmul.f32 0.5, %v5985_v27  ;;  %v3836_v55 = vmul.f32 0.5, %v3734_v50  ;;  %v7576_v22 = vpop.f32.mrf.mxu1 }
 0x607   : > { %6008 = vtanh.f32 %v3806_v23  ;;  %v3807_v7 = vmul.f32 0.5, %v3589_v30  ;;  %4497 = vst [vmem:[%s7259_s17 + $0x408] sm:$0xff] %v4337_v41  ;;  %v4203_v57 = vmul.f32 0.5, %v5987_v60  ;;  %v3822_v32 = vmul.f32 0.5, %v3726_v38  ;;  %v7599_v58 = vpop.f32.mrf.mxu0 }
 0x608   : > { %v5989_v20 = vpop.eup %5988  ;;  %v3813_v0 = vmul.f32 0.5, %v3591_v2  ;;  %v3737_v42 = vadd.f32 %v7495_v14, %v7251_v26  ;;  %v4341_v6 = vadd.f32 0.5, %v4201_v8  ;;  %6010 = vtanh.f32 %v3836_v55  ;;  %v7583_v37 = vpop.f32.mrf.mxu1 }
 0x609   : > { %v5991_v9 = vpop.eup %5990  ;;  %v4202_v62 = vmul.f32 0.5, %v5989_v20  ;;  %v3593_v18 = vadd.f32 %v7503_v33, %v7254_v28  ;;  %v4343_v39 = vadd.f32 0.5, %v4203_v57  ;;  %6012 = vtanh.f32 %v3807_v7  ;;  %v7621_v20 = vpop.f32.mrf.mxu0 }
 0x60a   : > { %v5993_v45 = vpop.eup %5992  ;;  %v4204_v53 = vmul.f32 0.5, %v5991_v9  ;;  %v3843_v25 = vmul.f32 0.5, %v3737_v42  ;;  %4501 = vst [vmem:[%s7259_s17 + $0x428] sm:$0xff] %v4341_v6  ;;  %6014 = vtanh.f32 %v3822_v32  ;;  %v7588_v61 = vpop.f32.mrf.mxu1  ;;  %v3729_v5 = vadd.f32 %v7508_v49, %v7251_v26 }
 0x60b   : > { %v5995_v4 = vpop.eup %5994  ;;  %v4342_v14 = vadd.f32 0.5, %v4202_v62  ;;  %v4072_v29 = vmul.f32 0.5, %v5993_v45  ;;  %v3814_v56 = vmul.f32 0.5, %v3593_v18  ;;  %4503 = vst [vmem:[%s7259_s17 + $0x438] sm:$0xff] %v4343_v39  ;;  %6016 = vtanh.f32 %v3813_v0 }
 0x60c   : > { %v5997_v33 = vpop.eup %5996  ;;  %v4344_v16 = vadd.f32 0.5, %v4204_v53  ;;  %v4088_v43 = vmul.f32 0.5, %v5995_v4  ;;  %6018 = vtanh.f32 %v3843_v25  ;;  %v3597_v15 = vadd.f32 %v7513_v13, %v7248_v54  ;;  %v7596_v63 = vpop.f32.mrf.mxu1 }
 0x60d   : > { %v5999_v17 = vpop.eup %5998  ;;  %4502 = vst [vmem:[%s7259_s17 + $0x430] sm:$0xff] %v4342_v14  ;;  %v4212_v12 = vadd.f32 0.5, %v4072_v29  ;;  %v4073_v51 = vmul.f32 0.5, %v5997_v33  ;;  %6020 = vtanh.f32 %v3814_v56  ;;  %v3829_v48 = vmul.f32 0.5, %v3729_v5  ;;  %v3760_v29 = vpop.f32.mrf.mxu0 }
 0x60e   : > { %4504 = vst [vmem:[%s7259_s17 + $0x440] sm:$0xff] %v4344_v16  ;;  %v4228_v44 = vadd.f32 0.5, %v4088_v43  ;;  %v4074_v11 = vmul.f32 0.5, %v5999_v17  ;;  %v3820_v34 = vmul.f32 0.5, %v3597_v15  ;;  %v3750_v21 = vadd.f32 %v7523_v1, %v7251_v26  ;;  %v7606_v13 = vpop.f32.mrf.mxu1 }
 0x60f   : > { %4372 = vst [vmem:[%s7259_s17 + $0x20] sm:$0xff] %v4212_v12  ;;  %v4213_v49 = vadd.f32 0.5, %v4073_v51  ;;  %v3599_v23 = vadd.f32 %v7520_v10, %v7254_v28  ;;  %6022 = vtanh.f32 %v3829_v48  ;;  %v3742_v30 = vadd.f32 %v7536_v59, %v7251_v26 }
 0x610   : > { %v6001_v46 = vpop.eup %6000  ;;  %4388 = vst.msk [vmem:[%s7259_s17 + $0xa0] sm:$0xff] %vm1179_vm0, %v4228_v44  ;;  %v4214_v50 = vadd.f32 0.5, %v4074_v11  ;;  %v3601_v27 = vadd.f32 %v7528_v36, %v7248_v54  ;;  %6024 = vtanh.f32 %v3820_v34  ;;  %v3864_v38 = vmul.f32 0.5, %v3750_v21  ;;  %v7615_v2 = vpop.f32.mrf.mxu1 }
 0x611   : > { %v6003_v41 = vpop.eup %6002  ;;  %4373 = vst [vmem:[%s7259_s17 + $0x28] sm:$0xff] %v4213_v49  ;;  %v4079_v1 = vmul.f32 0.5, %v6001_v46  ;;  %v3821_v10 = vmul.f32 0.5, %v3599_v23  ;;  %v3850_v55 = vmul.f32 0.5, %v3742_v30  ;;  %v3753_v59 = vadd.f32 %v7556_v19, %v7251_v26  ;;  %v5412_v46 = vpop.f32.mrf.mxu0 }
 0x612   : > { %v6005_v60 = vpop.eup %6004  ;;  %4374 = vst.msk [vmem:[%s7259_s17 + $0x30] sm:$0xff] %vm1179_vm0, %v4214_v50  ;;  %v4095_v8 = vmul.f32 0.5, %v6003_v41  ;;  %v3827_v7 = vmul.f32 0.5, %v3601_v27  ;;  %6026 = vtanh.f32 %v3864_v38  ;;  %v3603_v0 = vadd.f32 %v7533_v3, %v7254_v28  ;;  %v7625_v42 = vpop.f32.mrf.mxu1 }
 0x613   : > { %v6007_v36 = vpop.eup %6006  ;;  %v4219_v57 = vadd.f32 0.5, %v4079_v1  ;;  %v4080_v32 = vmul.f32 0.5, %v6005_v60  ;;  %6028 = vtanh.f32 %v3821_v10  ;;  %v3871_v18 = vmul.f32 0.5, %v3753_v59 }
 0x614   : > { %v6009_v9 = vpop.eup %6008  ;;  %v4235_v6 = vadd.f32 0.5, %v4095_v8  ;;  %v4081_v62 = vmul.f32 0.5, %v6007_v36  ;;  %6030 = vtanh.f32 %v3850_v55  ;;  %v3828_v39 = vmul.f32 0.5, %v3603_v0  ;;  %v7628_v53 = vpop.f32.mrf.mxu1 }
 0x615   : > { %4379 = vst [vmem:[%s7259_s17 + $0x58] sm:$0xff] %v4219_v57  ;;  %v4220_v19 = vadd.f32 0.5, %v4080_v32  ;;  %v4086_v45 = vmul.f32 0.5, %v6009_v9  ;;  %v6011_v25 = vpop.eup %6010  ;;  %6032 = vtanh.f32 %v3827_v7  ;;  %v3745_v4 = vadd.f32 %v7573_v35, %v7251_v26  ;;  %v3773_v0 = vpop.f32.mrf.mxu0 }
 0x616   : > { %4395 = vst.msk [vmem:[%s7259_s17 + $0xd8] sm:$0xff] %vm1179_vm0, %v4235_v6  ;;  %v4221_v3 = vadd.f32 0.5, %v4081_v62  ;;  %v3607_v14 = vadd.f32 %v7543_v40, %v7248_v54  ;;  %v6013_v56 = vpop.eup %6012  ;;  %v4116_v16 = vmul.f32 0.5, %v6011_v25  ;;  %6034 = vtanh.f32 %v3871_v18  ;;  %v7639_v5 = vpop.f32.mrf.mxu1 }
 0x617   : > { %4380 = vst [vmem:[%s7259_s17 + $0x60] sm:$0xff] %v4220_v19  ;;  %v4226_v33 = vadd.f32 0.5, %v4086_v45  ;;  %v3766_v43 = vadd.f32 %v7585_v52, %v7251_v26  ;;  %v6015_v17 = vpop.eup %6014  ;;  %v4087_v12 = vmul.f32 0.5, %v6013_v56  ;;  %6036 = vtanh.f32 %v3828_v39 }
 0x618   : > { %4381 = vst.msk [vmem:[%s7259_s17 + $0x68] sm:$0xff] %vm1179_vm0, %v4221_v3  ;;  %v3857_v35 = vmul.f32 0.5, %v3745_v4  ;;  %v3834_v40 = vmul.f32 0.5, %v3607_v14  ;;  %v6017_v51 = vpop.eup %6016  ;;  %v4256_v15 = vadd.f32 0.5, %v4116_v16  ;;  %v4102_v44 = vmul.f32 0.5, %v6015_v17  ;;  %v7646_v52 = vpop.f32.mrf.mxu1 }
 0x619   : > { %4386 = vst [vmem:[%s7259_s17 + $0x90] sm:$0xff] %v4226_v33  ;;  %v3892_v11 = vmul.f32 0.5, %v3766_v43  ;;  %v3609_v48 = vadd.f32 %v7551_v31, %v7254_v28  ;;  %v6019_v49 = vpop.eup %6018  ;;  %v4227_v34 = vadd.f32 0.5, %v4087_v12  ;;  %v4093_v21 = vmul.f32 0.5, %v6017_v51  ;;  %v5413_v17 = vpop.f32.mrf.mxu0 }
 0x61a   : > { %6038 = vtanh.f32 %v3857_v35  ;;  %v3758_v23 = vadd.f32 %v7599_v58, %v7251_v26  ;;  %v6021_v50 = vpop.eup %6020  ;;  %4416 = vst.msk [vmem:[%s7259_s17 + $0x180] sm:$0xff] %vm1179_vm0, %v4256_v15  ;;  %v4242_v30 = vadd.f32 0.5, %v4102_v44  ;;  %v4123_v27 = vmul.f32 0.5, %v6019_v49  ;;  %v7652_v31 = vpop.f32.mrf.mxu1 }
 0x61b   : > { %6040 = vtanh.f32 %v3834_v40  ;;  %v3835_v41 = vmul.f32 0.5, %v3609_v48  ;;  %4387 = vst [vmem:[%s7259_s17 + $0x98] sm:$0xff] %v4227_v34  ;;  %v4233_v1 = vadd.f32 0.5, %v4093_v21  ;;  %v4094_v38 = vmul.f32 0.5, %v6021_v50 }
 0x61c   : > { %6042 = vtanh.f32 %v3892_v11  ;;  %v3878_v10 = vmul.f32 0.5, %v3758_v23  ;;  %v6023_v60 = vpop.eup %6022  ;;  %4402 = vst.msk [vmem:[%s7259_s17 + $0x110] sm:$0xff] %vm1179_vm0, %v4242_v30  ;;  %v4263_v58 = vadd.f32 0.5, %v4123_v27  ;;  %v3611_v8 = vadd.f32 %v7558_v47, %v7248_v54  ;;  %v7661_v7 = vpop.f32.mrf.mxu1 }
 0x61d   : > { %6044 = vtanh.f32 %v3835_v41  ;;  %v3769_v55 = vadd.f32 %v7621_v20, %v7251_v26  ;;  %v6025_v59 = vpop.eup %6024  ;;  %4393 = vst [vmem:[%s7259_s17 + $0xc8] sm:$0xff] %v4233_v1  ;;  %v4234_v36 = vadd.f32 0.5, %v4094_v38  ;;  %v4109_v57 = vmul.f32 0.5, %v6023_v60  ;;  %v3776_v27 = vpop.f32.mrf.mxu0 }
 0x61e   : > { %6046 = vtanh.f32 %v3878_v10  ;;  %v3613_v32 = vadd.f32 %v7566_v24, %v7254_v28  ;;  %4423 = vst.msk [vmem:[%s7259_s17 + $0x1b8] sm:$0xff] %vm1179_vm0, %v4263_v58  ;;  %v4100_v9 = vmul.f32 0.5, %v6025_v59  ;;  %v3841_v6 = vmul.f32 0.5, %v3611_v8  ;;  %v7669_v62 = vpop.f32.mrf.mxu1 }
 0x61f   : > { %v3899_v47 = vmul.f32 0.5, %v3769_v55  ;;  %v3761_v20 = vadd.f32 %v3760_v29, %v7251_v26  ;;  %v6027_v18 = vpop.eup %6026  ;;  %4394 = vst [vmem:[%s7259_s17 + $0xd0] sm:$0xff] %v4234_v36  ;;  %v4249_v19 = vadd.f32 0.5, %v4109_v57  ;;  %v3617_v39 = vadd.f32 %v7576_v22, %v7248_v54 }
 0x620   : > { %v3842_v45 = vmul.f32 0.5, %v3613_v32  ;;  %v3782_v24 = vadd.f32 %v5412_v46, %v7251_v26  ;;  %v6029_v25 = vpop.eup %6028  ;;  %v4240_v3 = vadd.f32 0.5, %v4100_v9  ;;  %v4144_v4 = vmul.f32 0.5, %v6027_v18  ;;  %v7675_v56 = vpop.f32.mrf.mxu1 }
 0x621   : > { %6048 = vtanh.f32 %v3841_v6  ;;  %v3885_v14 = vmul.f32 0.5, %v3761_v20  ;;  %v6031_v29 = vpop.eup %6030  ;;  %4409 = vst.msk [vmem:[%s7259_s17 + $0x148] sm:$0xff] %vm1179_vm0, %v4249_v19  ;;  %v4101_v33 = vmul.f32 0.5, %v6029_v25  ;;  %v3848_v16 = vmul.f32 0.5, %v3617_v39 }
 0x622   : > { %6050 = vtanh.f32 %v3899_v47  ;;  %v3920_v43 = vmul.f32 0.5, %v3782_v24  ;;  %v6033_v22 = vpop.eup %6032  ;;  %4400 = vst [vmem:[%s7259_s17 + $0x100] sm:$0xff] %v4240_v3  ;;  %v4284_v12 = vadd.f32 0.5, %v4144_v4  ;;  %v4130_v35 = vmul.f32 0.5, %v6031_v29  ;;  %v7682_v51 = vpop.f32.mrf.mxu1 }
 0x623   : > { %6052 = vtanh.f32 %v3842_v45  ;;  %v3619_v40 = vadd.f32 %v7583_v37, %v7254_v28  ;;  %v6035_v15 = vpop.eup %6034  ;;  %v4241_v44 = vadd.f32 0.5, %v4101_v33  ;;  %v4107_v11 = vmul.f32 0.5, %v6033_v22 }
 0x624   : > { %6054 = vtanh.f32 %v3885_v14  ;;  %v3774_v48 = vadd.f32 %v3773_v0, %v7251_v26  ;;  %v6037_v49 = vpop.eup %6036  ;;  %4444 = vst.msk [vmem:[%s7259_s17 + $0x260] sm:$0xff] %vm1179_vm0, %v4284_v12  ;;  %v4270_v34 = vadd.f32 0.5, %v4130_v35  ;;  %v4151_v21 = vmul.f32 0.5, %v6035_v15  ;;  %v7687_v46 = vpop.f32.mrf.mxu1 }
 0x625   : > { %6056 = vtanh.f32 %v3848_v16  ;;  %v3849_v23 = vmul.f32 0.5, %v3619_v40  ;;  %4401 = vst [vmem:[%s7259_s17 + $0x108] sm:$0xff] %v4241_v44  ;;  %v4247_v37 = vadd.f32 0.5, %v4107_v11  ;;  %v4108_v50 = vmul.f32 0.5, %v6037_v49 }
 0x626   : > { %6058 = vtanh.f32 %v3920_v43  ;;  %v3906_v30 = vmul.f32 0.5, %v3774_v48  ;;  %4430 = vst.msk [vmem:[%s7259_s17 + $0x1f0] sm:$0xff] %vm1179_vm0, %v4270_v34  ;;  %v4291_v1 = vadd.f32 0.5, %v4151_v21  ;;  %v3621_v38 = vadd.f32 %v7588_v61, %v7248_v54  ;;  %v7695_v60 = vpop.f32.mrf.mxu1 }
 0x627   : > { %v6039_v41 = vpop.eup %6038  ;;  %6060 = vtanh.f32 %v3849_v23  ;;  %v3785_v10 = vadd.f32 %v5413_v17, %v7251_v26  ;;  %4407 = vst [vmem:[%s7259_s17 + $0x138] sm:$0xff] %v4247_v37  ;;  %v4248_v8 = vadd.f32 0.5, %v4108_v50  ;;  %v3623_v59 = vadd.f32 %v7596_v63, %v7254_v28 }
 0x628   : > { %v6041_v58 = vpop.eup %6040  ;;  %v4137_v55 = vmul.f32 0.5, %v6039_v41  ;;  %6062 = vtanh.f32 %v3906_v30  ;;  %4451 = vst.msk [vmem:[%s7259_s17 + $0x298] sm:$0xff] %vm1179_vm0, %v4291_v1  ;;  %v3855_v32 = vmul.f32 0.5, %v3621_v38  ;;  %v3777_v0 = vadd.f32 %v3776_v27, %v7251_v26  ;;  %v7703_v9 = vpop.f32.mrf.mxu1 }
 0x629   : > { %v6043_v36 = vpop.eup %6042  ;;  %v4114_v57 = vmul.f32 0.5, %v6041_v58  ;;  %v3927_v61 = vmul.f32 0.5, %v3785_v10  ;;  %4408 = vst [vmem:[%s7259_s17 + $0x140] sm:$0xff] %v4248_v8  ;;  %v3856_v18 = vmul.f32 0.5, %v3623_v59  ;;  %v3627_v63 = vadd.f32 %v7606_v13, %v7248_v54 }
 0x62a   : > { %v6045_v6 = vpop.eup %6044  ;;  %v4277_v47 = vadd.f32 0.5, %v4137_v55  ;;  %v4172_v20 = vmul.f32 0.5, %v6043_v36  ;;  %6064 = vtanh.f32 %v3855_v32  ;;  %v3913_v24 = vmul.f32 0.5, %v3777_v0  ;;  %v7708_v25 = vpop.f32.mrf.mxu1 }
 0x62b   : > { %v6047_v19 = vpop.eup %6046  ;;  %v4254_v45 = vadd.f32 0.5, %v4114_v57  ;;  %v4115_v39 = vmul.f32 0.5, %v6045_v6  ;;  %6066 = vtanh.f32 %v3927_v61  ;;  %v3862_v4 = vmul.f32 0.5, %v3627_v63 }
 0x62c   : > { %4437 = vst.msk [vmem:[%s7259_s17 + $0x228] sm:$0xff] %vm1179_vm0, %v4277_v47  ;;  %v4312_v26 = vadd.f32 0.5, %v4172_v20  ;;  %v4158_v3 = vmul.f32 0.5, %v6047_v19  ;;  %6068 = vtanh.f32 %v3856_v18  ;;  %v3629_v13 = vadd.f32 %v7615_v2, %v7254_v28  ;;  %v7724_v40 = vpop.f32.mrf.mxu1 }
 0x62d   : > { %4414 = vst [vmem:[%s7259_s17 + $0x170] sm:$0xff] %v4254_v45  ;;  %v4255_v14 = vadd.f32 0.5, %v4115_v39  ;;  %v3631_v29 = vadd.f32 %v7625_v42, %v7248_v54  ;;  %6070 = vtanh.f32 %v3913_v24  ;;  %v3633_v43 = vadd.f32 %v7628_v53, %v7254_v28 }
 0x62e   : > { %v6049_v33 = vpop.eup %6048  ;;  %4472 = vst.msk [vmem:[%s7259_s17 + $0x340] sm:$0xff] %vm1179_vm0, %v4312_v26  ;;  %v4298_v16 = vadd.f32 0.5, %v4158_v3  ;;  %v3637_v17 = vadd.f32 %v7639_v5, %v7248_v54  ;;  %6072 = vtanh.f32 %v3862_v4  ;;  %v3863_v2 = vmul.f32 0.5, %v3629_v13  ;;  %v7733_v1 = vpop.f32.mrf.mxu1 }
 0x62f   : > { %v6051_v22 = vpop.eup %6050  ;;  %4415 = vst [vmem:[%s7259_s17 + $0x178] sm:$0xff] %v4255_v14  ;;  %v4121_v12 = vmul.f32 0.5, %v6049_v33  ;;  %v3869_v35 = vmul.f32 0.5, %v3631_v29  ;;  %v3870_v44 = vmul.f32 0.5, %v3633_v43  ;;  %v3639_v53 = vadd.f32 %v7646_v52, %v7254_v28 }
 0x630   : > { %v6053_v42 = vpop.eup %6052  ;;  %4458 = vst.msk [vmem:[%s7259_s17 + $0x2d0] sm:$0xff] %vm1179_vm0, %v4298_v16  ;;  %v4179_v15 = vmul.f32 0.5, %v6051_v22  ;;  %v3876_v11 = vmul.f32 0.5, %v3637_v17  ;;  %6074 = vtanh.f32 %v3863_v2  ;;  %v3641_v34 = vadd.f32 %v7652_v31, %v7248_v54  ;;  %v3668_v20 = vpop.f32.mrf.mxu1 }
 0x631   : > { %v6055_v48 = vpop.eup %6054  ;;  %v4261_v5 = vadd.f32 0.5, %v4121_v12  ;;  %v4122_v49 = vmul.f32 0.5, %v6053_v42  ;;  %6076 = vtanh.f32 %v3869_v35  ;;  %v3877_v50 = vmul.f32 0.5, %v3639_v53 }
 0x632   : > { %v6057_v21 = vpop.eup %6056  ;;  %v4319_v23 = vadd.f32 0.5, %v4179_v15  ;;  %v4165_v37 = vmul.f32 0.5, %v6055_v48  ;;  %6078 = vtanh.f32 %v3870_v44  ;;  %v3883_v52 = vmul.f32 0.5, %v3641_v34  ;;  %v3670_v33 = vpop.f32.mrf.mxu1 }
 0x633   : > { %v6059_v30 = vpop.eup %6058  ;;  %4421 = vst [vmem:[%s7259_s17 + $0x1a8] sm:$0xff] %v4261_v5  ;;  %v4262_v27 = vadd.f32 0.5, %v4122_v49  ;;  %v4128_v41 = vmul.f32 0.5, %v6057_v21  ;;  %6080 = vtanh.f32 %v3876_v11  ;;  %v3643_v58 = vadd.f32 %v7661_v7, %v7254_v28 }
 0x634   : > { %v6061_v38 = vpop.eup %6060  ;;  %4479 = vst.msk [vmem:[%s7259_s17 + $0x378] sm:$0xff] %vm1179_vm0, %v4319_v23  ;;  %v4305_v31 = vadd.f32 0.5, %v4165_v37  ;;  %v4200_v10 = vmul.f32 0.5, %v6059_v30  ;;  %6082 = vtanh.f32 %v3877_v50  ;;  %v3647_v36 = vadd.f32 %v7669_v62, %v7248_v54  ;;  %v3672_v5 = vpop.f32.mrf.mxu1 }
 0x635   : > { %v6063_v8 = vpop.eup %6062  ;;  %4422 = vst [vmem:[%s7259_s17 + $0x1b0] sm:$0xff] %v4262_v27  ;;  %v4268_v55 = vadd.f32 0.5, %v4128_v41  ;;  %v4129_v59 = vmul.f32 0.5, %v6061_v38  ;;  %6084 = vtanh.f32 %v3883_v52  ;;  %v3884_v61 = vmul.f32 0.5, %v3643_v58 }
 0x636   : > { %4465 = vst.msk [vmem:[%s7259_s17 + $0x308] sm:$0xff] %vm1179_vm0, %v4305_v31  ;;  %v4340_v57 = vadd.f32 0.5, %v4200_v10  ;;  %v4186_v32 = vmul.f32 0.5, %v6063_v8  ;;  %v3890_v6 = vmul.f32 0.5, %v3647_v36  ;;  %v3649_v7 = vadd.f32 %v7675_v56, %v7254_v28 }
 0x637   : > { %4428 = vst [vmem:[%s7259_s17 + $0x1e0] sm:$0xff] %v4268_v55  ;;  %v4269_v0 = vadd.f32 0.5, %v4129_v59  ;;  %v3651_v47 = vadd.f32 %v7682_v51, %v7248_v54  ;;  %v6065_v18 = vpop.eup %6064  ;;  %6086 = vtanh.f32 %v3884_v61  ;;  %v3653_v63 = vadd.f32 %v7687_v46, %v7254_v28 }
 0x638   : > { %4500 = vst.msk [vmem:[%s7259_s17 + $0x420] sm:$0xff] %vm1179_vm0, %v4340_v57  ;;  %v4326_v62 = vadd.f32 0.5, %v4186_v32  ;;  %v3657_v19 = vadd.f32 %v7695_v60, %v7248_v54  ;;  %v6067_v45 = vpop.eup %6066  ;;  %v4135_v39 = vmul.f32 0.5, %v6065_v18  ;;  %6088 = vtanh.f32 %v3890_v6 }
 0x639   : > { %4429 = vst [vmem:[%s7259_s17 + $0x1e8] sm:$0xff] %v4269_v0  ;;  %v3891_v56 = vmul.f32 0.5, %v3649_v7  ;;  %v3897_v24 = vmul.f32 0.5, %v3651_v47  ;;  %v6069_v26 = vpop.eup %6068  ;;  %v4207_v51 = vmul.f32 0.5, %v6067_v45  ;;  %v3898_v3 = vmul.f32 0.5, %v3653_v63 }
 0x63a   : > { %4486 = vst.msk [vmem:[%s7259_s17 + $0x3b0] sm:$0xff] %vm1179_vm0, %v4326_v62  ;;  %v3904_v4 = vmul.f32 0.5, %v3657_v19  ;;  %v3659_v14 = vadd.f32 %v7703_v9, %v7254_v28  ;;  %v6071_v46 = vpop.eup %6070  ;;  %v4275_v13 = vadd.f32 0.5, %v4135_v39  ;;  %v4136_v60 = vmul.f32 0.5, %v6069_v26 }
 0x63b   : > { %6090 = vtanh.f32 %v3891_v56  ;;  %v3661_v29 = vadd.f32 %v7708_v25, %v7248_v54  ;;  %v6073_v16 = vpop.eup %6072  ;;  %v4347_v43 = vadd.f32 0.5, %v4207_v51  ;;  %v4193_v17 = vmul.f32 0.5, %v6071_v46 }
 0x63c   : > { %6092 = vtanh.f32 %v3897_v24  ;;  %v3905_v22 = vmul.f32 0.5, %v3659_v14  ;;  %4435 = vst [vmem:[%s7259_s17 + $0x218] sm:$0xff] %v4275_v13  ;;  %v4276_v12 = vadd.f32 0.5, %v4136_v60  ;;  %v4142_v2 = vmul.f32 0.5, %v6073_v16 }
 0x63d   : > { %6094 = vtanh.f32 %v3898_v3  ;;  %v3911_v9 = vmul.f32 0.5, %v3661_v29  ;;  %v6075_v35 = vpop.eup %6074  ;;  %4507 = vst.msk [vmem:[%s7259_s17 + $0x458] sm:$0xff] %vm1179_vm0, %v4347_v43  ;;  %v4333_v42 = vadd.f32 0.5, %v4193_v17  ;;  %v3663_v25 = vadd.f32 %v7724_v40, %v7254_v28 }
 0x63e   : > { %6096 = vtanh.f32 %v3904_v4  ;;  %v3667_v15 = vadd.f32 %v7733_v1, %v7248_v54  ;;  %v6077_v44 = vpop.eup %6076  ;;  %4436 = vst [vmem:[%s7259_s17 + $0x220] sm:$0xff] %v4276_v12  ;;  %v4282_v11 = vadd.f32 0.5, %v4142_v2  ;;  %v4143_v53 = vmul.f32 0.5, %v6075_v35 }
 0x63f   : > { %6098 = vtanh.f32 %v3905_v22  ;;  %v3669_v48 = vadd.f32 %v3668_v20, %v7254_v28  ;;  %v6079_v49 = vpop.eup %6078  ;;  %4493 = vst.msk [vmem:[%s7259_s17 + $0x3e8] sm:$0xff] %vm1179_vm0, %v4333_v42  ;;  %v4149_v34 = vmul.f32 0.5, %v6077_v44  ;;  %v3912_v21 = vmul.f32 0.5, %v3663_v25 }
 0x640   : > { %6100 = vtanh.f32 %v3911_v9  ;;  %v3918_v40 = vmul.f32 0.5, %v3667_v15  ;;  %v6081_v23 = vpop.eup %6080  ;;  %4442 = vst [vmem:[%s7259_s17 + $0x250] sm:$0xff] %v4282_v11  ;;  %v4283_v37 = vadd.f32 0.5, %v4143_v53  ;;  %v4150_v50 = vmul.f32 0.5, %v6079_v49 }
 0x641   : > { %v3919_v30 = vmul.f32 0.5, %v3669_v48  ;;  %v3671_v27 = vadd.f32 %v3670_v33, %v7248_v54  ;;  %v6083_v41 = vpop.eup %6082  ;;  %v4289_v52 = vadd.f32 0.5, %v4149_v34  ;;  %v4156_v1 = vmul.f32 0.5, %v6081_v23 }
 0x642   : > { %6102 = vtanh.f32 %v3912_v21  ;;  %v3673_v38 = vadd.f32 %v3672_v5, %v7254_v28  ;;  %v6085_v31 = vpop.eup %6084  ;;  %4443 = vst [vmem:[%s7259_s17 + $0x258] sm:$0xff] %v4283_v37  ;;  %v4290_v10 = vadd.f32 0.5, %v4150_v50  ;;  %v4157_v58 = vmul.f32 0.5, %v6083_v41 }
 0x643   : > { %6104 = vtanh.f32 %v3918_v40  ;;  %v3925_v8 = vmul.f32 0.5, %v3671_v27  ;;  %4449 = vst [vmem:[%s7259_s17 + $0x288] sm:$0xff] %v4289_v52  ;;  %v4296_v55 = vadd.f32 0.5, %v4156_v1  ;;  %v4163_v59 = vmul.f32 0.5, %v6085_v31 }
 0x644   : > { %6106 = vtanh.f32 %v3919_v30  ;;  %v3926_v54 = vmul.f32 0.5, %v3673_v38  ;;  %v6087_v36 = vpop.eup %6086  ;;  %4450 = vst [vmem:[%s7259_s17 + $0x290] sm:$0xff] %v4290_v10  ;;  %v4297_v57 = vadd.f32 0.5, %v4157_v58 }
 0x645   : > { %6108 = vtanh.f32 %v3925_v8  ;;  %v6089_v28 = vpop.eup %6088  ;;  %4456 = vst [vmem:[%s7259_s17 + $0x2c0] sm:$0xff] %v4296_v55  ;;  %v4303_v32 = vadd.f32 0.5, %v4163_v59  ;;  %v4164_v61 = vmul.f32 0.5, %v6087_v36 }
 0x646   : > { %6110 = vtanh.f32 %v3926_v54  ;;  %4457 = vst [vmem:[%s7259_s17 + $0x2c8] sm:$0xff] %v4297_v57  ;;  %v4170_v0 = vmul.f32 0.5, %v6089_v28 }
 0x647   : > { %4463 = vst [vmem:[%s7259_s17 + $0x2f8] sm:$0xff] %v4303_v32  ;;  %v4304_v7 = vadd.f32 0.5, %v4164_v61 }
 0x648   : > { %v6091_v6 = vpop.eup %6090  ;;  %v4310_v20 = vadd.f32 0.5, %v4170_v0 }
 0x649   : > { %v6093_v47 = vpop.eup %6092  ;;  %v4171_v18 = vmul.f32 0.5, %v6091_v6  ;;  %4464 = vst [vmem:[%s7259_s17 + $0x300] sm:$0xff] %v4304_v7 }
 0x64a   : > { %v6095_v62 = vpop.eup %6094  ;;  %v4177_v63 = vmul.f32 0.5, %v6093_v47  ;;  %4470 = vst [vmem:[%s7259_s17 + $0x330] sm:$0xff] %v4310_v20 }
 0x64b   : > { %v6097_v19 = vpop.eup %6096  ;;  %v4311_v45 = vadd.f32 0.5, %v4171_v18  ;;  %v4178_v39 = vmul.f32 0.5, %v6095_v62 }
 0x64c   : > { %v6099_v56 = vpop.eup %6098  ;;  %v4317_v24 = vadd.f32 0.5, %v4177_v63  ;;  %v4184_v26 = vmul.f32 0.5, %v6097_v19 }
 0x64d   : > { %v6101_v51 = vpop.eup %6100  ;;  %4471 = vst [vmem:[%s7259_s17 + $0x338] sm:$0xff] %v4311_v45  ;;  %v4318_v3 = vadd.f32 0.5, %v4178_v39  ;;  %v4185_v4 = vmul.f32 0.5, %v6099_v56 }
 0x64e   : > { %4477 = vst [vmem:[%s7259_s17 + $0x368] sm:$0xff] %v4317_v24  ;;  %v4324_v14 = vadd.f32 0.5, %v4184_v26  ;;  %v4191_v46 = vmul.f32 0.5, %v6101_v51 }
 0x64f   : > { %v6103_v13 = vpop.eup %6102  ;;  %4478 = vst [vmem:[%s7259_s17 + $0x370] sm:$0xff] %v4318_v3  ;;  %v4325_v60 = vadd.f32 0.5, %v4185_v4 }
 0x650   : > { %v6105_v29 = vpop.eup %6104  ;;  %4484 = vst [vmem:[%s7259_s17 + $0x3a0] sm:$0xff] %v4324_v14  ;;  %v4331_v33 = vadd.f32 0.5, %v4191_v46  ;;  %v4192_v16 = vmul.f32 0.5, %v6103_v13 }
 0x651   : > { %v6107_v43 = vpop.eup %6106  ;;  %4485 = vst [vmem:[%s7259_s17 + $0x3a8] sm:$0xff] %v4325_v60  ;;  %v4198_v17 = vmul.f32 0.5, %v6105_v29 }
 0x652   : > { %v6109_v22 = vpop.eup %6108  ;;  %4491 = vst [vmem:[%s7259_s17 + $0x3d8] sm:$0xff] %v4331_v33  ;;  %v4332_v12 = vadd.f32 0.5, %v4192_v16  ;;  %v4199_v2 = vmul.f32 0.5, %v6107_v43 }
 0x653   : > { %v6111_v9 = vpop.eup %6110  ;;  %v4338_v35 = vadd.f32 0.5, %v4198_v17  ;;  %v4205_v42 = vmul.f32 0.5, %v6109_v22 }
 0x654   : > { %4492 = vst [vmem:[%s7259_s17 + $0x3e0] sm:$0xff] %v4332_v12  ;;  %v4339_v25 = vadd.f32 0.5, %v4199_v2  ;;  %v4206_v15 = vmul.f32 0.5, %v6111_v9 }
 0x655   : > { %4498 = vst [vmem:[%s7259_s17 + $0x410] sm:$0xff] %v4338_v35  ;;  %v4345_v44 = vadd.f32 0.5, %v4205_v42 }
 0x656   : > { %4499 = vst [vmem:[%s7259_s17 + $0x418] sm:$0xff] %v4339_v25  ;;  %v4346_v11 = vadd.f32 0.5, %v4206_v15 }
 0x657   : > { %4505 = vst [vmem:[%s7259_s17 + $0x448] sm:$0xff] %v4345_v44 }
 0x658   : > { %4506 = vst [vmem:[%s7259_s17 + $0x450] sm:$0xff] %v4346_v11 }
 0x659 PF: > { %s20_s30 = sadd.s32 1, %s6118_s30  }
 0x65a   : > { %p17_p4 = scmp.ge.s32.totalorder %s20_s30, 4  }
 0x65c   :  { %19 = sbr.rel (!%p17_p4) target bundleno = 1 (0x1), region = 95 }

</bundles_post_ra>
